<compile_context>
chip_gen: v5e
topology: v5e:2x2
jax: 0.10.0
libtpu: 0.0.40
codegen_flags: <defaults>
</compile_context>

<pallas_src>
import functools

import jax
import jax.numpy as jnp
from jax.experimental import pallas as pl
from jax.experimental.pallas import tpu as pltpu


def _round_up(x, m):
    return (x + m - 1) // m * m


# -----------------------------------------------------------------------------
# Fused kernel.  grid = (B // TB,), one step per batch tile, "parallel".
#   x_pad   : [TB, H+2, W+2, C]  bf16   (NHWC, 1-px halo; pipelined per step)
#   w_conv  : [9, C, Dp]         bf16   ((kh,kw)-major; resident)
#   b_conv  : [1, Dp]            f32
#   w1c     : [Dp, Dp+Np]        bf16   (head layer-1 || classifier, fused)
#   b1, bc  : [1, Dp] / [1, Np]  f32
#   w2, b2  : [Dp, Fp] / [1, Fp] bf16 / f32
#   out     : [1, TB, Dp+Fp+Np]  f32    ([ fm | feature | logits ], lane-dense)
# -----------------------------------------------------------------------------
def _fused_kernel(x_ref, wconv_ref, bconv_ref, w1c_ref, b1_ref, bc_ref,
                  w2_ref, b2_ref, out_ref, *, TB, H, W, C, Dp, Fp, Np, inv_P):
    M = TB * H * W

    # Conv-as-9-shifted-matmuls (im2col fused in-register), bf16 x bf16 -> f32.
    acc = jnp.zeros((M, Dp), jnp.float32)
    for dh in range(3):
        for dw in range(3):
            xs = x_ref[:, dh:dh + H, dw:dw + W, :]            # [TB, H, W, C] bf16
            acc = acc + jnp.dot(xs.reshape(M, C), wconv_ref[dh * 3 + dw],
                                preferred_element_type=jnp.float32)

    y = jnp.maximum(acc + bconv_ref[...], 0.0)                # bias + ReLU  [M, Dp] f32
    # Global average pool (f32 accumulation path).
    fm = jnp.sum(y.reshape(TB, H * W, Dp), axis=1) * inv_P    # [TB, Dp] f32
    fm_bf = fm.astype(jnp.bfloat16)

    # Head layer-1 and classifier share fm -> single fused matmul, split at lane 128.
    hz = jnp.dot(fm_bf, w1c_ref[...], preferred_element_type=jnp.float32)   # [TB, Dp+Np]
    h = jnp.maximum(hz[:, :Dp] + b1_ref[...], 0.0)
    logits = hz[:, Dp:] + bc_ref[...]                          # detach_cls: identity fwd
    feat = jnp.dot(h.astype(jnp.bfloat16), w2_ref[...],
                   preferred_element_type=jnp.float32) + b2_ref[...]

    # Lane-dense, 128-aligned stores (no concatenate / masked vst).
    out_ref[0, :, 0:Dp] = fm
    out_ref[0, :, Dp:Dp + Fp] = feat
    out_ref[0, :, Dp + Fp:] = logits


@functools.partial(jax.jit, static_argnames=("input_dim", "feature_dim", "n_classes"))
def general_module_forward(x, params, *, input_dim, feature_dim, n_classes):
    B, C, H, W = x.shape
    D, F, N = input_dim, feature_dim, n_classes
    Dp = _round_up(D, 128)
    Fp = _round_up(F, 128)
    Np = _round_up(N, 128)
    OUTW = Dp + Fp + Np

    # Only plain-JAX glue: NCHW -> NHWC, 1-px halo pad, bf16 cast (single HBM pass).
    x_pad = jnp.pad(jnp.transpose(x, (0, 2, 3, 1)),
                    ((0, 0), (1, 1), (1, 1), (0, 0))).astype(jnp.bfloat16)

    # Batch tile: keep >= 2 grid steps whenever B >= 2 so v7x's two TCs both work.
    TB = 1
    for cand in (8, 4, 2):
        if B % cand == 0 and B // cand >= 2:
            TB = cand
            break
    nb = B // TB

    kernel = functools.partial(_fused_kernel, TB=TB, H=H, W=W, C=C,
                               Dp=Dp, Fp=Fp, Np=Np, inv_P=1.0 / float(H * W))

    out = pl.pallas_call(
        kernel,
        out_shape=jax.ShapeDtypeStruct((nb, TB, OUTW), jnp.float32),
        grid_spec=pltpu.PrefetchScalarGridSpec(
            num_scalar_prefetch=0,
            grid=(nb,),
            in_specs=[
                pl.BlockSpec((TB, H + 2, W + 2, C), lambda b: (b, 0, 0, 0)),  # x (pipelined)
                pl.BlockSpec((9, C, Dp),      lambda b: (0, 0, 0)),           # w_conv (resident)
                pl.BlockSpec((1, Dp),         lambda b: (0, 0)),              # b_conv
                pl.BlockSpec((Dp, Dp + Np),   lambda b: (0, 0)),              # w1 || wc
                pl.BlockSpec((1, Dp),         lambda b: (0, 0)),              # b1
                pl.BlockSpec((1, Np),         lambda b: (0, 0)),              # bc
                pl.BlockSpec((Dp, Fp),        lambda b: (0, 0)),              # w2
                pl.BlockSpec((1, Fp),         lambda b: (0, 0)),              # b2
            ],
            out_specs=pl.BlockSpec((1, TB, OUTW), lambda b: (b, 0, 0)),
        ),
        compiler_params=pltpu.CompilerParams(
            dimension_semantics=("parallel",),
        ),
    )(x_pad, params["w_conv"], params["b_conv"], params["w1c"], params["b1"],
      params["bc"], params["w2"], params["b2"])

    out = out.reshape(B, OUTW)
    # ResnetOutput container -> dict (strip lane padding).
    return {"feature_map": out[:, :D],
            "feature": out[:, Dp:Dp + F],
            "logits": out[:, Dp + Fp:Dp + Fp + N]}


def init_params(key, in_ch, input_dim, feature_dim, n_classes):
    D, F, N = input_dim, feature_dim, n_classes
    Dp = _round_up(D, 128)
    Fp = _round_up(F, 128)
    Np = _round_up(N, 128)
    ks = jax.random.split(key, 4)

    def lin(k, fan_in, shape):
        return jax.random.normal(k, shape, jnp.float32) / jnp.sqrt(fan_in)

    # Backbone conv weight laid out [9, C, D] with (kh, kw)-major ordering.
    # (Porting a real PyTorch Conv2d weight [D, C, 3, 3]: w.permute(2, 3, 1, 0).reshape(9, C, D).)
    w_conv = jnp.pad(lin(ks[0], in_ch * 9, (9, in_ch, D)), ((0, 0), (0, 0), (0, Dp - D)))

    # Head MLP2 layer-1 (D -> D) and classifier (D -> N), concatenated on output columns.
    w1 = jnp.pad(lin(ks[1], D, (D, D)), ((0, Dp - D), (0, Dp - D)))
    wc = jnp.pad(lin(ks[3], D, (D, N)), ((0, Dp - D), (0, Np - N)))
    w1c = jnp.concatenate([w1, wc], axis=1)                     # [Dp, Dp + Np]

    w2 = jnp.pad(lin(ks[2], D, (D, F)), ((0, Dp - D), (0, Fp - F)))

    b1 = jnp.pad(0.01 * jnp.ones((1, D), jnp.float32), ((0, 0), (0, Dp - D)))
    b2 = jnp.pad(0.01 * jnp.ones((1, F), jnp.float32), ((0, 0), (0, Fp - F)))

    return {
        "w_conv": w_conv.astype(jnp.bfloat16),
        "b_conv": jnp.zeros((1, Dp), jnp.float32),
        "w1c": w1c.astype(jnp.bfloat16),
        "b1": b1,
        "bc": jnp.zeros((1, Np), jnp.float32),
        "w2": w2.astype(jnp.bfloat16),
        "b2": b2,
    }


def _reference_forward(x, params, input_dim, feature_dim, n_classes):
    """Plain-JAX reference mirroring the kernel's bf16-operand / f32-accumulate math."""
    B, C, H, W = x.shape
    D, F, N = input_dim, feature_dim, n_classes
    Dp = params["b1"].shape[1]

    xp = jnp.pad(jnp.transpose(x, (0, 2, 3, 1)), ((0, 0), (1, 1), (1, 1), (0, 0)))
    xp = xp.astype(jnp.bfloat16).astype(jnp.float32)
    wconv = params["w_conv"].astype(jnp.float32)                # [9, C, Dp]

    y = jnp.zeros((B, H, W, Dp), jnp.float32)
    for dh in range(3):
        for dw in range(3):
            xs = xp[:, dh:dh + H, dw:dw + W, :]
            y = y + jnp.einsum("bhwc,cd->bhwd", xs, wconv[dh * 3 + dw])
    y = jnp.maximum(y + params["b_conv"][0], 0.0)
    fm = jnp.mean(y.reshape(B, H * W, Dp), axis=1)              # [B, Dp] f32
    fm_bf = fm.astype(jnp.bfloat16).astype(jnp.float32)

    hz = fm_bf @ params["w1c"].astype(jnp.float32)
    h = jnp.maximum(hz[:, :Dp] + params["b1"], 0.0)
    logits = hz[:, Dp:] + params["bc"]
    feat = (h.astype(jnp.bfloat16).astype(jnp.float32) @ params["w2"].astype(jnp.float32)
            + params["b2"])
    return {"feature_map": fm[:, :D], "feature": feat[:, :F], "logits": logits[:, :N]}


if __name__ == "__main__":
    B, C, H, W = 2, 4, 16, 16
    INPUT_DIM = 32      # backbone.feature_dim
    FEATURE_DIM = 64    # GeneralModule(feature_dim=64)
    N_CLASSES = 10

    key = jax.random.PRNGKey(0)
    kx, kp = jax.random.split(key)
    x = jax.random.normal(kx, (B, C, H, W), jnp.float32)
    params = init_params(kp, C, INPUT_DIM, FEATURE_DIM, N_CLASSES)

    out = general_module_forward(x, params, input_dim=INPUT_DIM,
                                 feature_dim=FEATURE_DIM, n_classes=N_CLASSES)
    out = jax.tree_util.tree_map(jax.block_until_ready, out)

    assert out["feature_map"].shape == (B, INPUT_DIM)
    assert out["feature"].shape == (B, FEATURE_DIM)
    assert out["logits"].shape == (B, N_CLASSES)
    assert all(bool(jnp.isfinite(v).all()) for v in out.values())

    ref = _reference_forward(x, params, INPUT_DIM, FEATURE_DIM, N_CLASSES)
    for name in ("feature_map", "feature", "logits"):
        assert bool(jnp.allclose(out[name], ref[name], atol=2e-2, rtol=2e-2)), name

    print("KERNEL_OK")
</pallas_src>

<mosaic_0001>
module attributes {stable_mosaic.version = 11 : i64} {
  func.func @_fused_kernel(%arg0: i32, %arg1: memref<1x18x18x4xbf16, #tpu.memory_space<vmem>>, %arg2: memref<9x4x128xbf16, #tpu.memory_space<vmem>>, %arg3: memref<1x128xf32, #tpu.memory_space<vmem>>, %arg4: memref<128x256xbf16, #tpu.memory_space<vmem>>, %arg5: memref<1x128xf32, #tpu.memory_space<vmem>>, %arg6: memref<1x128xf32, #tpu.memory_space<vmem>>, %arg7: memref<128x128xbf16, #tpu.memory_space<vmem>>, %arg8: memref<1x128xf32, #tpu.memory_space<vmem>>, %arg9: memref<1x1x384xf32, #tpu.memory_space<vmem>>) attributes {dimension_semantics = [#tpu.dimension_semantics<parallel>], iteration_bounds = array<i64: 2>, scalar_prefetch = 0 : i64, scratch_operands = 0 : i64, tpu.core_type = #tpu.core_type<tc>, window_params = [{transform_indices = @transform_0, window_bounds = array<i64: 1, 18, 18, 4>}, {pipeline_mode = #tpu.pipeline_mode<synchronous>, transform_indices = @transform_1, window_bounds = array<i64: 9, 4, 128>}, {pipeline_mode = #tpu.pipeline_mode<synchronous>, transform_indices = @transform_2, window_bounds = array<i64: 1, 128>}, {pipeline_mode = #tpu.pipeline_mode<synchronous>, transform_indices = @transform_3, window_bounds = array<i64: 128, 256>}, {pipeline_mode = #tpu.pipeline_mode<synchronous>, transform_indices = @transform_4, window_bounds = array<i64: 1, 128>}, {pipeline_mode = #tpu.pipeline_mode<synchronous>, transform_indices = @transform_5, window_bounds = array<i64: 1, 128>}, {pipeline_mode = #tpu.pipeline_mode<synchronous>, transform_indices = @transform_6, window_bounds = array<i64: 128, 128>}, {pipeline_mode = #tpu.pipeline_mode<synchronous>, transform_indices = @transform_7, window_bounds = array<i64: 1, 128>}, {transform_indices = @transform_8, window_bounds = array<i64: 1, 1, 384>}]} {
    %cst = arith.constant 0.000000e+00 : f32
    %0 = vector.broadcast %cst : f32 to vector<256x128xf32>
    %c0 = arith.constant 0 : index
    %c0_0 = arith.constant 0 : index
    %c0_1 = arith.constant 0 : index
    %c0_2 = arith.constant 0 : index
    %1 = vector.load %arg1[%c0, %c0_0, %c0_1, %c0_2] : memref<1x18x18x4xbf16, #tpu.memory_space<vmem>>, vector<1x16x16x4xbf16>
    %2 = vector.shape_cast %1 : vector<1x16x16x4xbf16> to vector<256x4xbf16>
    %c0_3 = arith.constant 0 : index
    %c0_4 = arith.constant 0 : index
    %c0_5 = arith.constant 0 : index
    %3 = vector.load %arg2[%c0_3, %c0_4, %c0_5] : memref<9x4x128xbf16, #tpu.memory_space<vmem>>, vector<1x4x128xbf16>
    %4 = vector.shape_cast %3 : vector<1x4x128xbf16> to vector<4x128xbf16>
    %cst_6 = arith.constant dense<0.000000e+00> : vector<256x128xf32>
    %5 = tpu.matmul %2, %4, %cst_6 {dimension_numbers = #tpu.dot_dimension_numbers<[1], [0], [0], [1], [0, 0, 1, 1], [], []>} : vector<256x4xbf16>, vector<4x128xbf16>, vector<256x128xf32> -> vector<256x128xf32>
    %6 = arith.addf %0, %5 : vector<256x128xf32>
    %c0_7 = arith.constant 0 : index
    %c0_8 = arith.constant 0 : index
    %c1 = arith.constant 1 : index
    %c0_9 = arith.constant 0 : index
    %7 = vector.load %arg1[%c0_7, %c0_8, %c1, %c0_9] : memref<1x18x18x4xbf16, #tpu.memory_space<vmem>>, vector<1x16x16x4xbf16>
    %8 = vector.shape_cast %7 : vector<1x16x16x4xbf16> to vector<256x4xbf16>
    %c1_10 = arith.constant 1 : index
    %c0_11 = arith.constant 0 : index
    %c0_12 = arith.constant 0 : index
    %9 = vector.load %arg2[%c1_10, %c0_11, %c0_12] : memref<9x4x128xbf16, #tpu.memory_space<vmem>>, vector<1x4x128xbf16>
    %10 = vector.shape_cast %9 : vector<1x4x128xbf16> to vector<4x128xbf16>
    %cst_13 = arith.constant dense<0.000000e+00> : vector<256x128xf32>
    %11 = tpu.matmul %8, %10, %cst_13 {dimension_numbers = #tpu.dot_dimension_numbers<[1], [0], [0], [1], [0, 0, 1, 1], [], []>} : vector<256x4xbf16>, vector<4x128xbf16>, vector<256x128xf32> -> vector<256x128xf32>
    %12 = arith.addf %6, %11 : vector<256x128xf32>
    %c0_14 = arith.constant 0 : index
    %c0_15 = arith.constant 0 : index
    %c2 = arith.constant 2 : index
    %c0_16 = arith.constant 0 : index
    %13 = vector.load %arg1[%c0_14, %c0_15, %c2, %c0_16] : memref<1x18x18x4xbf16, #tpu.memory_space<vmem>>, vector<1x16x16x4xbf16>
    %14 = vector.shape_cast %13 : vector<1x16x16x4xbf16> to vector<256x4xbf16>
    %c2_17 = arith.constant 2 : index
    %c0_18 = arith.constant 0 : index
    %c0_19 = arith.constant 0 : index
    %15 = vector.load %arg2[%c2_17, %c0_18, %c0_19] : memref<9x4x128xbf16, #tpu.memory_space<vmem>>, vector<1x4x128xbf16>
    %16 = vector.shape_cast %15 : vector<1x4x128xbf16> to vector<4x128xbf16>
    %cst_20 = arith.constant dense<0.000000e+00> : vector<256x128xf32>
    %17 = tpu.matmul %14, %16, %cst_20 {dimension_numbers = #tpu.dot_dimension_numbers<[1], [0], [0], [1], [0, 0, 1, 1], [], []>} : vector<256x4xbf16>, vector<4x128xbf16>, vector<256x128xf32> -> vector<256x128xf32>
    %18 = arith.addf %12, %17 : vector<256x128xf32>
    %c0_21 = arith.constant 0 : index
    %c1_22 = arith.constant 1 : index
    %c0_23 = arith.constant 0 : index
    %c0_24 = arith.constant 0 : index
    %19 = vector.load %arg1[%c0_21, %c1_22, %c0_23, %c0_24] : memref<1x18x18x4xbf16, #tpu.memory_space<vmem>>, vector<1x16x16x4xbf16>
    %20 = vector.shape_cast %19 : vector<1x16x16x4xbf16> to vector<256x4xbf16>
    %c3 = arith.constant 3 : index
    %c0_25 = arith.constant 0 : index
    %c0_26 = arith.constant 0 : index
    %21 = vector.load %arg2[%c3, %c0_25, %c0_26] : memref<9x4x128xbf16, #tpu.memory_space<vmem>>, vector<1x4x128xbf16>
    %22 = vector.shape_cast %21 : vector<1x4x128xbf16> to vector<4x128xbf16>
    %cst_27 = arith.constant dense<0.000000e+00> : vector<256x128xf32>
    %23 = tpu.matmul %20, %22, %cst_27 {dimension_numbers = #tpu.dot_dimension_numbers<[1], [0], [0], [1], [0, 0, 1, 1], [], []>} : vector<256x4xbf16>, vector<4x128xbf16>, vector<256x128xf32> -> vector<256x128xf32>
    %24 = arith.addf %18, %23 : vector<256x128xf32>
    %c0_28 = arith.constant 0 : index
    %c1_29 = arith.constant 1 : index
    %c1_30 = arith.constant 1 : index
    %c0_31 = arith.constant 0 : index
    %25 = vector.load %arg1[%c0_28, %c1_29, %c1_30, %c0_31] : memref<1x18x18x4xbf16, #tpu.memory_space<vmem>>, vector<1x16x16x4xbf16>
    %26 = vector.shape_cast %25 : vector<1x16x16x4xbf16> to vector<256x4xbf16>
    %c4 = arith.constant 4 : index
    %c0_32 = arith.constant 0 : index
    %c0_33 = arith.constant 0 : index
    %27 = vector.load %arg2[%c4, %c0_32, %c0_33] : memref<9x4x128xbf16, #tpu.memory_space<vmem>>, vector<1x4x128xbf16>
    %28 = vector.shape_cast %27 : vector<1x4x128xbf16> to vector<4x128xbf16>
    %cst_34 = arith.constant dense<0.000000e+00> : vector<256x128xf32>
    %29 = tpu.matmul %26, %28, %cst_34 {dimension_numbers = #tpu.dot_dimension_numbers<[1], [0], [0], [1], [0, 0, 1, 1], [], []>} : vector<256x4xbf16>, vector<4x128xbf16>, vector<256x128xf32> -> vector<256x128xf32>
    %30 = arith.addf %24, %29 : vector<256x128xf32>
    %c0_35 = arith.constant 0 : index
    %c1_36 = arith.constant 1 : index
    %c2_37 = arith.constant 2 : index
    %c0_38 = arith.constant 0 : index
    %31 = vector.load %arg1[%c0_35, %c1_36, %c2_37, %c0_38] : memref<1x18x18x4xbf16, #tpu.memory_space<vmem>>, vector<1x16x16x4xbf16>
    %32 = vector.shape_cast %31 : vector<1x16x16x4xbf16> to vector<256x4xbf16>
    %c5 = arith.constant 5 : index
    %c0_39 = arith.constant 0 : index
    %c0_40 = arith.constant 0 : index
    %33 = vector.load %arg2[%c5, %c0_39, %c0_40] : memref<9x4x128xbf16, #tpu.memory_space<vmem>>, vector<1x4x128xbf16>
    %34 = vector.shape_cast %33 : vector<1x4x128xbf16> to vector<4x128xbf16>
    %cst_41 = arith.constant dense<0.000000e+00> : vector<256x128xf32>
    %35 = tpu.matmul %32, %34, %cst_41 {dimension_numbers = #tpu.dot_dimension_numbers<[1], [0], [0], [1], [0, 0, 1, 1], [], []>} : vector<256x4xbf16>, vector<4x128xbf16>, vector<256x128xf32> -> vector<256x128xf32>
    %36 = arith.addf %30, %35 : vector<256x128xf32>
    %c0_42 = arith.constant 0 : index
    %c2_43 = arith.constant 2 : index
    %c0_44 = arith.constant 0 : index
    %c0_45 = arith.constant 0 : index
    %37 = vector.load %arg1[%c0_42, %c2_43, %c0_44, %c0_45] : memref<1x18x18x4xbf16, #tpu.memory_space<vmem>>, vector<1x16x16x4xbf16>
    %38 = vector.shape_cast %37 : vector<1x16x16x4xbf16> to vector<256x4xbf16>
    %c6 = arith.constant 6 : index
    %c0_46 = arith.constant 0 : index
    %c0_47 = arith.constant 0 : index
    %39 = vector.load %arg2[%c6, %c0_46, %c0_47] : memref<9x4x128xbf16, #tpu.memory_space<vmem>>, vector<1x4x128xbf16>
    %40 = vector.shape_cast %39 : vector<1x4x128xbf16> to vector<4x128xbf16>
    %cst_48 = arith.constant dense<0.000000e+00> : vector<256x128xf32>
    %41 = tpu.matmul %38, %40, %cst_48 {dimension_numbers = #tpu.dot_dimension_numbers<[1], [0], [0], [1], [0, 0, 1, 1], [], []>} : vector<256x4xbf16>, vector<4x128xbf16>, vector<256x128xf32> -> vector<256x128xf32>
    %42 = arith.addf %36, %41 : vector<256x128xf32>
    %c0_49 = arith.constant 0 : index
    %c2_50 = arith.constant 2 : index
    %c1_51 = arith.constant 1 : index
    %c0_52 = arith.constant 0 : index
    %43 = vector.load %arg1[%c0_49, %c2_50, %c1_51, %c0_52] : memref<1x18x18x4xbf16, #tpu.memory_space<vmem>>, vector<1x16x16x4xbf16>
    %44 = vector.shape_cast %43 : vector<1x16x16x4xbf16> to vector<256x4xbf16>
    %c7 = arith.constant 7 : index
    %c0_53 = arith.constant 0 : index
    %c0_54 = arith.constant 0 : index
    %45 = vector.load %arg2[%c7, %c0_53, %c0_54] : memref<9x4x128xbf16, #tpu.memory_space<vmem>>, vector<1x4x128xbf16>
    %46 = vector.shape_cast %45 : vector<1x4x128xbf16> to vector<4x128xbf16>
    %cst_55 = arith.constant dense<0.000000e+00> : vector<256x128xf32>
    %47 = tpu.matmul %44, %46, %cst_55 {dimension_numbers = #tpu.dot_dimension_numbers<[1], [0], [0], [1], [0, 0, 1, 1], [], []>} : vector<256x4xbf16>, vector<4x128xbf16>, vector<256x128xf32> -> vector<256x128xf32>
    %48 = arith.addf %42, %47 : vector<256x128xf32>
    %c0_56 = arith.constant 0 : index
    %c2_57 = arith.constant 2 : index
    %c2_58 = arith.constant 2 : index
    %c0_59 = arith.constant 0 : index
    %49 = vector.load %arg1[%c0_56, %c2_57, %c2_58, %c0_59] : memref<1x18x18x4xbf16, #tpu.memory_space<vmem>>, vector<1x16x16x4xbf16>
    %50 = vector.shape_cast %49 : vector<1x16x16x4xbf16> to vector<256x4xbf16>
    %c8 = arith.constant 8 : index
    %c0_60 = arith.constant 0 : index
    %c0_61 = arith.constant 0 : index
    %51 = vector.load %arg2[%c8, %c0_60, %c0_61] : memref<9x4x128xbf16, #tpu.memory_space<vmem>>, vector<1x4x128xbf16>
    %52 = vector.shape_cast %51 : vector<1x4x128xbf16> to vector<4x128xbf16>
    %cst_62 = arith.constant dense<0.000000e+00> : vector<256x128xf32>
    %53 = tpu.matmul %50, %52, %cst_62 {dimension_numbers = #tpu.dot_dimension_numbers<[1], [0], [0], [1], [0, 0, 1, 1], [], []>} : vector<256x4xbf16>, vector<4x128xbf16>, vector<256x128xf32> -> vector<256x128xf32>
    %54 = arith.addf %48, %53 : vector<256x128xf32>
    %c0_63 = arith.constant 0 : index
    %c0_64 = arith.constant 0 : index
    %55 = vector.load %arg3[%c0_63, %c0_64] : memref<1x128xf32, #tpu.memory_space<vmem>>, vector<1x128xf32>
    %56 = vector.broadcast %55 : vector<1x128xf32> to vector<256x128xf32>
    %57 = arith.addf %54, %56 : vector<256x128xf32>
    %cst_65 = arith.constant 0.000000e+00 : f32
    %58 = vector.broadcast %cst_65 : f32 to vector<256x128xf32>
    %59 = arith.maximumf %57, %58 : vector<256x128xf32>
    %60 = vector.shape_cast %59 : vector<256x128xf32> to vector<1x256x128xf32>
    %cst_66 = arith.constant dense<0.000000e+00> : vector<1x128xf32>
    %61 = vector.multi_reduction <add>, %60, %cst_66 [1] : vector<1x256x128xf32> to vector<1x128xf32>
    %cst_67 = arith.constant 3.906250e-03 : f32
    %62 = vector.broadcast %cst_67 : f32 to vector<1x128xf32>
    %63 = arith.mulf %61, %62 : vector<1x128xf32>
    %64 = arith.truncf %63 : vector<1x128xf32> to vector<1x128xbf16>
    %c0_68 = arith.constant 0 : index
    %c0_69 = arith.constant 0 : index
    %65 = vector.load %arg4[%c0_68, %c0_69] : memref<128x256xbf16, #tpu.memory_space<vmem>>, vector<128x256xbf16>
    %cst_70 = arith.constant dense<0.000000e+00> : vector<1x256xf32>
    %66 = tpu.matmul %64, %65, %cst_70 {dimension_numbers = #tpu.dot_dimension_numbers<[1], [0], [0], [1], [0, 0, 1, 1], [], []>} : vector<1x128xbf16>, vector<128x256xbf16>, vector<1x256xf32> -> vector<1x256xf32>
    %67 = vector.extract_strided_slice %66 {offsets = [0, 0], sizes = [1, 128], strides = [1, 1]} : vector<1x256xf32> to vector<1x128xf32>
    %c0_71 = arith.constant 0 : index
    %c0_72 = arith.constant 0 : index
    %68 = vector.load %arg5[%c0_71, %c0_72] : memref<1x128xf32, #tpu.memory_space<vmem>>, vector<1x128xf32>
    %69 = arith.addf %67, %68 : vector<1x128xf32>
    %cst_73 = arith.constant 0.000000e+00 : f32
    %70 = vector.broadcast %cst_73 : f32 to vector<1x128xf32>
    %71 = arith.maximumf %69, %70 : vector<1x128xf32>
    %72 = vector.extract_strided_slice %66 {offsets = [0, 128], sizes = [1, 128], strides = [1, 1]} : vector<1x256xf32> to vector<1x128xf32>
    %c0_74 = arith.constant 0 : index
    %c0_75 = arith.constant 0 : index
    %73 = vector.load %arg6[%c0_74, %c0_75] : memref<1x128xf32, #tpu.memory_space<vmem>>, vector<1x128xf32>
    %74 = arith.addf %72, %73 : vector<1x128xf32>
    %75 = arith.truncf %71 : vector<1x128xf32> to vector<1x128xbf16>
    %c0_76 = arith.constant 0 : index
    %c0_77 = arith.constant 0 : index
    %76 = vector.load %arg7[%c0_76, %c0_77] : memref<128x128xbf16, #tpu.memory_space<vmem>>, vector<128x128xbf16>
    %cst_78 = arith.constant dense<0.000000e+00> : vector<1x128xf32>
    %77 = tpu.matmul %75, %76, %cst_78 {dimension_numbers = #tpu.dot_dimension_numbers<[1], [0], [0], [1], [0, 0, 1, 1], [], []>} : vector<1x128xbf16>, vector<128x128xbf16>, vector<1x128xf32> -> vector<1x128xf32>
    %c0_79 = arith.constant 0 : index
    %c0_80 = arith.constant 0 : index
    %78 = vector.load %arg8[%c0_79, %c0_80] : memref<1x128xf32, #tpu.memory_space<vmem>>, vector<1x128xf32>
    %79 = arith.addf %77, %78 : vector<1x128xf32>
    %c0_81 = arith.constant 0 : index
    %c0_82 = arith.constant 0 : index
    %c0_83 = arith.constant 0 : index
    %80 = vector.load %arg9[%c0_81, %c0_82, %c0_83] : memref<1x1x384xf32, #tpu.memory_space<vmem>>, vector<1x1x128xf32>
    %81 = vector.shape_cast %80 : vector<1x1x128xf32> to vector<1x128xf32>
    %82 = vector.shape_cast %63 : vector<1x128xf32> to vector<1x1x128xf32>
    tpu.vector_store %arg9[%c0_81, %c0_82, %c0_83], %82 {strides = array<i32>} : memref<1x1x384xf32, #tpu.memory_space<vmem>>, vector<1x1x128xf32>,
    %c0_84 = arith.constant 0 : index
    %c0_85 = arith.constant 0 : index
    %c128 = arith.constant 128 : index
    %83 = vector.load %arg9[%c0_84, %c0_85, %c128] : memref<1x1x384xf32, #tpu.memory_space<vmem>>, vector<1x1x128xf32>
    %84 = vector.shape_cast %83 : vector<1x1x128xf32> to vector<1x128xf32>
    %85 = vector.shape_cast %79 : vector<1x128xf32> to vector<1x1x128xf32>
    tpu.vector_store %arg9[%c0_84, %c0_85, %c128], %85 {strides = array<i32>} : memref<1x1x384xf32, #tpu.memory_space<vmem>>, vector<1x1x128xf32>,
    %c0_86 = arith.constant 0 : index
    %c0_87 = arith.constant 0 : index
    %c256 = arith.constant 256 : index
    %86 = vector.load %arg9[%c0_86, %c0_87, %c256] : memref<1x1x384xf32, #tpu.memory_space<vmem>>, vector<1x1x128xf32>
    %87 = vector.shape_cast %86 : vector<1x1x128xf32> to vector<1x128xf32>
    %88 = vector.shape_cast %74 : vector<1x128xf32> to vector<1x1x128xf32>
    tpu.vector_store %arg9[%c0_86, %c0_87, %c256], %88 {strides = array<i32>} : memref<1x1x384xf32, #tpu.memory_space<vmem>>, vector<1x1x128xf32>,
    return
  }
  func.func @transform_0(%arg0: i32) -> (i32, i32, i32, i32) {
    %c0_i32 = arith.constant 0 : i32
    %c0_i32_0 = arith.constant 0 : i32
    %c0_i32_1 = arith.constant 0 : i32
    %c0_i32_2 = arith.constant 0 : i32
    return %arg0, %c0_i32, %c0_i32_0, %c0_i32_1 : i32, i32, i32, i32
  }
  func.func @transform_1(%arg0: i32) -> (i32, i32, i32) {
    %c0_i32 = arith.constant 0 : i32
    %c0_i32_0 = arith.constant 0 : i32
    %c0_i32_1 = arith.constant 0 : i32
    %c0_i32_2 = arith.constant 0 : i32
    return %c0_i32, %c0_i32_0, %c0_i32_1 : i32, i32, i32
  }
  func.func @transform_2(%arg0: i32) -> (i32, i32) {
    %c0_i32 = arith.constant 0 : i32
    %c0_i32_0 = arith.constant 0 : i32
    %c0_i32_1 = arith.constant 0 : i32
    return %c0_i32, %c0_i32_0 : i32, i32
  }
  func.func @transform_3(%arg0: i32) -> (i32, i32) {
    %c0_i32 = arith.constant 0 : i32
    %c0_i32_0 = arith.constant 0 : i32
    %c0_i32_1 = arith.constant 0 : i32
    return %c0_i32, %c0_i32_0 : i32, i32
  }
  func.func @transform_4(%arg0: i32) -> (i32, i32) {
    %c0_i32 = arith.constant 0 : i32
    %c0_i32_0 = arith.constant 0 : i32
    %c0_i32_1 = arith.constant 0 : i32
    return %c0_i32, %c0_i32_0 : i32, i32
  }
  func.func @transform_5(%arg0: i32) -> (i32, i32) {
    %c0_i32 = arith.constant 0 : i32
    %c0_i32_0 = arith.constant 0 : i32
    %c0_i32_1 = arith.constant 0 : i32
    return %c0_i32, %c0_i32_0 : i32, i32
  }
  func.func @transform_6(%arg0: i32) -> (i32, i32) {
    %c0_i32 = arith.constant 0 : i32
    %c0_i32_0 = arith.constant 0 : i32
    %c0_i32_1 = arith.constant 0 : i32
    return %c0_i32, %c0_i32_0 : i32, i32
  }
  func.func @transform_7(%arg0: i32) -> (i32, i32) {
    %c0_i32 = arith.constant 0 : i32
    %c0_i32_0 = arith.constant 0 : i32
    %c0_i32_1 = arith.constant 0 : i32
    return %c0_i32, %c0_i32_0 : i32, i32
  }
  func.func @transform_8(%arg0: i32) -> (i32, i32, i32) {
    %c0_i32 = arith.constant 0 : i32
    %c0_i32_0 = arith.constant 0 : i32
    %c0_i32_1 = arith.constant 0 : i32
    return %arg0, %c0_i32, %c0_i32_0 : i32, i32, i32
  }
}

</mosaic_0001>

<bundles_post_ra>
// kernel: general_module_forward.1
= control target key start
LH: loop header
LB: loop body
LE: loop exit
PB: predicated region body
PF: predicated region fallthrough
CT: control target
= control target key end

     0   :  { %s5467_s27 = smov 0   ;;  %s6980_s0 = inlined_call_operand.vmem [shape: bf16[2,18,18,4], index: 0, kind: input, shape index: {}]   ;;  %s6981_s1 = inlined_call_operand.vmem [shape: bf16[9,4,128], index: 1, kind: input, shape index: {}]   ;;  %s6982_s2 = inlined_call_operand.vmem [shape: f32[1,128], index: 2, kind: input, shape index: {}]   ;;  %s6983_s3 = inlined_call_operand.vmem [shape: bf16[128,256], index: 3, kind: input, shape index: {}]   ;;  %s6984_s4 = inlined_call_operand.vmem [shape: f32[1,128], index: 4, kind: input, shape index: {}]   ;;  %s6985_s5 = inlined_call_operand.vmem [shape: f32[1,128], index: 5, kind: input, shape index: {}]   ;;  %s6986_s6 = inlined_call_operand.vmem [shape: bf16[128,128], index: 6, kind: input, shape index: {}]   ;;  %s6987_s7 = inlined_call_operand.vmem [shape: f32[1,128], index: 7, kind: input, shape index: {}]   ;;  %s6988_s8 = inlined_call_operand.vmem [shape: f32[2,1,384], index: 8, kind: output, shape index: {}]  }
   0x1 LB: > { %s4589_s28 = sadd.s32 4294967295, %s5420_s27   ;;  %p4593_p0 = scmp.ge.s32.totalorder %s5420_s27, 1  ;;  %s5420_s27 = sphi %s5467_s27, %s18_s27  }
   0x2   : > { %p262_p1 = scmp.lt.s32.totalorder %s5420_s27, 3 }
   0x4   : > { %p263_p2 = pnand %p4593_p0, %p262_p1 }
   0x6   : > { %266 = sbr.rel (%p263_p2) target bundleno = 1047 (0x417), region = 52 }
   0xb   : > { %v4595_v0 = vld [vmem:[%s6981_s1 + $0x2] sm:$0x3]  ;;  %vm840_vm0 = vcmask 1041408   ;;  %p295_p3 = scmp.lt.s32.totalorder %s4589_s28, 1  ;;  %v4886_v2 = vld [vmem:[%s6981_s1 + $0x8] sm:$0x3] }
   0xc   : > { %v842_v1 = vsel %vm840_vm0, %v4595_v0, 0  ;;  %v2356_v3 = vsel %vm840_vm0, %v4886_v2, 0  ;;  %v4708_v4 = vld [vmem:[%s6981_s1 + $0x4] sm:$0x3]  ;;  %v337_v5 = vld [vmem:[%s6981_s1] sm:$0x3] }
   0xd   : > { %851 = vmatpush.bf16.msra.mxu0 %v842_v1  ;;  %5349 = vmatpush.bf16.msra.mxu1 %v842_v1  ;;  %s7000_s28 = smov (!%p295_p3, %s4589_s28), 1  ;;  %v1415_v6 = vsel %vm840_vm0, %v4708_v4, 0  ;;  %v1062_v7 = vsel %vm840_vm0, %v337_v5, 0  ;;  %vm354_vm1 = vsmask.f32 3328  ;;  %vm791_vm3 = vcmask 31744  }
   0xe   : > { %5350 = vmatpush.bf16.msra.mxu2 %v842_v1  ;;  %s5352_s15 = smul.u32 216, %s7000_s28  ;;  %5351 = vmatpush.bf16.msra.mxu3 %v842_v1  ;;  %vm355_vm2 = vsmask.f32 7440  ;;  %vm1201_vm5 = vcmask 1042432   ;;  %vm1202_vm6 = vcmask 1046532  }
   0xf   : > { %vm5516_vm4 = vmor %vm354_vm1, %vm355_vm2  ;;  %s5353_s13 = smul.u32 3, %s7000_s28 }
  0x10   : > { %s5497_s18 = scalar_lea.vmem %s6980_s0, %s5352_s15  ;;  %vm5692_vm7 = vmor %vm1201_vm5, %vm1202_vm6 }
  0x11   : > { %2365 = vmatpush.bf16.msrb.mxu0 %v2356_v3  ;;  %1071 = vmatpush.bf16.msrb.mxu1 %v1062_v7  ;;  %v305_v8 = vld [vmem:[%s5497_s18] sm:$0xf]  ;;  %v5501_v9 = vld [vmem:[%s5497_s18 + $0x4] sm:$0xf]  ;;  %v5504_v10 = vld [vmem:[%s5497_s18 + $0x8] sm:$0x1]  ;;  %s303_s16 = scalar_lea.vmem %s6988_s8, %s5353_s13 }
  0x12   : > { %1424 = vmatpush.bf16.msrb.mxu2 %v1415_v6  ;;  %v358_v11 = vshrl.u32 %v305_v8, 16  ;;  %v361_v12 = vshll.u32 %v305_v8, 16  ;;  %v367_v13 = vshll.u32 %v5501_v9, 16  ;;  %v371_v14 = vshrl.u32 %v5501_v9, 16  ;;  %v315_v15 = vld [vmem:[%s5497_s18 + $0x3c] sm:$0xf] }
  0x13   : > { %v377_v16 = vshll.u32 %v5504_v10, 16  ;;  %v316_v17 = vld [vmem:[%s5497_s18 + $0x40] sm:$0xf]  ;;  %v343_v18 = vld [vmem:[%s5497_s18 + $0x44] sm:$0x1]  ;;  %v478_v25 = vshrl.u32 %v315_v15, 16 }
  0x14   : > { %v360_v19 = vrot.slane %v358_v11, 4  ;;  %v363_v20 = vrot.slane %v361_v12, 5  ;;  %v369_v21 = vrot.slane %v367_v13, 5  ;;  %v373_v22 = vrot.slane %v371_v14, 4  ;;  %v323_v23 = vld [vmem:[%s5497_s18 + $0x6c] sm:$0xf] }
  0x15   : > { %v379_v24 = vrot.slane %v377_v16, 5  ;;  %v481_v26 = vshll.u32 %v315_v15, 16  ;;  %v487_v27 = vshll.u32 %v316_v17, 16  ;;  %v491_v30 = vshrl.u32 %v316_v17, 16  ;;  %v324_v32 = vld [vmem:[%s5497_s18 + $0x70] sm:$0xf] }
  0x16   : > { %v364_v28 = vor.u32 %v363_v20, %v360_v19  ;;  %v374_v29 = vor.u32 %v373_v22, %v369_v21  ;;  %v497_v31 = vshll.u32 %v343_v18, 16  ;;  %v480_v34 = vrot.slane %v478_v25, 4  ;;  %v347_v43 = vld [vmem:[%s5497_s18 + $0x74] sm:$0x1]  ;;  %v307_v59 = vld [vmem:[%s5497_s18 + $0xc] sm:$0xf] }
  0x17   : > { %v483_v35 = vrot.slane %v481_v26, 5  ;;  %v489_v36 = vrot.slane %v487_v27, 5  ;;  %v574_v37 = vshrl.u32 %v323_v23, 16  ;;  %v493_v40 = vrot.slane %v491_v30, 4  ;;  %v5529_v63 = vld [vmem:[%s5497_s18 + $0x10] sm:$0xf] }
  0x18   : > { %v365_v38 = vrot.slane %v364_v28, 4  ;;  %v375_v39 = vrot.slane %v374_v29, 4  ;;  %v499_v41 = vrot.slane %v497_v31, 5  ;;  %v577_v45 = vshll.u32 %v323_v23, 16  ;;  %v5532_v0 = vld [vmem:[%s5497_s18 + $0x14] sm:$0x1] }
  0x19   : > { %v484_v42 = vor.u32 %v483_v35, %v480_v34  ;;  %v576_v44 = vrot.slane %v574_v37, 4  ;;  %v583_v46 = vshll.u32 %v324_v32, 16  ;;  %v494_v49 = vor.u32 %v493_v40, %v489_v36  ;;  %v317_v15 = vld [vmem:[%s5497_s18 + $0x48] sm:$0xf]  ;;  %v318_v20 = vld [vmem:[%s5497_s18 + $0x4c] sm:$0xf] }
  0x1a   : > { %v370_v47 = vsel %vm5516_vm4, %v365_v38, %v369_v21  ;;  %v380_v48 = vsel %vm5516_vm4, %v375_v39, %v379_v24  ;;  %v587_v50 = vshrl.u32 %v324_v32, 16  ;;  %v579_v54 = vrot.slane %v577_v45, 5  ;;  %v344_v25 = vld [vmem:[%s5497_s18 + $0x50] sm:$0x1]  ;;  %v325_v35 = vld [vmem:[%s5497_s18 + $0x78] sm:$0xf] }
  0x1b   : > { %v743_v51 = vunpack.c.l.b16 %v370_v47  ;;  %v744_v52 = vunpack.c.l.b16 %v380_v48  ;;  %v485_v53 = vrot.slane %v484_v42, 4  ;;  %v495_v55 = vrot.slane %v494_v49, 4  ;;  %v348_v47 = vld [vmem:[%s5497_s18 + $0x80] sm:$0x1] }
  0x1c   : > { %v585_v56 = vrot.slane %v583_v46, 5  ;;  %v589_v57 = vrot.slane %v587_v50, 4  ;;  %v593_v58 = vshll.u32 %v347_v43, 16  ;;  %v580_v62 = vor.u32 %v579_v54, %v576_v44  ;;  %v326_v44 = vld [vmem:[%s5497_s18 + $0x7c] sm:$0xf] }
  0x1d   : > { %v775_v60 = vpack.c.b16 %v744_v52, %v743_v51  ;;  %v490_v61 = vsel %vm5516_vm4, %v485_v53, %v489_v36  ;;  %v500_v1 = vsel %vm5516_vm4, %v495_v55, %v499_v41  ;;  %v382_v7 = vshrl.u32 %v307_v59, 16 }
  0x1e   : > { %v753_v2 = vunpack.c.l.b16 %v490_v61  ;;  %v590_v3 = vor.u32 %v589_v57, %v585_v56  ;;  %v595_v4 = vrot.slane %v593_v58, 5  ;;  %v754_v5 = vunpack.c.l.b16 %v500_v1 }
  0x1f   : > { %4596 = vmatmul.msk.bf16.vlgmr.msra.gmra.mxu0 %vm791_vm3, %v775_v60  ;;  %v581_v6 = vrot.slane %v580_v62, 4  ;;  %v385_v8 = vshll.u32 %v307_v59, 16  ;;  %v391_v12 = vshll.u32 %v5529_v63, 16  ;;  %v395_v13 = vshrl.u32 %v5529_v63, 16  ;;  %v331_v62 = vld [vmem:[%s5497_s18 + $0x9c] sm:$0xf] }
  0x20   : > { %v591_v11 = vrot.slane %v590_v3, 4  ;;  %v401_v14 = vshll.u32 %v5532_v0, 16  ;;  %v780_v16 = vpack.c.b16 %v754_v5, %v753_v2  ;;  %v384_v18 = vrot.slane %v382_v7, 4 }
  0x21   : > { %v586_v17 = vsel %vm5516_vm4, %v581_v6, %v585_v56  ;;  %v387_v19 = vrot.slane %v385_v8, 5  ;;  %v393_v23 = vrot.slane %v391_v12, 5  ;;  %v397_v24 = vrot.slane %v395_v13, 4 }
  0x22   : > { %v596_v21 = vsel %vm5516_vm4, %v591_v11, %v595_v4  ;;  %v761_v22 = vunpack.c.l.b16 %v586_v17  ;;  %4601 = vmatmul.msk.bf16.vlgmr.msra.gmra.mxu1 %vm791_vm3, %v780_v16  ;;  %v403_v28 = vrot.slane %v401_v14, 5  ;;  %v502_v29 = vshrl.u32 %v317_v15, 16  ;;  %v332_v4 = vld [vmem:[%s5497_s18 + $0xa0] sm:$0xf]  ;;  %v351_v11 = vld [vmem:[%s5497_s18 + $0xa4] sm:$0x1] }
  0x23   : > { %v762_v26 = vunpack.c.l.b16 %v596_v21  ;;  %v388_v27 = vor.u32 %v387_v19, %v384_v18  ;;  %v398_v30 = vor.u32 %v397_v24, %v393_v23  ;;  %v505_v31 = vshll.u32 %v317_v15, 16 }
  0x24   : > { %v511_v32 = vshll.u32 %v318_v20, 16  ;;  %v515_v34 = vshrl.u32 %v318_v20, 16  ;;  %v504_v38 = vrot.slane %v502_v29, 4  ;;  %v521_v39 = vshll.u32 %v344_v25, 16  ;;  %v4757_v20 = vld [vmem:[%s6981_s1 + $0x6] sm:$0x3] }
  0x25   : > { %v784_v36 = vpack.c.b16 %v762_v26, %v761_v22  ;;  %v389_v37 = vrot.slane %v388_v27, 4  ;;  %v399_v40 = vrot.slane %v398_v30, 4  ;;  %v507_v41 = vrot.slane %v505_v31, 5  ;;  %v309_v25 = vld [vmem:[%s5497_s18 + $0x18] sm:$0xf] }
  0x26   : > { %v513_v42 = vrot.slane %v511_v32, 5  ;;  %v517_v43 = vrot.slane %v515_v34, 4  ;;  %v523_v46 = vrot.slane %v521_v39, 5  ;;  %v598_v48 = vshrl.u32 %v325_v35, 16  ;;  %v5571_v29 = vld [vmem:[%s5497_s18 + $0x1c] sm:$0xf] }
  0x27   : > { %4605 = vmatmul.msk.bf16.vlgmr.msra.gmra.mxu2 %vm791_vm3, %v784_v36  ;;  %v394_v45 = vsel %vm5516_vm4, %v389_v37, %v393_v23  ;;  %v601_v49 = vshll.u32 %v325_v35, 16  ;;  %v404_v50 = vsel %vm5516_vm4, %v399_v40, %v403_v28  ;;  %v508_v52 = vor.u32 %v507_v41, %v504_v38  ;;  %v5575_v35 = vld [vmem:[%s5497_s18 + $0x20] sm:$0x1] }
  0x28   : > { %v745_v51 = vunpack.c.l.b16 %v394_v45  ;;  %v518_v53 = vor.u32 %v517_v43, %v513_v42  ;;  %v746_v54 = vunpack.c.l.b16 %v404_v50  ;;  %v600_v55 = vrot.slane %v598_v48, 4 }
  0x29   : > { %v603_v56 = vrot.slane %v601_v49, 5  ;;  %v607_v57 = vshll.u32 %v326_v44, 16  ;;  %v509_v58 = vrot.slane %v508_v52, 4  ;;  %v611_v60 = vshrl.u32 %v326_v44, 16  ;;  %v319_v44 = vld [vmem:[%s5497_s18 + $0x54] sm:$0xf] }
  0x2a   : > { %v519_v59 = vrot.slane %v518_v53, 4  ;;  %v617_v61 = vshll.u32 %v348_v47, 16  ;;  %v776_v1 = vpack.c.b16 %v746_v54, %v745_v51  ;;  %v670_v15 = vshrl.u32 %v331_v62, 16  ;;  %v5585_v53 = vld [vmem:[%s5497_s18 + $0x58] sm:$0xf] }
  0x2b   : > { %v604_v2 = vor.u32 %v603_v56, %v600_v55  ;;  %v609_v3 = vrot.slane %v607_v57, 5  ;;  %v514_v5 = vsel %vm5516_vm4, %v509_v58, %v513_v42  ;;  %v613_v7 = vrot.slane %v611_v60, 4  ;;  %v5590_v57 = vld [vmem:[%s5497_s18 + $0x5c] sm:$0x1] }
  0x2c   : > { %v524_v6 = vsel %vm5516_vm4, %v519_v59, %v523_v46  ;;  %v619_v8 = vrot.slane %v617_v61, 5  ;;  %v755_v12 = vunpack.c.l.b16 %v514_v5  ;;  %v673_v17 = vshll.u32 %v331_v62, 16 }
  0x2d   : > { %v756_v13 = vunpack.c.l.b16 %v524_v6  ;;  %v605_v14 = vrot.slane %v604_v2, 4  ;;  %v614_v16 = vor.u32 %v613_v7, %v609_v3  ;;  %v679_v18 = vshll.u32 %v332_v4, 16 }
  0x2e   : > { %v683_v19 = vshrl.u32 %v332_v4, 16  ;;  %v672_v23 = vrot.slane %v670_v15, 4  ;;  %v689_v24 = vshll.u32 %v351_v11, 16  ;;  %v675_v27 = vrot.slane %v673_v17, 5  ;;  %v328_v15 = vld [vmem:[%s5497_s18 + $0x88] sm:$0xf] }
  0x2f   : > { %4597 = vmatmul.msk.bf16.gmra.mxu0 %vm791_vm3, %v776_v1  ;;  %v781_v21 = vpack.c.b16 %v756_v13, %v755_v12  ;;  %v610_v22 = vsel %vm5516_vm4, %v605_v14, %v609_v3  ;;  %v615_v26 = vrot.slane %v614_v16, 4  ;;  %v681_v28 = vrot.slane %v679_v18, 5  ;;  %v327_v1 = vld [vmem:[%s5497_s18 + $0x84] sm:$0xf] }
  0x30   : > { %v763_v30 = vunpack.c.l.b16 %v610_v22  ;;  %v685_v31 = vrot.slane %v683_v19, 4  ;;  %v691_v32 = vrot.slane %v689_v24, 5  ;;  %v1702_v34 = vsel %vm840_vm0, %v4757_v20, 0 }
  0x31   : > { %v620_v36 = vsel %vm5516_vm4, %v615_v26, %v619_v8  ;;  %v676_v37 = vor.u32 %v675_v27, %v672_v23  ;;  %1711 = vmatpush.bf16.msrb.mxu3 %v1702_v34  ;;  %v406_v38 = vshrl.u32 %v309_v25, 16  ;;  %v409_v39 = vshll.u32 %v309_v25, 16 }
  0x32   : > { %4602 = vmatmul.msk.bf16.gmra.mxu1 %vm791_vm3, %v781_v21  ;;  %v764_v40 = vunpack.c.l.b16 %v620_v36  ;;  %v686_v41 = vor.u32 %v685_v31, %v681_v28  ;;  %v415_v42 = vshll.u32 %v5571_v29, 16  ;;  %v419_v43 = vshrl.u32 %v5571_v29, 16  ;;  %v349_v21 = vld [vmem:[%s5497_s18 + $0x8c] sm:$0x1]  ;;  %v333_v31 = vld [vmem:[%s5497_s18 + $0xa8] sm:$0xf] }
  0x33   : > { %v677_v45 = vrot.slane %v676_v37, 4  ;;  %v408_v46 = vrot.slane %v406_v38, 4  ;;  %v411_v47 = vrot.slane %v409_v39, 5  ;;  %v425_v48 = vshll.u32 %v5575_v35, 16  ;;  %v334_v37 = vld [vmem:[%s5497_s18 + $0xac] sm:$0xf] }
  0x34   : > { %v785_v49 = vpack.c.b16 %v764_v40, %v763_v30  ;;  %v687_v50 = vrot.slane %v686_v41, 4  ;;  %v417_v51 = vrot.slane %v415_v42, 5  ;;  %v421_v52 = vrot.slane %v419_v43, 4 }
  0x35   : > { %v682_v54 = vsel %vm5516_vm4, %v677_v45, %v681_v28  ;;  %v412_v55 = vor.u32 %v411_v47, %v408_v46  ;;  %v427_v56 = vrot.slane %v425_v48, 5  ;;  %v526_v58 = vshrl.u32 %v319_v44, 16  ;;  %v352_v45 = vld [vmem:[%s5497_s18 + $0xb0] sm:$0x1] }
  0x36   : > { %v692_v59 = vsel %vm5516_vm4, %v687_v50, %v691_v32  ;;  %v769_v60 = vunpack.c.l.b16 %v682_v54  ;;  %v422_v61 = vor.u32 %v421_v52, %v417_v51  ;;  %v529_v62 = vshll.u32 %v319_v44, 16 }
  0x37   : > { %4606 = vmatmul.msk.bf16.gmra.mxu2 %vm791_vm3, %v785_v49  ;;  %v770_v2 = vunpack.c.l.b16 %v692_v59  ;;  %v413_v3 = vrot.slane %v412_v55, 4  ;;  %v528_v4 = vrot.slane %v526_v58, 4  ;;  %v535_v5 = vshll.u32 %v5585_v53, 16 }
  0x38   : > { %v423_v6 = vrot.slane %v422_v61, 4  ;;  %v531_v7 = vrot.slane %v529_v62, 5  ;;  %v539_v8 = vshrl.u32 %v5585_v53, 16  ;;  %v545_v11 = vshll.u32 %v5590_v57, 16  ;;  %v311_v61 = vld [vmem:[%s5497_s18 + $0x24] sm:$0xf] }
  0x39   : > { %v788_v12 = vpack.c.b16 %v770_v2, %v769_v60  ;;  %v418_v13 = vsel %vm5516_vm4, %v413_v3, %v417_v51  ;;  %v537_v14 = vrot.slane %v535_v5, 5  ;;  %v622_v16 = vshrl.u32 %v327_v1, 16  ;;  %v5618_v3 = vld [vmem:[%s5497_s18 + $0x28] sm:$0xf] }
  0x3a   : > { %v428_v17 = vsel %vm5516_vm4, %v423_v6, %v427_v56  ;;  %v747_v18 = vunpack.c.l.b16 %v418_v13  ;;  %v532_v19 = vor.u32 %v531_v7, %v528_v4  ;;  %v541_v20 = vrot.slane %v539_v8, 4  ;;  %v5621_v4 = vld [vmem:[%s5497_s18 + $0x2c] sm:$0x1] }
  0x3b   : > { %4609 = vmatmul.msk.bf16.vlgmr.msra.gmra.mxu3 %vm791_vm3, %v788_v12  ;;  %v748_v22 = vunpack.c.l.b16 %v428_v17  ;;  %v547_v23 = vrot.slane %v545_v11, 5  ;;  %v624_v24 = vrot.slane %v622_v16, 4  ;;  %v625_v25 = vshll.u32 %v327_v1, 16 }
  0x3c   : > { %v533_v26 = vrot.slane %v532_v19, 4  ;;  %v542_v27 = vor.u32 %v541_v20, %v537_v14  ;;  %v631_v28 = vshll.u32 %v328_v15, 16  ;;  %v635_v30 = vshrl.u32 %v328_v15, 16  ;;  %v321_v19 = vld [vmem:[%s5497_s18 + $0x60] sm:$0xf] }
  0x3d   : > { %v777_v32 = vpack.c.b16 %v748_v22, %v747_v18  ;;  %v627_v34 = vrot.slane %v625_v25, 5  ;;  %v641_v36 = vshll.u32 %v349_v21, 16  ;;  %v694_v46 = vshrl.u32 %v333_v31, 16 }
  0x3e   : > { %v538_v38 = vsel %vm5516_vm4, %v533_v26, %v537_v14  ;;  %v543_v39 = vrot.slane %v542_v27, 4  ;;  %v633_v40 = vrot.slane %v631_v28, 5  ;;  %v637_v41 = vrot.slane %v635_v30, 4  ;;  %v5636_v30 = vld [vmem:[%s5497_s18 + $0x68] sm:$0x1] }
  0x3f   : > { %4598 = vmatmul.msk.bf16.gmra.mxu0 %vm791_vm3, %v777_v32  ;;  %v757_v42 = vunpack.c.l.b16 %v538_v38  ;;  %v628_v43 = vor.u32 %v627_v34, %v624_v24  ;;  %v643_v44 = vrot.slane %v641_v36, 5  ;;  %v697_v49 = vshll.u32 %v333_v31, 16  ;;  %v5631_v24 = vld [vmem:[%s5497_s18 + $0x64] sm:$0xf] }
  0x40   : > { %v548_v47 = vsel %vm5516_vm4, %v543_v39, %v547_v23  ;;  %v638_v48 = vor.u32 %v637_v41, %v633_v40  ;;  %v703_v50 = vshll.u32 %v334_v37, 16  ;;  %v696_v54 = vrot.slane %v694_v46, 4 }
  0x41   : > { %v758_v51 = vunpack.c.l.b16 %v548_v47  ;;  %v629_v52 = vrot.slane %v628_v43, 4  ;;  %v707_v55 = vshrl.u32 %v334_v37, 16  ;;  %v699_v58 = vrot.slane %v697_v49, 5 }
  0x42   : > { %v639_v56 = vrot.slane %v638_v48, 4  ;;  %v705_v59 = vrot.slane %v703_v50, 5  ;;  %v713_v60 = vshll.u32 %v352_v45, 16  ;;  %v430_v13 = vshrl.u32 %v311_v61, 16  ;;  %v329_v45 = vld [vmem:[%s5497_s18 + $0x90] sm:$0xf] }
  0x43   : > { %v782_v62 = vpack.c.b16 %v758_v51, %v757_v42  ;;  %v634_v1 = vsel %vm5516_vm4, %v629_v52, %v633_v40  ;;  %v709_v2 = vrot.slane %v707_v55, 4  ;;  %v700_v7 = vor.u32 %v699_v58, %v696_v54  ;;  %v330_v50 = vld [vmem:[%s5497_s18 + $0x94] sm:$0xf]  ;;  %v350_v55 = vld [vmem:[%s5497_s18 + $0x98] sm:$0x1] }
  0x44   : > { %v644_v5 = vsel %vm5516_vm4, %v639_v56, %v643_v44  ;;  %v765_v6 = vunpack.c.l.b16 %v634_v1  ;;  %v715_v8 = vrot.slane %v713_v60, 5  ;;  %v433_v14 = vshll.u32 %v311_v61, 16 }
  0x45   : > { %4603 = vmatmul.msk.bf16.gmra.mxu1 %vm791_vm3, %v782_v62  ;;  %v766_v11 = vunpack.c.l.b16 %v644_v5  ;;  %v710_v12 = vor.u32 %v709_v2, %v705_v59  ;;  %v701_v15 = vrot.slane %v700_v7, 4  ;;  %v439_v16 = vshll.u32 %v5618_v3, 16 }
  0x46   : > { %v443_v17 = vshrl.u32 %v5618_v3, 16  ;;  %v449_v18 = vshll.u32 %v5621_v4, 16  ;;  %v432_v22 = vrot.slane %v430_v13, 4  ;;  %v435_v23 = vrot.slane %v433_v14, 5 }
  0x47   : > { %v786_v20 = vpack.c.b16 %v766_v11, %v765_v6  ;;  %v711_v21 = vrot.slane %v710_v12, 4  ;;  %v706_v25 = vsel %vm5516_vm4, %v701_v15, %v705_v59  ;;  %v441_v26 = vrot.slane %v439_v16, 5  ;;  %v335_v11 = vld [vmem:[%s5497_s18 + $0xb4] sm:$0xf]  ;;  %v336_v16 = vld [vmem:[%s5497_s18 + $0xb8] sm:$0xf] }
  0x48   : > { %v445_v27 = vrot.slane %v443_v17, 4  ;;  %v451_v28 = vrot.slane %v449_v18, 5  ;;  %v771_v32 = vunpack.c.l.b16 %v706_v25  ;;  %v436_v34 = vor.u32 %v435_v23, %v432_v22 }
  0x49   : > { %4607 = vmatmul.msk.bf16.gmra.mxu2 %vm791_vm3, %v786_v20  ;;  %v716_v31 = vsel %vm5516_vm4, %v711_v21, %v715_v8  ;;  %v550_v36 = vshrl.u32 %v321_v19, 16  ;;  %v553_v39 = vshll.u32 %v321_v19, 16  ;;  %v559_v40 = vshll.u32 %v5631_v24, 16  ;;  %v353_v20 = vld [vmem:[%s5497_s18 + $0xbc] sm:$0x1] }
  0x4a   : > { %v772_v37 = vunpack.c.l.b16 %v716_v31  ;;  %v446_v38 = vor.u32 %v445_v27, %v441_v26  ;;  %v437_v41 = vrot.slane %v436_v34, 4  ;;  %v563_v43 = vshrl.u32 %v5631_v24, 16 }
  0x4b   : > { %v552_v42 = vrot.slane %v550_v36, 4  ;;  %v569_v44 = vshll.u32 %v5636_v30, 16  ;;  %v555_v48 = vrot.slane %v553_v39, 5  ;;  %v561_v49 = vrot.slane %v559_v40, 5 }
  0x4c   : > { %v789_v46 = vpack.c.b16 %v772_v37, %v771_v32  ;;  %v447_v47 = vrot.slane %v446_v38, 4  ;;  %v442_v51 = vsel %vm5516_vm4, %v437_v41, %v441_v26  ;;  %v565_v52 = vrot.slane %v563_v43, 4  ;;  %v313_v38 = vld [vmem:[%s5497_s18 + $0x30] sm:$0xf]  ;;  %v5662_v43 = vld [vmem:[%s5497_s18 + $0x34] sm:$0xf] }
  0x4d   : > { %v571_v54 = vrot.slane %v569_v44, 5  ;;  %v749_v58 = vunpack.c.l.b16 %v442_v51  ;;  %v556_v59 = vor.u32 %v555_v48, %v552_v42  ;;  %v646_v60 = vshrl.u32 %v329_v45, 16  ;;  %v5668_v48 = vld [vmem:[%s5497_s18 + $0x38] sm:$0x1] }
  0x4e   : > { %4610 = vmatmul.msk.bf16.gmra.mxu3 %vm791_vm3, %v789_v46  ;;  %v452_v56 = vsel %vm5516_vm4, %v447_v47, %v451_v28  ;;  %v566_v62 = vor.u32 %v565_v52, %v561_v49  ;;  %v649_v1 = vshll.u32 %v329_v45, 16  ;;  %v655_v2 = vshll.u32 %v330_v50, 16 }
  0x4f   : > { %v750_v61 = vunpack.c.l.b16 %v452_v56  ;;  %v557_v5 = vrot.slane %v556_v59, 4  ;;  %v648_v6 = vrot.slane %v646_v60, 4  ;;  %v659_v7 = vshrl.u32 %v330_v50, 16 }
  0x50   : > { %v665_v8 = vshll.u32 %v350_v55, 16  ;;  %v567_v13 = vrot.slane %v566_v62, 4  ;;  %v651_v14 = vrot.slane %v649_v1, 5  ;;  %v657_v15 = vrot.slane %v655_v2, 5  ;;  %v4984_v1 = vld [vmem:[%s6981_s1 + $0xc] sm:$0x3] }
  0x51   : > { %v778_v12 = vpack.c.b16 %v750_v61, %v749_v58  ;;  %v562_v17 = vsel %vm5516_vm4, %v557_v5, %v561_v49  ;;  %v661_v18 = vrot.slane %v659_v7, 4  ;;  %v718_v25 = vshrl.u32 %v335_v11, 16  ;;  %v1153_v58 = vld [vmem:[%s5497_s18] sm:$0xe] }
  0x52   : > { %v667_v19 = vrot.slane %v665_v8, 5  ;;  %v572_v21 = vsel %vm5516_vm4, %v567_v13, %v571_v54  ;;  %v759_v22 = vunpack.c.l.b16 %v562_v17  ;;  %v652_v23 = vor.u32 %v651_v14, %v648_v6  ;;  %v5113_v8 = vld [vmem:[%s6981_s1 + $0xe] sm:$0x3]  ;;  %v4935_v14 = vld [vmem:[%s6981_s1 + $0xa] sm:$0x3] }
  0x53   : > { %4599 = vmatmul.msk.bf16.gmra.mxu0 %vm791_vm3, %v778_v12  ;;  %v760_v26 = vunpack.c.l.b16 %v572_v21  ;;  %v662_v27 = vor.u32 %v661_v18, %v657_v15  ;;  %v721_v28 = vshll.u32 %v335_v11, 16  ;;  %v727_v31 = vshll.u32 %v336_v16, 16 }
  0x54   : > { %v653_v32 = vrot.slane %v652_v23, 4  ;;  %v720_v34 = vrot.slane %v718_v25, 4  ;;  %v731_v36 = vshrl.u32 %v336_v16, 16  ;;  %v737_v37 = vshll.u32 %v353_v20, 16 }
  0x55   : > { %v783_v39 = vpack.c.b16 %v760_v26, %v759_v22  ;;  %v663_v40 = vrot.slane %v662_v27, 4  ;;  %v723_v41 = vrot.slane %v721_v28, 5  ;;  %v729_v42 = vrot.slane %v727_v31, 5 }
  0x56   : > { %v1209_v44 = vrot.slane %v5504_v10, 5  ;;  %v658_v45 = vsel %vm5516_vm4, %v653_v32, %v657_v15  ;;  %v733_v46 = vrot.slane %v731_v36, 4  ;;  %v739_v47 = vrot.slane %v737_v37, 5  ;;  %v4839_v36 = vld [vmem:[%s5497_s18 + $0x10] sm:$0xf] }
  0x57   : > { %4604 = vmatmul.msk.bf16.gmra.mxu1 %vm791_vm3, %v783_v39  ;;  %v668_v49 = vsel %vm5516_vm4, %v663_v40, %v667_v19  ;;  %v767_v50 = vunpack.c.l.b16 %v658_v45  ;;  %v724_v51 = vor.u32 %v723_v41, %v720_v34  ;;  %v454_v52 = vshrl.u32 %v313_v38, 16  ;;  %v4838_v34 = vld [vmem:[%s5497_s18 + $0xc] sm:$0xf]  ;;  %v4840_v45 = vld [vmem:[%s5497_s18 + $0x14] sm:$0x1] }
  0x58   : > { %v768_v54 = vunpack.c.l.b16 %v668_v49  ;;  %v734_v55 = vor.u32 %v733_v46, %v729_v42  ;;  %v457_v56 = vshll.u32 %v313_v38, 16  ;;  %v463_v10 = vshll.u32 %v5662_v43, 16 }
  0x59   : > { %v725_v59 = vrot.slane %v724_v51, 4  ;;  %v456_v60 = vrot.slane %v454_v52, 4  ;;  %v467_v61 = vshrl.u32 %v5662_v43, 16  ;;  %v473_v62 = vshll.u32 %v5668_v48, 16 }
  0x5a   : > { %v787_v2 = vpack.c.b16 %v768_v54, %v767_v50  ;;  %v735_v5 = vrot.slane %v734_v55, 4  ;;  %v459_v6 = vrot.slane %v457_v56, 5  ;;  %v465_v7 = vrot.slane %v463_v10, 5  ;;  %v5162_v55 = vld [vmem:[%s6981_s1 + $0x10] sm:$0x3] }
  0x5b   : > { %v730_v11 = vsel %vm5516_vm4, %v725_v59, %v729_v42  ;;  %v469_v12 = vrot.slane %v467_v61, 4  ;;  %v475_v13 = vrot.slane %v473_v62, 5  ;;  %v4692_v20 = vrot.slane %v1153_v58, 9  ;;  %v5277_v42 = vld [vmem:[%s5497_s18] sm:$0xff]  ;;  %v1155_v62 = vld [vmem:[%s5497_s18 + $0x18] sm:$0xe] }
  0x5c   : > { %4608 = vmatmul.msk.bf16.gmra.mxu2 %vm791_vm3, %v787_v2  ;;  %v740_v15 = vsel %vm5516_vm4, %v735_v5, %v739_v47  ;;  %v773_v16 = vunpack.c.l.b16 %v730_v11  ;;  %v460_v17 = vor.u32 %v459_v6, %v456_v60  ;;  %v1206_v21 = vrot.slane %v5501_v9, 5  ;;  %v4841_v2 = vld [vmem:[%s5497_s18 + $0x18] sm:$0xf]  ;;  %v4842_v11 = vld [vmem:[%s5497_s18 + $0x1c] sm:$0xf] }
  0x5d   : > { %v774_v18 = vunpack.c.l.b16 %v740_v15  ;;  %v470_v19 = vor.u32 %v469_v12, %v465_v7  ;;  %v3041_v25 = vsel %vm840_vm0, %v4984_v1, 0  ;;  %v3695_v26 = vsel %vm840_vm0, %v5113_v8, 0 }
  0x5e   : > { %v461_v22 = vrot.slane %v460_v17, 4  ;;  %v2754_v27 = vsel %vm840_vm0, %v4935_v14, 0  ;;  %v1208_v32 = vrot.slane %v1206_v21, 4  ;;  %3050 = vmatpush.bf16.msra.mxu2 %v3041_v25  ;;  %3704 = vmatpush.bf16.msra.mxu3 %v3695_v26  ;;  %v1207_v39 = vsel %vm5692_vm7, %v4692_v20, %v1206_v21  ;;  %v5293_v26 = vld [vmem:[%s5497_s18 + $0xc] sm:$0xff] }
  0x5f   : > { %v790_v28 = vpack.c.b16 %v774_v18, %v773_v16  ;;  %v471_v31 = vrot.slane %v470_v19, 4  ;;  %2763 = vmatpush.bf16.msra.mxu1 %v2754_v27  ;;  %v1874_v46 = vshrl.u32 %v4838_v34, 16  ;;  %v1877_v47 = vshll.u32 %v4838_v34, 16  ;;  %v1154_v16 = vld [vmem:[%s5497_s18 + $0xc] sm:$0xe] }
  0x60   : > { %v466_v9 = vsel %vm5516_vm4, %v461_v22, %v465_v7  ;;  %v1210_v40 = vsel %vm5692_vm7, %v1208_v32, %v1209_v44  ;;  %v1883_v49 = vshll.u32 %v4839_v36, 16  ;;  %v1318_v51 = vunpack.c.l.b16 %v1207_v39 }
  0x61   : > { %4611 = vmatmul.msk.bf16.gmra.mxu3 %vm791_vm3, %v790_v28  ;;  %v476_v37 = vsel %vm5516_vm4, %v471_v31, %v475_v13  ;;  %v751_v38 = vunpack.c.l.b16 %v466_v9  ;;  %v1319_v52 = vunpack.c.l.b16 %v1210_v40  ;;  %v1887_v54 = vshrl.u32 %v4839_v36, 16 }
  0x62   : > { %v752_v41 = vunpack.c.l.b16 %v476_v37  ;;  %v1876_v56 = vrot.slane %v1874_v46, 4  ;;  %v1879_v10 = vrot.slane %v1877_v47, 5  ;;  %v1885_v44 = vrot.slane %v1883_v49, 5  ;;  %v4843_v37 = vld [vmem:[%s5497_s18 + $0x20] sm:$0x1]  ;;  %v5278_v47 = vld [vmem:[%s5497_s18 + $0xc] sm:$0xff] }
  0x63   : > { %v1889_v58 = vrot.slane %v1887_v54, 4  ;;  %v1893_v59 = vshll.u32 %v4840_v45, 16  ;;  %v4093_v61 = vsel %vm840_vm0, %v5162_v55, 0  ;;  %v1220_v1 = vrot.slane %v5571_v29, 5  ;;  %v4844_v54 = vld [vmem:[%s5497_s18 + $0x24] sm:$0xf] }
  0x64   : > { %v779_v50 = vpack.c.b16 %v752_v41, %v751_v38  ;;  %v1880_v60 = vor.u32 %v1879_v10, %v1876_v56  ;;  %v1350_v5 = vpack.c.b16 %v1319_v52, %v1318_v51  ;;  %4102 = vmatpush.bf16.msra.mxu0 %v4093_v61  ;;  %v4694_v8 = vrot.slane %v1155_v62, 9  ;;  %v4845_v56 = vld [vmem:[%s5497_s18 + $0x28] sm:$0xf] }
  0x65   : > { %v1890_v6 = vor.u32 %v1889_v58, %v1885_v44  ;;  %v1895_v7 = vrot.slane %v1893_v59, 5  ;;  %v1213_v12 = vrot.slane %v5529_v63, 5  ;;  %v1222_v14 = vrot.slane %v1220_v1, 4  ;;  %v1156_v58 = vld [vmem:[%s5497_s18 + $0x24] sm:$0xe] }
  0x66   : > { %4600 = vmatmul.msk.bf16.gmra.mxu0 %vm791_vm3, %v779_v50  ;;  %v1881_v13 = vrot.slane %v1880_v60, 4  ;;  %v1223_v15 = vrot.slane %v5575_v35, 5  ;;  %v1221_v18 = vsel %vm5692_vm7, %v4694_v8, %v1220_v1  ;;  %v1898_v29 = vshrl.u32 %v4841_v2, 16 }
  0x67   : > { %4676 = vmatmul.msk.bf16.vlgmr.msrb.gmra.mxu1 %vm791_vm3, %v5277_v42  ;;  %v1891_v17 = vrot.slane %v1890_v6, 4  ;;  %v1901_v19 = vshll.u32 %v4841_v2, 16  ;;  %v1322_v63 = vunpack.c.l.b16 %v1221_v18  ;;  %v1907_v22 = vshll.u32 %v4842_v11, 16 }
  0x68   : > { %v1886_v20 = vsel %vm5516_vm4, %v1881_v13, %v1885_v44  ;;  %v1224_v21 = vsel %vm5692_vm7, %v1222_v14, %v1223_v15  ;;  %v4693_v27 = vrot.slane %v1154_v16, 9  ;;  %v1215_v28 = vrot.slane %v1213_v12, 4  ;;  %v5294_v14 = vld [vmem:[%s5497_s18 + $0x18] sm:$0xff] }
  0x69   : > { %v1896_v35 = vsel %vm5516_vm4, %v1891_v17, %v1895_v7  ;;  %v1323_v25 = vunpack.c.l.b16 %v1224_v21  ;;  %v1216_v31 = vrot.slane %v5532_v0, 5  ;;  %v1911_v32 = vshrl.u32 %v4842_v11, 16  ;;  %v4846_v21 = vld [vmem:[%s5497_s18 + $0x2c] sm:$0x1] }
  0x6a   : > { %v2259_v9 = vunpack.c.l.b16 %v1886_v20  ;;  %v2260_v34 = vunpack.c.l.b16 %v1896_v35  ;;  %v1900_v38 = vrot.slane %v1898_v29, 4  ;;  %v1903_v39 = vrot.slane %v1901_v19, 5 }
  0x6b   : > { %v5736_v36 = vpack.c.b16 %v1323_v25, %v1322_v63  ;;  %v1909_v40 = vrot.slane %v1907_v22, 5  ;;  %v1913_v41 = vrot.slane %v1911_v32, 4  ;;  %v1214_v42 = vsel %vm5692_vm7, %v4693_v27, %v1213_v12  ;;  %v4847_v32 = vld [vmem:[%s5497_s18 + $0x30] sm:$0xf] }
  0x6c   : > { %4709 = vmatmul.msk.bf16.vlgmr.msrb.gmra.mxu2 %vm791_vm3, %v1350_v5  ;;  %v1217_v0 = vsel %vm5692_vm7, %v1215_v28, %v1216_v31  ;;  %v2291_v45 = vpack.c.b16 %v2260_v34, %v2259_v9  ;;  %v1917_v46 = vshll.u32 %v4843_v37, 16  ;;  %v1904_v49 = vor.u32 %v1903_v39, %v1900_v38  ;;  %v1157_v9 = vld [vmem:[%s5497_s18 + $0x30] sm:$0xe]  ;;  %v4848_v38 = vld [vmem:[%s5497_s18 + $0x34] sm:$0xf] }
  0x6d   : > { %v1914_v50 = vor.u32 %v1913_v41, %v1909_v40  ;;  %v1320_v51 = vunpack.c.l.b16 %v1214_v42  ;;  %v1321_v52 = vunpack.c.l.b16 %v1217_v0  ;;  %v1227_v59 = vrot.slane %v5618_v3, 5 }
  0x6e   : > { %v1919_v55 = vrot.slane %v1917_v46, 5  ;;  %v1905_v10 = vrot.slane %v1904_v49, 4  ;;  %v1230_v60 = vrot.slane %v5621_v4, 5  ;;  %v4695_v62 = vrot.slane %v1156_v58, 9 }
  0x6f   : > { %v1915_v44 = vrot.slane %v1914_v50, 4  ;;  %v1351_v61 = vpack.c.b16 %v1321_v52, %v1320_v51  ;;  %v1922_v1 = vshrl.u32 %v4844_v54, 16  ;;  %v1229_v2 = vrot.slane %v1227_v59, 4  ;;  %v5295_v51 = vld [vmem:[%s5497_s18 + $0x24] sm:$0xff] }
  0x70   : > { %v1925_v5 = vshll.u32 %v4844_v54, 16  ;;  %v1931_v6 = vshll.u32 %v4845_v56, 16  ;;  %v1935_v7 = vshrl.u32 %v4845_v56, 16  ;;  %v1228_v8 = vsel %vm5692_vm7, %v4695_v62, %v1227_v59  ;;  %v4849_v59 = vld [vmem:[%s5497_s18 + $0x38] sm:$0x1] }
  0x71   : > { %4822 = vmatmul.msk.bf16.vlgmr.msrb.gmra.mxu3 %vm791_vm3, %v5293_v26  ;;  %v1910_v11 = vsel %vm5516_vm4, %v1905_v10, %v1909_v40  ;;  %v1920_v3 = vsel %vm5516_vm4, %v1915_v44, %v1919_v55  ;;  %v1231_v4 = vsel %vm5692_vm7, %v1229_v2, %v1230_v60  ;;  %v1324_v12 = vunpack.c.l.b16 %v1228_v8  ;;  %v5279_v26 = vld [vmem:[%s5497_s18 + $0x18] sm:$0xff]  ;;  %v4851_v8 = vld [vmem:[%s5497_s18 + $0x40] sm:$0xf] }
  0x72   : > { %v1325_v13 = vunpack.c.l.b16 %v1231_v4  ;;  %v1924_v15 = vrot.slane %v1922_v1, 4  ;;  %v1927_v16 = vrot.slane %v1925_v5, 5  ;;  %v1933_v17 = vrot.slane %v1931_v6, 5 }
  0x73   : > { %v1937_v18 = vrot.slane %v1935_v7, 4  ;;  %v2261_v29 = vunpack.c.l.b16 %v1910_v11  ;;  %v2262_v19 = vunpack.c.l.b16 %v1920_v3  ;;  %v1941_v35 = vshll.u32 %v4846_v21, 16  ;;  %v4850_v7 = vld [vmem:[%s5497_s18 + $0x3c] sm:$0xf] }
  0x74   : > { %v1353_v20 = vpack.c.b16 %v1325_v13, %v1324_v12  ;;  %v1928_v63 = vor.u32 %v1927_v16, %v1924_v15  ;;  %v1234_v34 = vrot.slane %v5662_v43, 5  ;;  %v1237_v37 = vrot.slane %v5668_v48, 5  ;;  %v5296_v16 = vld [vmem:[%s5497_s18 + $0x30] sm:$0xff] }
  0x75   : > { %v1938_v22 = vor.u32 %v1937_v18, %v1933_v17  ;;  %v2292_v25 = vpack.c.b16 %v2262_v19, %v2261_v29  ;;  %v1943_v31 = vrot.slane %v1941_v35, 5  ;;  %v4696_v39 = vrot.slane %v1157_v9, 9  ;;  %v4852_v35 = vld [vmem:[%s5497_s18 + $0x44] sm:$0x1]  ;;  %v4853_v9 = vld [vmem:[%s5497_s18 + $0x48] sm:$0xf] }
  0x76   : > { %4887 = vmatmul.msk.bf16.vlgmr.msrb.gmra.mxu0 %vm791_vm3, %v2291_v45  ;;  %v1929_v27 = vrot.slane %v1928_v63, 4  ;;  %v1236_v42 = vrot.slane %v1234_v34, 4  ;;  %v1946_v0 = vshrl.u32 %v4847_v32, 16  ;;  %v1949_v46 = vshll.u32 %v4847_v32, 16 }
  0x77   : > { %4677 = vmatmul.msk.bf16.gmra.mxu1 %vm791_vm3, %v5278_v47  ;;  %v1939_v28 = vrot.slane %v1938_v22, 4  ;;  %v1235_v45 = vsel %vm5692_vm7, %v4696_v39, %v1234_v34  ;;  %v1955_v47 = vshll.u32 %v4848_v38, 16  ;;  %v1959_v43 = vshrl.u32 %v4848_v38, 16  ;;  %v4854_v34 = vld [vmem:[%s5497_s18 + $0x4c] sm:$0xf] }
  0x78   : > { %v1934_v40 = vsel %vm5516_vm4, %v1929_v27, %v1933_v17  ;;  %v1238_v48 = vsel %vm5692_vm7, %v1236_v42, %v1237_v37  ;;  %v1326_v49 = vunpack.c.l.b16 %v1235_v45  ;;  %v1948_v55 = vrot.slane %v1946_v0, 4  ;;  %v1158_v0 = vld [vmem:[%s5497_s18 + $0x3c] sm:$0xe] }
  0x79   : > { %v1944_v41 = vsel %vm5516_vm4, %v1939_v28, %v1943_v31  ;;  %v1327_v50 = vunpack.c.l.b16 %v1238_v48  ;;  %v2263_v52 = vunpack.c.l.b16 %v1934_v40  ;;  %v1951_v10 = vrot.slane %v1949_v46, 5 }
  0x7a   : > { %v2264_v54 = vunpack.c.l.b16 %v1944_v41  ;;  %v1957_v44 = vrot.slane %v1955_v47, 5  ;;  %v1961_v58 = vrot.slane %v1959_v43, 4  ;;  %v1965_v1 = vshll.u32 %v4849_v59, 16  ;;  %v5363_v41 = vld [vmem:[%s5497_s18 + $0x40] sm:$0xf] }
  0x7b   : > { %v1354_v56 = vpack.c.b16 %v1327_v50, %v1326_v49  ;;  %v1970_v12 = vshrl.u32 %v4850_v7, 16  ;;  %v1973_v13 = vshll.u32 %v4850_v7, 16  ;;  %v1983_v15 = vshrl.u32 %v4851_v8, 16 }
  0x7c   : > { %4710 = vmatmul.msk.bf16.gmra.mxu2 %vm791_vm3, %v1351_v61  ;;  %v2293_v60 = vpack.c.b16 %v2264_v54, %v2263_v52  ;;  %v1952_v61 = vor.u32 %v1951_v10, %v1948_v55  ;;  %v1962_v62 = vor.u32 %v1961_v58, %v1957_v44  ;;  %v1967_v6 = vrot.slane %v1965_v1, 5  ;;  %v5364_v54 = vld [vmem:[%s5497_s18 + $0x44] sm:$0x1]  ;;  %v5297_v10 = vld [vmem:[%s5497_s18 + $0x3c] sm:$0xff] }
  0x7d   : > { %v1972_v19 = vrot.slane %v1970_v12, 4  ;;  %v1975_v21 = vrot.slane %v1973_v13, 5  ;;  %v1985_v22 = vrot.slane %v1983_v15, 4  ;;  %v1989_v31 = vshll.u32 %v4852_v35, 16  ;;  %v5282_v12 = vld [vmem:[%s5497_s18 + $0x3c] sm:$0xff] }
  0x7e   : > { %v1953_v2 = vrot.slane %v1952_v61, 4  ;;  %v1963_v5 = vrot.slane %v1962_v62, 4  ;;  %v1241_v42 = vrot.slane %v5363_v41, 5  ;;  %v1994_v45 = vshrl.u32 %v4853_v9, 16  ;;  %v5365_v35 = vld [vmem:[%s5497_s18 + $0x4c] sm:$0xf] }
  0x7f   : > { %v1976_v27 = vor.u32 %v1975_v21, %v1972_v19  ;;  %v1991_v39 = vrot.slane %v1989_v31, 5  ;;  %v1997_v46 = vshll.u32 %v4853_v9, 16  ;;  %v2003_v47 = vshll.u32 %v4854_v34, 16  ;;  %v4856_v19 = vld [vmem:[%s5497_s18 + $0x54] sm:$0xf] }
  0x80   : > { %v1958_v3 = vsel %vm5516_vm4, %v1953_v2, %v1957_v44  ;;  %v1968_v4 = vsel %vm5516_vm4, %v1963_v5, %v1967_v6  ;;  %v2007_v43 = vshrl.u32 %v4854_v34, 16  ;;  %v1243_v52 = vrot.slane %v1241_v42, 4  ;;  %v4857_v21 = vld [vmem:[%s5497_s18 + $0x58] sm:$0xf] }
  0x81   : > { %4823 = vmatmul.msk.bf16.gmra.mxu3 %vm791_vm3, %v5294_v14  ;;  %v1979_v14 = vshll.u32 %v4851_v8, 16  ;;  %v2265_v18 = vunpack.c.l.b16 %v1958_v3  ;;  %v2266_v29 = vunpack.c.l.b16 %v1968_v4  ;;  %v1977_v37 = vrot.slane %v1976_v27, 4 }
  0x82   : > { %v1244_v55 = vrot.slane %v5364_v54, 5  ;;  %v1996_v44 = vrot.slane %v1994_v45, 4  ;;  %v1999_v58 = vrot.slane %v1997_v46, 5  ;;  %v2005_v59 = vrot.slane %v2003_v47, 5  ;;  %v4858_v54 = vld [vmem:[%s5497_s18 + $0x5c] sm:$0x1] }
  0x83   : > { %v1981_v63 = vrot.slane %v1979_v14, 5  ;;  %v2018_v31 = vshrl.u32 %v4856_v19, 16  ;;  %v2021_v9 = vshll.u32 %v4856_v19, 16  ;;  %v2027_v34 = vshll.u32 %v4857_v21, 16  ;;  %v1160_v19 = vld [vmem:[%s5497_s18 + $0x54] sm:$0xe] }
  0x84   : > { %v1245_v5 = vsel %vm5692_vm7, %v1243_v52, %v1244_v55  ;;  %v2000_v6 = vor.u32 %v1999_v58, %v1996_v44 }
  0x85   : > { %v1986_v28 = vor.u32 %v1985_v22, %v1981_v63  ;;  %v1982_v49 = vsel %vm5516_vm4, %v1977_v37, %v1981_v63  ;;  %v1329_v14 = vunpack.c.l.b16 %v1245_v5  ;;  %v2031_v37 = vshrl.u32 %v4857_v21, 16 }
  0x86   : > { %4888 = vmatmul.msk.bf16.gmra.mxu0 %vm791_vm3, %v2292_v25  ;;  %v2294_v25 = vpack.c.b16 %v2266_v29, %v2265_v18  ;;  %v2267_v62 = vunpack.c.l.b16 %v1982_v49  ;;  %v2001_v15 = vrot.slane %v2000_v6, 4  ;;  %v2020_v49 = vrot.slane %v2018_v31, 4  ;;  %v5299_v31 = vld [vmem:[%s5497_s18 + $0x54] sm:$0xff] }
  0x87   : > { %4678 = vmatmul.msk.bf16.gmra.mxu1 %vm791_vm3, %v5279_v26  ;;  %v1987_v38 = vrot.slane %v1986_v28, 4  ;;  %v1159_v28 = vld [vmem:[%s5497_s18 + $0x48] sm:$0xe]  ;;  %v2033_v52 = vrot.slane %v2031_v37, 4 }
  0x88   : > { %v4698_v45 = vrot.slane %v1159_v28, 9 }
  0x89   : > { %v1992_v50 = vsel %vm5516_vm4, %v1987_v38, %v1991_v39  ;;  %v5366_v39 = vld [vmem:[%s5497_s18 + $0x50] sm:$0x1] }
  0x8a   : > { %v2268_v1 = vunpack.c.l.b16 %v1992_v50  ;;  %v1251_v41 = vrot.slane %v5366_v39, 5  ;;  %v2023_v50 = vrot.slane %v2021_v9, 5 }
  0x8c   : > { %4711 = vmatmul.msk.bf16.gmra.mxu2 %vm791_vm3, %v5736_v36  ;;  %v5280_v36 = vld [vmem:[%s5497_s18 + $0x24] sm:$0xff]  ;;  %v2295_v3 = vpack.c.b16 %v2268_v1, %v2267_v62  ;;  %v2037_v1 = vshll.u32 %v4858_v54, 16 }
  0x91   : > { %4824 = vmatmul.msk.bf16.gmra.mxu3 %vm791_vm3, %v5295_v51  ;;  %v4697_v51 = vrot.slane %v1158_v0, 9 }
  0x96   : > { %4889 = vmatmul.msk.bf16.gmra.mxu0 %vm791_vm3, %v2293_v60  ;;  %v2009_v60 = vrot.slane %v2007_v43, 4 }
  0x97   : > { %4679 = vmatmul.msk.bf16.gmra.mxu1 %vm791_vm3, %v5280_v36  ;;  %v4855_v36 = vld [vmem:[%s5497_s18 + $0x50] sm:$0x1] }
  0x98   : > { %v2010_v7 = vor.u32 %v2009_v60, %v2005_v59  ;;  %v2013_v8 = vshll.u32 %v4855_v36, 16  ;;  %v2024_v60 = vor.u32 %v2023_v50, %v2020_v49  ;;  %v5283_v36 = vld [vmem:[%s5497_s18 + $0x48] sm:$0xff] }
  0x99   : > { %v4861_v49 = vld [vmem:[%s5497_s18 + $0x68] sm:$0x1] }
  0x9a   : > { %v2015_v18 = vrot.slane %v2013_v8, 5  ;;  %v2025_v8 = vrot.slane %v2024_v60, 4 }
  0x9c   : > { %v5790_v11 = vpop.f32.mrf.mxu0  ;;  %4712 = vmatmul.msk.bf16.gmra.mxu2 %vm791_vm3, %v1353_v20  ;;  %v5281_v20 = vld [vmem:[%s5497_s18 + $0x30] sm:$0xff] }
  0x9f   : > { %v5798_v17 = vpop.f32.mrf.mxu1 }
  0xa1   : > { %4825 = vmatmul.msk.bf16.gmra.mxu3 %vm791_vm3, %v5296_v16  ;;  %v2011_v16 = vrot.slane %v2010_v7, 4 }
  0xa3   : > { %v2016_v27 = vsel %vm5516_vm4, %v2011_v16, %v2015_v18  ;;  %v1255_v16 = vrot.slane %v5585_v53, 5  ;;  %v4699_v53 = vrot.slane %v1160_v19, 9 }
  0xa4   : > { %v5802_v26 = vpop.f32.mrf.mxu0  ;;  %v2270_v43 = vunpack.c.l.b16 %v2016_v27 }
  0xa5   : > { %v1257_v9 = vrot.slane %v1255_v16, 4  ;;  %v1256_v50 = vsel %vm5692_vm7, %v4699_v53, %v1255_v16  ;;  %v1161_v16 = vld [vmem:[%s5497_s18 + $0x60] sm:$0xe] }
  0xa6   : > { %4890 = vmatmul.msk.bf16.gmra.mxu0 %vm791_vm3, %v2294_v25  ;;  %v1248_v25 = vrot.slane %v5365_v35, 5  ;;  %v1332_v60 = vunpack.c.l.b16 %v1256_v50  ;;  %v4700_v53 = vrot.slane %v1161_v16, 9 }
  0xa7   : > { %v5806_v32 = vpop.f32.mrf.mxu1  ;;  %4680 = vmatmul.msk.bf16.gmra.mxu1 %vm791_vm3, %v5281_v20  ;;  %v2006_v20 = vsel %vm5516_vm4, %v2001_v15, %v2005_v59  ;;  %v4860_v15 = vld [vmem:[%s5497_s18 + $0x64] sm:$0xf] }
  0xa8   : > { %v1250_v46 = vrot.slane %v1248_v25, 4  ;;  %v2269_v47 = vunpack.c.l.b16 %v2006_v20  ;;  %v1249_v44 = vsel %vm5692_vm7, %v4698_v45, %v1248_v25  ;;  %v2051_v27 = vshll.u32 %v4860_v15, 16 }
  0xa9   : > { %v2055_v28 = vshrl.u32 %v4860_v15, 16 }
  0xaa   : > { %v5811_v40 = vpop.f32.mrf.mxu2  ;;  %v1252_v58 = vsel %vm5692_vm7, %v1250_v46, %v1251_v41  ;;  %v2296_v59 = vpack.c.b16 %v2270_v43, %v2269_v47  ;;  %v2053_v46 = vrot.slane %v2051_v27, 5 }
  0xab   : > { %v1331_v5 = vunpack.c.l.b16 %v1252_v58  ;;  %v2057_v47 = vrot.slane %v2055_v28, 4  ;;  %v2061_v58 = vshll.u32 %v4861_v49, 16  ;;  %v4864_v49 = vld [vmem:[%s5497_s18 + $0x74] sm:$0x1] }
  0xac   : > { %v5815_v48 = vpop.f32.mrf.mxu0  ;;  %4713 = vmatmul.msk.bf16.gmra.mxu2 %vm791_vm3, %v1354_v56  ;;  %v1242_v56 = vsel %vm5692_vm7, %v4697_v51, %v1241_v42  ;;  %v5298_v42 = vld [vmem:[%s5497_s18 + $0x48] sm:$0xff]  ;;  %v2029_v51 = vrot.slane %v2027_v34, 5  ;;  %v1258_v34 = vrot.slane %v5590_v57, 5 }
  0xad   : > { %v1328_v13 = vunpack.c.l.b16 %v1242_v56  ;;  %v1330_v56 = vunpack.c.l.b16 %v1249_v44  ;;  %v2058_v44 = vor.u32 %v2057_v47, %v2053_v46 }
  0xae   : > { %v2034_v62 = vor.u32 %v2033_v52, %v2029_v51  ;;  %v2030_v21 = vsel %vm5516_vm4, %v2025_v8, %v2029_v51  ;;  %v1259_v57 = vsel %vm5692_vm7, %v1257_v9, %v1258_v34  ;;  %v5284_v52 = vld [vmem:[%s5497_s18 + $0x54] sm:$0xff]  ;;  %v4862_v8 = vld [vmem:[%s5497_s18 + $0x6c] sm:$0xf] }
  0xaf   : > { %v5824_v61 = vpop.f32.mrf.mxu1  ;;  %v1355_v63 = vpack.c.b16 %v1329_v14, %v1328_v13  ;;  %v1356_v13 = vpack.c.b16 %v1331_v5, %v1330_v56  ;;  %v4859_v14 = vld [vmem:[%s5497_s18 + $0x60] sm:$0xf]  ;;  %v2271_v37 = vunpack.c.l.b16 %v2030_v21  ;;  %v2059_v56 = vrot.slane %v2058_v44, 4 }
  0xb0   : > { %v2042_v25 = vshrl.u32 %v4859_v14, 16  ;;  %v2045_v20 = vshll.u32 %v4859_v14, 16  ;;  %v2063_v5 = vrot.slane %v2061_v58, 5  ;;  %v1262_v14 = vrot.slane %v5631_v24, 5 }
  0xb1   : > { %4826 = vmatmul.msk.bf16.gmra.mxu3 %vm791_vm3, %v5297_v10  ;;  %v2066_v19 = vshrl.u32 %v4862_v8, 16  ;;  %v2069_v21 = vshll.u32 %v4862_v8, 16  ;;  %v1265_v24 = vrot.slane %v5636_v30, 5  ;;  %v2085_v58 = vshll.u32 %v4864_v49, 16  ;;  %v5301_v49 = vld [vmem:[%s5497_s18 + $0x6c] sm:$0xff] }
  0xb2   : > { %v5827_v2 = vpop.f32.mrf.mxu2  ;;  %v2047_v45 = vrot.slane %v2045_v20, 5  ;;  %v1264_v9 = vrot.slane %v1262_v14, 4  ;;  %v1263_v50 = vsel %vm5692_vm7, %v4700_v53, %v1262_v14  ;;  %v4865_v14 = vld [vmem:[%s5497_s18 + $0x78] sm:$0xf] }
  0xb4   : > { %v5834_v4 = vpop.f32.mrf.mxu0  ;;  %v1266_v30 = vsel %vm5692_vm7, %v1264_v9, %v1265_v24  ;;  %v2093_v24 = vshll.u32 %v4865_v14, 16 }
  0xb6   : > { %4891 = vmatmul.msk.bf16.gmra.mxu0 %vm791_vm3, %v2295_v3  ;;  %v2035_v3 = vrot.slane %v2034_v62, 4  ;;  %v1333_v62 = vunpack.c.l.b16 %v1259_v57 }
  0xb7   : > { %4681 = vmatmul.msk.bf16.gmra.mxu1 %vm791_vm3, %v5282_v12  ;;  %v5839_v29 = vpop.f32.mrf.mxu1  ;;  %v2039_v12 = vrot.slane %v2037_v1, 5 }
  0xba   : > { %v5843_v22 = vpop.f32.mrf.mxu2 }
  0xbc   : > { %v5851_v38 = vpop.f32.mrf.mxu0  ;;  %4714 = vmatmul.msk.bf16.gmra.mxu2 %vm791_vm3, %v1355_v63  ;;  %v2040_v63 = vsel %vm5516_vm4, %v2035_v3, %v2039_v12  ;;  %v1357_v3 = vpack.c.b16 %v1333_v62, %v1332_v60  ;;  %v4863_v12 = vld [vmem:[%s5497_s18 + $0x70] sm:$0xf] }
  0xbd   : > { %v2272_v39 = vunpack.c.l.b16 %v2040_v63  ;;  %v2075_v20 = vshll.u32 %v4863_v12, 16  ;;  %v2079_v27 = vshrl.u32 %v4863_v12, 16  ;;  %v2087_v12 = vrot.slane %v2085_v58, 5 }
  0xbe   : > { %v5856_v0 = vpop.f32.mrf.mxu3 }
  0xbf   : > { %v2297_v51 = vpack.c.b16 %v2272_v39, %v2271_v37  ;;  %v2068_v39 = vrot.slane %v2066_v19, 4  ;;  %v2081_v47 = vrot.slane %v2079_v27, 4  ;;  %v4866_v19 = vld [vmem:[%s5497_s18 + $0x7c] sm:$0xf]  ;;  %v2090_v27 = vshrl.u32 %v4865_v14, 16 }
  0xc0   : > { %v2099_v9 = vshll.u32 %v4866_v19, 16 }
  0xc1   : > { %4827 = vmatmul.msk.bf16.gmra.mxu3 %vm791_vm3, %v5298_v42  ;;  %v2044_v42 = vrot.slane %v2042_v25, 4  ;;  %v2064_v25 = vsel %vm5516_vm4, %v2059_v56, %v2063_v5  ;;  %v1335_v56 = vunpack.c.l.b16 %v1266_v30 }
  0xc2   : > { %v5860_v55 = vpop.f32.mrf.mxu2  ;;  %v5862_v10 = vpop.f32.mrf.mxu1  ;;  %v2274_v37 = vunpack.c.l.b16 %v2064_v25  ;;  %v1162_v25 = vld [vmem:[%s5497_s18 + $0x6c] sm:$0xe] }
  0xc3   : > { %v2048_v54 = vor.u32 %v2047_v45, %v2044_v42  ;;  %v2071_v42 = vrot.slane %v2069_v21, 5  ;;  %v5367_v21 = vld [vmem:[%s5497_s18 + $0x70] sm:$0xf] }
  0xc4   : > { %v5869_v6 = vpop.f32.mrf.mxu0 }
  0xc6   : > { %v5871_v7 = vpop.f32.mrf.mxu3  ;;  %4892 = vmatmul.msk.bf16.gmra.mxu0 %vm791_vm3, %v2296_v59 }
  0xc7   : > { %4682 = vmatmul.msk.bf16.gmra.mxu1 %vm791_vm3, %v5283_v36  ;;  %v2049_v36 = vrot.slane %v2048_v54, 4  ;;  %v5285_v54 = vld [vmem:[%s5497_s18 + $0x60] sm:$0xff] }
  0xc9   : > { %v2054_v63 = vsel %vm5516_vm4, %v2049_v36, %v2053_v46  ;;  %v2077_v46 = vrot.slane %v2075_v20, 5  ;;  %v1334_v36 = vunpack.c.l.b16 %v1263_v50  ;;  %v4701_v50 = vrot.slane %v1162_v25, 9 }
  0xca   : > { %v5878_v18 = vpop.f32.mrf.mxu1  ;;  %v2273_v34 = vunpack.c.l.b16 %v2054_v63  ;;  %v1269_v63 = vrot.slane %v5367_v21, 5 }
  0xcb   : > { %v2082_v44 = vor.u32 %v2081_v47, %v2077_v46  ;;  %v1358_v16 = vpack.c.b16 %v1335_v56, %v1334_v36  ;;  %v2101_v36 = vrot.slane %v2099_v9, 5 }
  0xcc   : > { %v5885_v35 = vpop.f32.mrf.mxu2  ;;  %4715 = vmatmul.msk.bf16.gmra.mxu2 %vm791_vm3, %v1356_v13  ;;  %v2298_v57 = vpack.c.b16 %v2274_v37, %v2273_v34  ;;  %v2103_v34 = vshrl.u32 %v4866_v19, 16 }
  0xce   : > { %v2105_v56 = vrot.slane %v2103_v34, 4 }
  0xd0   : > { %v5890_v41 = vpop.f32.mrf.mxu0 }
  0xd1   : > { %v5892_v43 = vpop.f32.mrf.mxu3  ;;  %4828 = vmatmul.msk.bf16.gmra.mxu3 %vm791_vm3, %v5299_v31  ;;  %v5300_v31 = vld [vmem:[%s5497_s18 + $0x60] sm:$0xff] }
  0xd4   : > { %v5901_v59 = vpop.f32.mrf.mxu1  ;;  %v5903_v1 = vpop.f32.mrf.mxu2 }
  0xd6   : > { %4893 = vmatmul.msk.bf16.gmra.mxu0 %vm791_vm3, %v2297_v51  ;;  %v2072_v51 = vor.u32 %v2071_v42, %v2068_v39  ;;  %v5368_v42 = vld [vmem:[%s5497_s18 + $0x74] sm:$0x1] }
  0xd7   : > { %4683 = vmatmul.msk.bf16.gmra.mxu1 %vm791_vm3, %v5284_v52  ;;  %v1272_v47 = vrot.slane %v5368_v42, 5 }
  0xd8   : > { %v5909_v13 = vpop.f32.mrf.mxu0  ;;  %v2073_v5 = vrot.slane %v2072_v51, 4 }
  0xd9   : > { %v5912_v15 = vpop.f32.mrf.mxu3 }
  0xda   : > { %v2078_v20 = vsel %vm5516_vm4, %v2073_v5, %v2077_v46  ;;  %v1271_v46 = vrot.slane %v1269_v63, 4 }
  0xdb   : > { %v2275_v30 = vunpack.c.l.b16 %v2078_v20 }
  0xdc   : > { %4716 = vmatmul.msk.bf16.gmra.mxu2 %vm791_vm3, %v1357_v3  ;;  %v5920_v28 = vpop.f32.mrf.mxu1  ;;  %v2083_v3 = vrot.slane %v2082_v44, 4  ;;  %v2095_v44 = vrot.slane %v2093_v24, 5  ;;  %v1273_v14 = vsel %vm5692_vm7, %v1271_v46, %v1272_v47  ;;  %v4868_v46 = vld [vmem:[%s5497_s18 + $0x84] sm:$0xf] }
  0xde   : > { %v2088_v53 = vsel %vm5516_vm4, %v2083_v3, %v2087_v12  ;;  %v4867_v3 = vld [vmem:[%s5497_s18 + $0x80] sm:$0x1]  ;;  %v1270_v12 = vsel %vm5692_vm7, %v4701_v50, %v1269_v63 }
  0xdf   : > { %v5924_v45 = vpop.f32.mrf.mxu2  ;;  %v2276_v51 = vunpack.c.l.b16 %v2088_v53  ;;  %v2109_v25 = vshll.u32 %v4867_v3, 16  ;;  %v1336_v24 = vunpack.c.l.b16 %v1270_v12  ;;  %v1337_v53 = vunpack.c.l.b16 %v1273_v14 }
  0xe1   : > { %4829 = vmatmul.msk.bf16.gmra.mxu3 %vm791_vm3, %v5300_v31  ;;  %v2111_v50 = vrot.slane %v2109_v25, 5  ;;  %v5302_v25 = vld [vmem:[%s5497_s18 + $0x78] sm:$0xff] }
  0xe3   : > { %v5932_v52 = vpop.f32.mrf.mxu0 }
  0xe4   : > { %v5935_v60 = vpop.f32.mrf.mxu3  ;;  %v1073_v62 = vpop.f32.mrf.mxu1 }
  0xe6   : > { %4894 = vmatmul.msk.bf16.gmra.mxu0 %vm791_vm3, %v2298_v57  ;;  %v1074_v57 = vadd.f32 %v1073_v62, %v5790_v11  ;;  %v5286_v11 = vld [vmem:[%s5497_s18 + $0x6c] sm:$0xff]  ;;  %v2106_v62 = vor.u32 %v2105_v56, %v2101_v36  ;;  %v2117_v56 = vshll.u32 %v4868_v46, 16 }
  0xe7   : > { %v5938_v8 = vpop.f32.mrf.mxu2  ;;  %4684 = vmatmul.msk.bf16.gmra.mxu1 %vm791_vm3, %v5285_v54  ;;  %v2092_v54 = vrot.slane %v2090_v27, 4 }
  0xe9   : > { %v2096_v19 = vor.u32 %v2095_v44, %v2092_v54  ;;  %v5369_v54 = vld [vmem:[%s5497_s18 + $0x7c] sm:$0xf] }
  0xea   : > { %v1276_v44 = vrot.slane %v5369_v54, 5 }
  0xeb   : > { %v5947_v31 = vpop.f32.mrf.mxu0  ;;  %v2097_v34 = vrot.slane %v2096_v19, 4 }
  0xec   : > { %v5951_v37 = vpop.f32.mrf.mxu3  ;;  %4717 = vmatmul.msk.bf16.gmra.mxu2 %vm791_vm3, %v1358_v16  ;;  %v1075_v39 = vpop.f32.mrf.mxu1  ;;  %v2299_v16 = vpack.c.b16 %v2276_v51, %v2275_v30  ;;  %v4869_v51 = vld [vmem:[%s5497_s18 + $0x88] sm:$0xf] }
  0xed   : > { %v1076_v63 = vadd.f32 %v1075_v39, %v5802_v26  ;;  %v2102_v26 = vsel %vm5516_vm4, %v2097_v34, %v2101_v36  ;;  %v2114_v39 = vshrl.u32 %v4868_v46, 16  ;;  %v2123_v12 = vshll.u32 %v4869_v51, 16 }
  0xee   : > { %v2127_v14 = vshrl.u32 %v4869_v51, 16  ;;  %v2277_v36 = vunpack.c.l.b16 %v2102_v26  ;;  %v2119_v34 = vrot.slane %v2117_v56, 5  ;;  %v5287_v26 = vld [vmem:[%s5497_s18 + $0x78] sm:$0xff] }
  0xef   : > { %v1426_v58 = vpop.f32.mrf.mxu2 }
  0xf0   : > { %v1506_v5 = vadd.f32 %v1426_v58, %v1074_v57  ;;  %v1359_v57 = vpack.c.b16 %v1337_v53, %v1336_v24  ;;  %v1163_v58 = vld [vmem:[%s5497_s18 + $0x78] sm:$0xe]  ;;  %v1278_v24 = vrot.slane %v1276_v44, 4  ;;  %v2129_v46 = vrot.slane %v2127_v14, 4 }
  0xf1   : > { %4830 = vmatmul.msk.bf16.gmra.mxu3 %vm791_vm3, %v5301_v49  ;;  %v2107_v49 = vrot.slane %v2106_v62, 4 }
  0xf3   : > { %v2367_v21 = vpop.f32.mrf.mxu0  ;;  %v2112_v3 = vsel %vm5516_vm4, %v2107_v49, %v2111_v50  ;;  %v2125_v50 = vrot.slane %v2123_v12, 5 }
  0xf4   : > { %v1713_v20 = vpop.f32.mrf.mxu3  ;;  %v1078_v27 = vpop.f32.mrf.mxu1 }
  0xf5   : > { %v1793_v9 = vadd.f32 %v1713_v20, %v1506_v5  ;;  %v4702_v20 = vrot.slane %v1163_v58, 9  ;;  %v1079_v53 = vadd.f32 %v1078_v27, %v5815_v48 }
  0xf6   : > { %4895 = vmatmul.msk.bf16.gmra.mxu0 %vm791_vm3, %v2299_v16  ;;  %v5370_v16 = vld [vmem:[%s5497_s18 + $0x80] sm:$0x1] }
  0xf7   : > { %v1428_v42 = vpop.f32.mrf.mxu2  ;;  %v5966_v47 = vadd.f32 %v2367_v21, %v1793_v9  ;;  %4685 = vmatmul.msk.bf16.gmra.mxu1 %vm791_vm3, %v5286_v11  ;;  %v1279_v19 = vrot.slane %v5370_v16, 5  ;;  %v2278_v9 = vunpack.c.l.b16 %v2112_v3 }
  0xf8   : > { %v1507_v30 = vadd.f32 %v1428_v42, %v1076_v63  ;;  %v2116_v63 = vrot.slane %v2114_v39, 4  ;;  %v2130_v39 = vor.u32 %v2129_v46, %v2125_v50 }
  0xf9   : > { %v1280_v54 = vsel %vm5692_vm7, %v1278_v24, %v1279_v19  ;;  %v2300_v48 = vpack.c.b16 %v2278_v9, %v2277_v36  ;;  %v4871_v24 = vld [vmem:[%s5497_s18 + $0x90] sm:$0xf]  ;;  %v4872_v9 = vld [vmem:[%s5497_s18 + $0x94] sm:$0xf] }
  0xfa   : > { %v2120_v27 = vor.u32 %v2119_v34, %v2116_v63  ;;  %v1339_v14 = vunpack.c.l.b16 %v1280_v54  ;;  %v1164_v63 = vld [vmem:[%s5497_s18 + $0x84] sm:$0xe]  ;;  %v5371_v34 = vld [vmem:[%s5497_s18 + $0x88] sm:$0xf]  ;;  %v2141_v46 = vshll.u32 %v4871_v24, 16  ;;  %v2151_v54 = vshrl.u32 %v4872_v9, 16 }
  0xfb   : > { %v2369_v5 = vpop.f32.mrf.mxu0 }
  0xfc   : > { %v1715_v21 = vpop.f32.mrf.mxu3  ;;  %4718 = vmatmul.msk.bf16.gmra.mxu2 %vm791_vm3, %v1359_v57  ;;  %v1080_v11 = vpop.f32.mrf.mxu1  ;;  %v4870_v57 = vld [vmem:[%s5497_s18 + $0x8c] sm:$0x1]  ;;  %v2121_v19 = vrot.slane %v2120_v27, 4 }
  0xfd   : > { %v1794_v62 = vadd.f32 %v1715_v21, %v1507_v30  ;;  %v1277_v30 = vsel %vm5692_vm7, %v4702_v20, %v1276_v44  ;;  %v2133_v56 = vshll.u32 %v4870_v57, 16  ;;  %v1081_v44 = vadd.f32 %v1080_v11, %v5834_v4 }
  0xfe   : > { %v1338_v12 = vunpack.c.l.b16 %v1277_v30  ;;  %v2126_v4 = vsel %vm5516_vm4, %v2121_v19, %v2125_v50  ;;  %v2138_v11 = vshrl.u32 %v4871_v24, 16  ;;  %v2147_v30 = vshll.u32 %v4872_v9, 16 }
  0xff   : > { %v1431_v42 = vpop.f32.mrf.mxu2  ;;  %v5981_v49 = vadd.f32 %v2369_v5, %v1794_v62  ;;  %v2135_v20 = vrot.slane %v2133_v56, 5 }
 0x100   : > { %v1508_v51 = vadd.f32 %v1431_v42, %v1079_v53  ;;  %v1360_v53 = vpack.c.b16 %v1339_v14, %v1338_v12  ;;  %v1283_v42 = vrot.slane %v5371_v34, 5  ;;  %v2279_v14 = vunpack.c.l.b16 %v2126_v4  ;;  %v4873_v34 = vld [vmem:[%s5497_s18 + $0x98] sm:$0x1]  ;;  %v5288_v4 = vld [vmem:[%s5497_s18 + $0x84] sm:$0xff] }
 0x101   : > { %4831 = vmatmul.msk.bf16.gmra.mxu3 %vm791_vm3, %v5302_v25  ;;  %v2131_v25 = vrot.slane %v2130_v39, 4  ;;  %v4703_v39 = vrot.slane %v1164_v63, 9  ;;  %v2140_v19 = vrot.slane %v2138_v11, 4  ;;  %v2149_v24 = vrot.slane %v2147_v30, 5 }
 0x102   : > { %v1285_v12 = vrot.slane %v1283_v42, 4 }
 0x103   : > { %v2372_v58 = vpop.f32.mrf.mxu0  ;;  %v2136_v57 = vsel %vm5516_vm4, %v2131_v25, %v2135_v20 }
 0x104   : > { %v1718_v5 = vpop.f32.mrf.mxu3  ;;  %v1083_v3 = vpop.f32.mrf.mxu1 }
 0x105   : > { %v1795_v16 = vadd.f32 %v1718_v5, %v1508_v51  ;;  %v5303_v5 = vld [vmem:[%s5497_s18 + $0x84] sm:$0xff] }
 0x106   : > { %4896 = vmatmul.msk.bf16.gmra.mxu0 %vm791_vm3, %v2300_v48  ;;  %v5372_v48 = vld [vmem:[%s5497_s18 + $0x8c] sm:$0x1] }
 0x107   : > { %v1433_v21 = vpop.f32.mrf.mxu2  ;;  %v5992_v62 = vadd.f32 %v2372_v58, %v1795_v16  ;;  %4686 = vmatmul.msk.bf16.gmra.mxu1 %vm791_vm3, %v5287_v26  ;;  %v1286_v27 = vrot.slane %v5372_v48, 5  ;;  %v1084_v16 = vadd.f32 %v1083_v3, %v5851_v38 }
 0x108   : > { %v1509_v36 = vadd.f32 %v1433_v21, %v1081_v44  ;;  %v2280_v44 = vunpack.c.l.b16 %v2136_v57  ;;  %v2143_v21 = vrot.slane %v2141_v46, 5  ;;  %v2157_v46 = vshll.u32 %v4873_v34, 16 }
 0x109   : > { %v1287_v38 = vsel %vm5692_vm7, %v1285_v12, %v1286_v27  ;;  %v5373_v27 = vld [vmem:[%s5497_s18 + $0x94] sm:$0xf] }
 0x10a   : > { %v2301_v3 = vpack.c.b16 %v2280_v44, %v2279_v14  ;;  %v2159_v14 = vrot.slane %v2157_v46, 5 }
 0x10b   : > { %v2374_v51 = vpop.f32.mrf.mxu0 }
 0x10c   : > { %v1720_v58 = vpop.f32.mrf.mxu3  ;;  %4719 = vmatmul.msk.bf16.gmra.mxu2 %vm791_vm3, %v1360_v53  ;;  %v1085_v26 = vpop.f32.mrf.mxu1  ;;  %v2153_v53 = vrot.slane %v2151_v54, 4  ;;  %v1341_v54 = vunpack.c.l.b16 %v1287_v38 }
 0x10d   : > { %v1796_v56 = vadd.f32 %v1720_v58, %v1509_v36  ;;  %v1086_v50 = vadd.f32 %v1085_v26, %v5869_v6  ;;  %v1284_v6 = vsel %vm5692_vm7, %v4703_v39, %v1283_v42  ;;  %v2144_v36 = vor.u32 %v2143_v21, %v2140_v19  ;;  %v1165_v42 = vld [vmem:[%s5497_s18 + $0x90] sm:$0xe]  ;;  %v4875_v21 = vld [vmem:[%s5497_s18 + $0xa0] sm:$0xf] }
 0x10e   : > { %v2154_v11 = vor.u32 %v2153_v53, %v2149_v24  ;;  %v1340_v30 = vunpack.c.l.b16 %v1284_v6  ;;  %v1290_v26 = vrot.slane %v5373_v27, 5 }
 0x10f   : > { %v1436_v25 = vpop.f32.mrf.mxu2  ;;  %v6008_v20 = vadd.f32 %v2374_v51, %v1796_v56  ;;  %v2145_v39 = vrot.slane %v2144_v36, 4 }
 0x110   : > { %v1510_v9 = vadd.f32 %v1436_v25, %v1084_v16  ;;  %v2155_v12 = vrot.slane %v2154_v11, 4  ;;  %v4874_v16 = vld [vmem:[%s5497_s18 + $0x9c] sm:$0xf]  ;;  %v1361_v19 = vpack.c.b16 %v1341_v54, %v1340_v30  ;;  %v5374_v25 = vld [vmem:[%s5497_s18 + $0x98] sm:$0x1] }
 0x111   : > { %4832 = vmatmul.msk.bf16.gmra.mxu3 %vm791_vm3, %v5303_v5  ;;  %v1293_v53 = vrot.slane %v5374_v25, 5  ;;  %v2150_v34 = vsel %vm5516_vm4, %v2145_v39, %v2149_v24  ;;  %v2162_v6 = vshrl.u32 %v4874_v16, 16  ;;  %v2165_v36 = vshll.u32 %v4874_v16, 16 }
 0x112   : > { %v2281_v54 = vunpack.c.l.b16 %v2150_v34 }
 0x113   : > { %v2377_v63 = vpop.f32.mrf.mxu0 }
 0x114   : > { %v1723_v51 = vpop.f32.mrf.mxu3  ;;  %v1088_v57 = vpop.f32.mrf.mxu1 }
 0x115   : > { %v1797_v48 = vadd.f32 %v1723_v51, %v1510_v9  ;;  %v1089_v58 = vadd.f32 %v1088_v57, %v5890_v41  ;;  %v4704_v41 = vrot.slane %v1165_v42, 9  ;;  %v1292_v9 = vrot.slane %v1290_v26, 4  ;;  %v5304_v51 = vld [vmem:[%s5497_s18 + $0x90] sm:$0xff] }
 0x116   : > { %4897 = vmatmul.msk.bf16.gmra.mxu0 %vm791_vm3, %v2301_v3  ;;  %v2160_v3 = vsel %vm5516_vm4, %v2155_v12, %v2159_v14  ;;  %v2164_v42 = vrot.slane %v2162_v6, 4 }
 0x117   : > { %v1438_v56 = vpop.f32.mrf.mxu2  ;;  %v6021_v5 = vadd.f32 %v2377_v63, %v1797_v48  ;;  %4687 = vmatmul.msk.bf16.gmra.mxu1 %vm791_vm3, %v5288_v4  ;;  %v2171_v63 = vshll.u32 %v4875_v21, 16  ;;  %v2175_v4 = vshrl.u32 %v4875_v21, 16  ;;  %v1291_v24 = vsel %vm5692_vm7, %v4704_v41, %v1290_v26  ;;  %v5289_v41 = vld [vmem:[%s5497_s18 + $0x90] sm:$0xff] }
 0x118   : > { %v1511_v44 = vadd.f32 %v1438_v56, %v1086_v50  ;;  %v1294_v30 = vsel %vm5692_vm7, %v1292_v9, %v1293_v53  ;;  %v2282_v48 = vunpack.c.l.b16 %v2160_v3  ;;  %v2167_v56 = vrot.slane %v2165_v36, 5 }
 0x119   : > { %v2173_v12 = vrot.slane %v2171_v63, 5  ;;  %v2177_v14 = vrot.slane %v2175_v4, 4  ;;  %v1343_v26 = vunpack.c.l.b16 %v1294_v30  ;;  %v4878_v63 = vld [vmem:[%s5497_s18 + $0xac] sm:$0xf]  ;;  %v5375_v30 = vld [vmem:[%s5497_s18 + $0xa0] sm:$0xf] }
 0x11a   : > { %v2168_v25 = vor.u32 %v2167_v56, %v2164_v42  ;;  %v1166_v42 = vld [vmem:[%s5497_s18 + $0x9c] sm:$0xe]  ;;  %v2199_v56 = vshrl.u32 %v4878_v63, 16 }
 0x11b   : > { %v2379_v38 = vpop.f32.mrf.mxu0  ;;  %v2178_v53 = vor.u32 %v2177_v14, %v2173_v12  ;;  %v5376_v14 = vld [vmem:[%s5497_s18 + $0xa4] sm:$0x1] }
 0x11c   : > { %v1725_v11 = vpop.f32.mrf.mxu3  ;;  %4720 = vmatmul.msk.bf16.gmra.mxu2 %vm791_vm3, %v1361_v19  ;;  %v1090_v50 = vpop.f32.mrf.mxu1  ;;  %v2302_v19 = vpack.c.b16 %v2282_v48, %v2281_v54  ;;  %v1297_v54 = vrot.slane %v5375_v30, 5 }
 0x11d   : > { %v1798_v46 = vadd.f32 %v1725_v11, %v1511_v44  ;;  %v1091_v57 = vadd.f32 %v1090_v50, %v5909_v13  ;;  %v4876_v44 = vld [vmem:[%s5497_s18 + $0xa4] sm:$0x1]  ;;  %v1342_v13 = vunpack.c.l.b16 %v1291_v24  ;;  %v2169_v50 = vrot.slane %v2168_v25, 4 }
 0x11e   : > { %v2181_v9 = vshll.u32 %v4876_v44, 16 }
 0x11f   : > { %v1441_v27 = vpop.f32.mrf.mxu2  ;;  %v6038_v39 = vadd.f32 %v2379_v38, %v1798_v46  ;;  %v1362_v36 = vpack.c.b16 %v1343_v26, %v1342_v13  ;;  %v2179_v46 = vrot.slane %v2178_v53, 4  ;;  %v2174_v13 = vsel %vm5516_vm4, %v2169_v50, %v2173_v12 }
 0x120   : > { %v1512_v16 = vadd.f32 %v1441_v27, %v1089_v58  ;;  %v4877_v58 = vld [vmem:[%s5497_s18 + $0xa8] sm:$0xf]  ;;  %v2195_v27 = vshll.u32 %v4878_v63, 16  ;;  %v2283_v12 = vunpack.c.l.b16 %v2174_v13 }
 0x121   : > { %4833 = vmatmul.msk.bf16.gmra.mxu3 %vm791_vm3, %v5304_v51  ;;  %v2183_v51 = vrot.slane %v2181_v9, 5  ;;  %v2186_v48 = vshrl.u32 %v4877_v58, 16 }
 0x123   : > { %v2382_v21 = vpop.f32.mrf.mxu0  ;;  %v2184_v26 = vsel %vm5516_vm4, %v2179_v46, %v2183_v51  ;;  %v2188_v25 = vrot.slane %v2186_v48, 4 }
 0x124   : > { %v1728_v34 = vpop.f32.mrf.mxu3  ;;  %v1093_v6 = vpop.f32.mrf.mxu1  ;;  %v2284_v63 = vunpack.c.l.b16 %v2184_v26 }
 0x125   : > { %v1799_v38 = vadd.f32 %v1728_v34, %v1512_v16  ;;  %v1094_v3 = vadd.f32 %v1093_v6, %v5932_v52  ;;  %v2189_v52 = vshll.u32 %v4877_v58, 16  ;;  %v1300_v16 = vrot.slane %v5376_v14, 5  ;;  %v5305_v34 = vld [vmem:[%s5497_s18 + $0x9c] sm:$0xff] }
 0x126   : > { %4898 = vmatmul.msk.bf16.gmra.mxu0 %vm791_vm3, %v2302_v19  ;;  %v2201_v58 = vrot.slane %v2199_v56, 4 }
 0x127   : > { %v1443_v4 = vpop.f32.mrf.mxu2  ;;  %v6047_v11 = vadd.f32 %v2382_v21, %v1799_v38  ;;  %4688 = vmatmul.msk.bf16.gmra.mxu1 %vm791_vm3, %v5289_v41  ;;  %v4705_v21 = vrot.slane %v1166_v42, 9  ;;  %v1299_v41 = vrot.slane %v1297_v54, 4  ;;  %v2191_v53 = vrot.slane %v2189_v52, 5 }
 0x128   : > { %v1513_v24 = vadd.f32 %v1443_v4, %v1091_v57  ;;  %v2197_v38 = vrot.slane %v2195_v27, 5  ;;  %v4879_v4 = vld [vmem:[%s5497_s18 + $0xb0] sm:$0x1]  ;;  %v2303_v52 = vpack.c.b16 %v2284_v63, %v2283_v12  ;;  %v5290_v27 = vld [vmem:[%s5497_s18 + $0x9c] sm:$0xff] }
 0x129   : > { %v2192_v30 = vor.u32 %v2191_v53, %v2188_v25  ;;  %v2205_v48 = vshll.u32 %v4879_v4, 16 }
 0x12b   : > { %v2384_v44 = vpop.f32.mrf.mxu0  ;;  %v2193_v13 = vrot.slane %v2192_v30, 4  ;;  %v5378_v30 = vld [vmem:[%s5497_s18 + $0xb0] sm:$0x1] }
 0x12c   : > { %v1730_v19 = vpop.f32.mrf.mxu3  ;;  %4721 = vmatmul.msk.bf16.gmra.mxu2 %vm791_vm3, %v1362_v36  ;;  %v1095_v57 = vpop.f32.mrf.mxu1  ;;  %v1298_v36 = vsel %vm5692_vm7, %v4705_v21, %v1297_v54  ;;  %v4880_v21 = vld [vmem:[%s5497_s18 + $0xb4] sm:$0xf] }
 0x12d   : > { %v1800_v9 = vadd.f32 %v1730_v19, %v1513_v24  ;;  %v1096_v6 = vadd.f32 %v1095_v57, %v5947_v31  ;;  %v1301_v24 = vsel %vm5692_vm7, %v1299_v41, %v1300_v16  ;;  %v2202_v31 = vor.u32 %v2201_v58, %v2197_v38  ;;  %v4881_v41 = vld [vmem:[%s5497_s18 + $0xb8] sm:$0xf]  ;;  %v1167_v58 = vld [vmem:[%s5497_s18 + $0xa8] sm:$0xe] }
 0x12e   : > { %v2207_v19 = vrot.slane %v2205_v48, 5  ;;  %v2198_v12 = vsel %vm5516_vm4, %v2193_v13, %v2197_v38  ;;  %v2210_v4 = vshrl.u32 %v4880_v21, 16 }
 0x12f   : > { %v1446_v50 = vpop.f32.mrf.mxu2  ;;  %v6061_v46 = vadd.f32 %v2384_v44, %v1800_v9  ;;  %v1345_v44 = vunpack.c.l.b16 %v1301_v24  ;;  %v2203_v26 = vrot.slane %v2202_v31, 4  ;;  %v5377_v9 = vld [vmem:[%s5497_s18 + $0xac] sm:$0xf]  ;;  %v1307_v31 = vrot.slane %v5378_v30, 5 }
 0x130   : > { %v1514_v51 = vadd.f32 %v1446_v50, %v1094_v3  ;;  %v1344_v3 = vunpack.c.l.b16 %v1298_v36  ;;  %v2213_v50 = vshll.u32 %v4880_v21, 16  ;;  %v2223_v36 = vshrl.u32 %v4881_v41, 16 }
 0x131   : > { %4834 = vmatmul.msk.bf16.gmra.mxu3 %vm791_vm3, %v5305_v34  ;;  %v1304_v34 = vrot.slane %v5377_v9, 5  ;;  %v2208_v63 = vsel %vm5516_vm4, %v2203_v26, %v2207_v19 }
 0x132   : > { %v1363_v53 = vpack.c.b16 %v1345_v44, %v1344_v3  ;;  %v2285_v3 = vunpack.c.l.b16 %v2198_v12  ;;  %v2286_v44 = vunpack.c.l.b16 %v2208_v63  ;;  %v2215_v13 = vrot.slane %v2213_v50, 5  ;;  %v5379_v50 = vld [vmem:[%s5497_s18 + $0x10] sm:$0xf] }
 0x133   : > { %v2387_v42 = vpop.f32.mrf.mxu0  ;;  %v2225_v19 = vrot.slane %v2223_v36, 4 }
 0x134   : > { %v1733_v56 = vpop.f32.mrf.mxu3  ;;  %v1098_v14 = vpop.f32.mrf.mxu1 }
 0x135   : > { %v1801_v54 = vadd.f32 %v1733_v56, %v1514_v51  ;;  %v2219_v51 = vshll.u32 %v4881_v41, 16  ;;  %v1099_v38 = vadd.f32 %v1098_v14, %v5798_v17  ;;  %v5306_v56 = vld [vmem:[%s5497_s18 + $0xa8] sm:$0xff]  ;;  %v4882_v41 = vld [vmem:[%s5497_s18 + $0xbc] sm:$0x1]  ;;  %v2304_v14 = vpack.c.b16 %v2286_v44, %v2285_v3  ;;  %v4883_v3 = vld [vmem:[%s5497_s18 + $0xc0] sm:$0xf] }
 0x136   : > { %4899 = vmatmul.msk.bf16.gmra.mxu0 %vm791_vm3, %v2303_v52  ;;  %v4706_v52 = vrot.slane %v1167_v58, 9  ;;  %v2229_v12 = vshll.u32 %v4882_v41, 16  ;;  %v5381_v41 = vld [vmem:[%s5497_s18 + $0xb8] sm:$0xf] }
 0x137   : > { %v1448_v16 = vpop.f32.mrf.mxu2  ;;  %v6070_v57 = vadd.f32 %v2387_v42, %v1801_v54  ;;  %4689 = vmatmul.msk.bf16.gmra.mxu1 %vm791_vm3, %v5290_v27  ;;  %v1306_v42 = vrot.slane %v1304_v34, 4  ;;  %v2212_v54 = vrot.slane %v2210_v4, 4  ;;  %v2221_v26 = vrot.slane %v2219_v51, 5  ;;  %v5291_v4 = vld [vmem:[%s5497_s18 + $0xa8] sm:$0xff] }
 0x138   : > { %v1515_v25 = vadd.f32 %v1448_v16, %v1096_v6  ;;  %v2545_v51 = vrot.slane %v5379_v50, 5 }
 0x139   : > { %v1308_v17 = vsel %vm5692_vm7, %v1306_v42, %v1307_v31  ;;  %v2216_v9 = vor.u32 %v2215_v13, %v2212_v54  ;;  %v2226_v58 = vor.u32 %v2225_v19, %v2221_v26  ;;  %v2231_v42 = vrot.slane %v2229_v12, 5  ;;  %v5380_v54 = vld [vmem:[%s5497_s18 + $0x14] sm:$0x1] }
 0x13a   : > { %v2547_v44 = vrot.slane %v2545_v51, 4  ;;  %v2548_v13 = vrot.slane %v5380_v54, 5 }
 0x13b   : > { %v2389_v24 = vpop.f32.mrf.mxu0  ;;  %v2217_v31 = vrot.slane %v2216_v9, 4  ;;  %v2234_v9 = vshrl.u32 %v4883_v3, 16 }
 0x13c   : > { %v1735_v48 = vpop.f32.mrf.mxu3  ;;  %4722 = vmatmul.msk.bf16.gmra.mxu2 %vm791_vm3, %v1363_v53  ;;  %v1100_v6 = vpop.f32.mrf.mxu1 }
 0x13d   : > { %v1802_v27 = vadd.f32 %v1735_v48, %v1515_v25  ;;  %v1305_v25 = vsel %vm5692_vm7, %v4706_v52, %v1304_v34  ;;  %v1347_v48 = vunpack.c.l.b16 %v1308_v17  ;;  %v1101_v34 = vadd.f32 %v1100_v6, %v5806_v32  ;;  %v4884_v32 = vld [vmem:[%s5497_s18 + $0xc4] sm:$0xf]  ;;  %v1168_v6 = vld [vmem:[%s5497_s18 + $0xb4] sm:$0xe] }
 0x13e   : > { %v1346_v30 = vunpack.c.l.b16 %v1305_v25  ;;  %v2227_v52 = vrot.slane %v2226_v58, 4  ;;  %v4903_v25 = vld [vmem:[%s5497_s18 + $0xc] sm:$0xe]  ;;  %v2222_v17 = vsel %vm5516_vm4, %v2217_v31, %v2221_v26  ;;  %v2247_v50 = vshrl.u32 %v4884_v32, 16 }
 0x13f   : > { %v1451_v16 = vpop.f32.mrf.mxu2  ;;  %v6085_v21 = vadd.f32 %v2389_v24, %v1802_v27  ;;  %v4919_v58 = vrot.slane %v4903_v25, 9  ;;  %v2549_v31 = vsel %vm5692_vm7, %v2547_v44, %v2548_v13  ;;  %v5065_v44 = vld [vmem:[%s5497_s18 + $0x18] sm:$0xf] }
 0x140   : > { %v1516_v53 = vadd.f32 %v1451_v16, %v1099_v38  ;;  %v1364_v16 = vpack.c.b16 %v1347_v48, %v1346_v30  ;;  %v2658_v25 = vunpack.c.l.b16 %v2549_v31 }
 0x141   : > { %6993 = vst [vmem:[#allocation2_spill] sm:$0xff] %v6085_v21  ;;  %4835 = vmatmul.msk.bf16.gmra.mxu3 %vm791_vm3, %v5306_v56  ;;  %v2546_v26 = vsel %vm5692_vm7, %v4919_v58, %v2545_v51  ;;  %v2249_v21 = vrot.slane %v2247_v50, 4 }
 0x143   : > { %v2392_v63 = vpop.f32.mrf.mxu0 }
 0x144   : > { %v1738_v36 = vpop.f32.mrf.mxu3  ;;  %v1103_v24 = vpop.f32.mrf.mxu1 }
 0x145   : > { %v1803_v27 = vadd.f32 %v1738_v36, %v1516_v53  ;;  %v1311_v53 = vrot.slane %v5381_v41, 5  ;;  %v5382_v36 = vld [vmem:[%s5497_s18 + $0xbc] sm:$0x1]  ;;  %v2236_v41 = vrot.slane %v2234_v9, 4  ;;  %v3213_v9 = vshrl.u32 %v5065_v44, 16 }
 0x146   : > { %4900 = vmatmul.msk.bf16.gmra.mxu0 %vm791_vm3, %v2304_v14  ;;  %v2232_v14 = vsel %vm5516_vm4, %v2227_v52, %v2231_v42  ;;  %v1314_v30 = vrot.slane %v5382_v36, 5  ;;  %v5307_v42 = vld [vmem:[%s5497_s18 + $0xb4] sm:$0xff] }
 0x147   : > { %v1453_v38 = vpop.f32.mrf.mxu2  ;;  %v6097_v56 = vadd.f32 %v2392_v63, %v1803_v27  ;;  %4690 = vmatmul.msk.bf16.gmra.mxu1 %vm791_vm3, %v5291_v4  ;;  %v2237_v63 = vshll.u32 %v4883_v3, 16  ;;  %v2243_v4 = vshll.u32 %v4884_v32, 16  ;;  %v2287_v3 = vunpack.c.l.b16 %v2222_v17  ;;  %v6130_v17 = vld [vmem:[%s5497_s18 + $0x1c] sm:$0xf] }
 0x148   : > { %v1517_v19 = vadd.f32 %v1453_v38, %v1101_v34  ;;  %v4707_v34 = vrot.slane %v1168_v6, 9  ;;  %v1313_v38 = vrot.slane %v1311_v53, 4  ;;  %v2288_v54 = vunpack.c.l.b16 %v2232_v14 }
 0x149   : > { %v1104_v32 = vadd.f32 %v1103_v24, %v5824_v61  ;;  %v2239_v51 = vrot.slane %v2237_v63, 5  ;;  %v2245_v58 = vrot.slane %v2243_v4, 5  ;;  %v5292_v4 = vld [vmem:[%s5497_s18 + $0xb4] sm:$0xff] }
 0x14a   : > { %v1312_v61 = vsel %vm5692_vm7, %v4707_v34, %v1311_v53  ;;  %v1315_v24 = vsel %vm5692_vm7, %v1313_v38, %v1314_v30  ;;  %v2305_v14 = vpack.c.b16 %v2288_v54, %v2287_v3  ;;  %v3226_v53 = vshrl.u32 %v6130_v17, 16 }
 0x14b   : > { %v2394_v12 = vpop.f32.mrf.mxu0  ;;  %v2240_v50 = vor.u32 %v2239_v51, %v2236_v41  ;;  %v3215_v38 = vrot.slane %v3213_v9, 4 }
 0x14c   : > { %v1740_v48 = vpop.f32.mrf.mxu3  ;;  %4723 = vmatmul.msk.bf16.gmra.mxu2 %vm791_vm3, %v1364_v16  ;;  %v1105_v27 = vpop.f32.mrf.mxu1  ;;  %v2657_v16 = vunpack.c.l.b16 %v2546_v26  ;;  %v2250_v26 = vor.u32 %v2249_v21, %v2245_v58 }
 0x14d   : > { %v1804_v52 = vadd.f32 %v1740_v48, %v1517_v19  ;;  %v4885_v19 = vld [vmem:[%s5497_s18 + $0xc8] sm:$0x1]  ;;  %v1106_v34 = vadd.f32 %v1105_v27, %v5839_v29  ;;  %v2241_v21 = vrot.slane %v2240_v50, 4 }
 0x14e   : > { %v6122_v48 = vpack.c.b16 %v2658_v25, %v2657_v16  ;;  %v2253_v31 = vshll.u32 %v4885_v19, 16  ;;  %v1348_v16 = vunpack.c.l.b16 %v1312_v61  ;;  %v3222_v25 = vshll.u32 %v6130_v17, 16 }
 0x14f   : > { %v1456_v6 = vpop.f32.mrf.mxu2  ;;  %v6118_v36 = vadd.f32 %v2394_v12, %v1804_v52  ;;  %v3216_v12 = vshll.u32 %v5065_v44, 16  ;;  %v2246_v27 = vsel %vm5516_vm4, %v2241_v21, %v2245_v58  ;;  %v6156_v21 = vld [vmem:[%s5497_s18 + $0x28] sm:$0xf] }
 0x150   : > { %v1518_v13 = vadd.f32 %v1456_v6, %v1104_v32  ;;  %v2251_v6 = vrot.slane %v2250_v26, 4  ;;  %v2255_v51 = vrot.slane %v2253_v31, 5  ;;  %v3224_v61 = vrot.slane %v3222_v25, 5  ;;  %v5308_v31 = vld [vmem:[%s5497_s18 + $0xc0] sm:$0xff] }
 0x151   : > { %4836 = vmatmul.msk.bf16.gmra.mxu3 %vm791_vm3, %v5307_v42  ;;  %v1349_v42 = vunpack.c.l.b16 %v1315_v24  ;;  %v3218_v3 = vrot.slane %v3216_v12, 5  ;;  %v3228_v24 = vrot.slane %v3226_v53, 4 }
 0x153   : > { %v2397_v63 = vpop.f32.mrf.mxu0  ;;  %v1365_v19 = vpack.c.b16 %v1349_v42, %v1348_v16  ;;  %v3219_v9 = vor.u32 %v3218_v3, %v3215_v38  ;;  %v2289_v16 = vunpack.c.l.b16 %v2246_v27  ;;  %v5068_v3 = vld [vmem:[%s5497_s18 + $0x24] sm:$0xf] }
 0x154   : > { %v1743_v52 = vpop.f32.mrf.mxu3  ;;  %v1108_v32 = vpop.f32.mrf.mxu1  ;;  %v3237_v27 = vshrl.u32 %v5068_v3, 16 }
 0x155   : > { %v1805_v30 = vadd.f32 %v1743_v52, %v1518_v13  ;;  %v6141_v13 = vld [vmem:[%s5497_s18 + $0x20] sm:$0x1]  ;;  %v1109_v52 = vadd.f32 %v1108_v32, %v5862_v10  ;;  %v3220_v53 = vrot.slane %v3219_v9, 4 }
 0x156   : > { %4901 = vmatmul.msk.bf16.gmra.mxu0 %vm791_vm3, %v2305_v14  ;;  %v2256_v14 = vsel %vm5516_vm4, %v2251_v6, %v2255_v51  ;;  %v3232_v50 = vshll.u32 %v6141_v13, 16  ;;  %v3884_v6 = vrot.slane %v6130_v17, 5 }
 0x157   : > { %v1458_v54 = vpop.f32.mrf.mxu2  ;;  %v6137_v41 = vadd.f32 %v2397_v63, %v1805_v30  ;;  %4691 = vmatmul.msk.bf16.gmra.mxu1 %vm791_vm3, %v5292_v4  ;;  %v3229_v4 = vor.u32 %v3228_v24, %v3224_v61  ;;  %v2290_v42 = vunpack.c.l.b16 %v2256_v14  ;;  %v3225_v32 = vsel %vm5516_vm4, %v3220_v53, %v3224_v61  ;;  %v5383_v24 = vld [vmem:[%s5497_s18 + $0x1c] sm:$0xf]  ;;  %v5130_v14 = vld [vmem:[%s5497_s18 + $0x18] sm:$0xe]  ;;  %v5384_v61 = vld [vmem:[%s5497_s18 + $0x20] sm:$0x1] }
 0x158   : > { %v1519_v44 = vadd.f32 %v1458_v54, %v1106_v34  ;;  %v3234_v38 = vrot.slane %v3232_v50, 5  ;;  %v3246_v50 = vshll.u32 %v6156_v21, 16  ;;  %v3886_v53 = vrot.slane %v3884_v6, 4 }
 0x159   : > { %v3230_v34 = vrot.slane %v3229_v4, 4  ;;  %v2306_v54 = vpack.c.b16 %v2290_v42, %v2289_v16  ;;  %v3240_v4 = vshll.u32 %v5068_v3, 16 }
 0x15b   : > { %v2399_v29 = vpop.f32.mrf.mxu0 }
 0x15c   : > { %v1745_v12 = vpop.f32.mrf.mxu3  ;;  %4724 = vmatmul.msk.bf16.gmra.mxu2 %vm791_vm3, %v1365_v19  ;;  %v1110_v63 = vpop.f32.mrf.mxu1  ;;  %v3235_v19 = vsel %vm5516_vm4, %v3230_v34, %v3234_v38  ;;  %v5309_v38 = vld [vmem:[%s5497_s18 + $0x18] sm:$0xff] }
 0x15d   : > { %v1806_v26 = vadd.f32 %v1745_v12, %v1519_v44  ;;  %v4904_v12 = vld [vmem:[%s5497_s18 + $0x18] sm:$0xe]  ;;  %v1111_v17 = vadd.f32 %v1110_v63, %v5878_v18  ;;  %v3599_v3 = vunpack.c.l.b16 %v3235_v19  ;;  %v3239_v18 = vrot.slane %v3237_v27, 4 }
 0x15e   : > { %v3242_v63 = vrot.slane %v3240_v4, 5 }
 0x15f   : > { %v1461_v58 = vpop.f32.mrf.mxu2  ;;  %v6151_v25 = vadd.f32 %v2399_v29, %v1806_v26  ;;  %v2552_v29 = vrot.slane %v5383_v24, 5  ;;  %v3250_v26 = vshrl.u32 %v6156_v21, 16 }
 0x160   : > { %v1520_v30 = vadd.f32 %v1461_v58, %v1109_v52  ;;  %v3598_v52 = vunpack.c.l.b16 %v3225_v32  ;;  %v5146_v58 = vrot.slane %v5130_v14, 9 }
 0x161   : > { %4837 = vmatmul.msk.bf16.gmra.mxu3 %vm791_vm3, %v5308_v31  ;;  %v2555_v31 = vrot.slane %v5384_v61, 5  ;;  %v2554_v24 = vrot.slane %v2552_v29, 4  ;;  %v3252_v32 = vrot.slane %v3250_v26, 4  ;;  %v6180_v61 = vld [vmem:[%s5497_s18 + $0x2c] sm:$0x1] }
 0x162   : > { %v3630_v19 = vpack.c.b16 %v3599_v3, %v3598_v52  ;;  %v3256_v26 = vshll.u32 %v6180_v61, 16  ;;  %v5071_v3 = vld [vmem:[%s5497_s18 + $0x30] sm:$0xf] }
 0x163   : > { %v2402_v10 = vpop.f32.mrf.mxu0 }
 0x164   : > { %v1748_v51 = vpop.f32.mrf.mxu3  ;;  %v1113_v44 = vpop.f32.mrf.mxu1 }
 0x165   : > { %v1807_v9 = vadd.f32 %v1748_v51, %v1520_v30  ;;  %v3887_v30 = vrot.slane %v6141_v13, 5  ;;  %v4920_v51 = vrot.slane %v4904_v12, 9  ;;  %v2556_v12 = vsel %vm5692_vm7, %v2554_v24, %v2555_v31 }
 0x166   : > { %4902 = vmatmul.msk.bf16.gmra.mxu0 %vm791_vm3, %v2306_v54  ;;  %v6177_v54 = vrot.slane %v3246_v50, 5  ;;  %v3243_v50 = vor.u32 %v3242_v63, %v3239_v18  ;;  %v3258_v24 = vrot.slane %v3256_v26, 5  ;;  %v3264_v18 = vshll.u32 %v5071_v3, 16 }
 0x167   : > { %v1463_v16 = vpop.f32.mrf.mxu2  ;;  %v6171_v42 = vadd.f32 %v2402_v10, %v1807_v9  ;;  %4936 = vmatmul.msk.bf16.vlgmr.msra.gmra.mxu1 %vm791_vm3, %v6122_v48  ;;  %v3885_v48 = vsel %vm5692_vm7, %v5146_v58, %v3884_v6  ;;  %v3888_v14 = vsel %vm5692_vm7, %v3886_v53, %v3887_v30  ;;  %v2553_v9 = vsel %vm5692_vm7, %v4920_v51, %v2552_v29  ;;  %v6198_v29 = vld [vmem:[%s5497_s18 + $0x34] sm:$0xf] }
 0x168   : > { %v1521_v34 = vadd.f32 %v1463_v16, %v1111_v17  ;;  %v3253_v6 = vor.u32 %v3252_v32, %v6177_v54  ;;  %v1114_v17 = vadd.f32 %v1113_v44, %v5901_v59  ;;  %v3996_v16 = vunpack.c.l.b16 %v3885_v48 }
 0x169   : > { %v3997_v58 = vunpack.c.l.b16 %v3888_v14  ;;  %v2659_v30 = vunpack.c.l.b16 %v2553_v9  ;;  %v3261_v44 = vshrl.u32 %v5071_v3, 16  ;;  %v3270_v63 = vshll.u32 %v6198_v29, 16  ;;  %v5385_v9 = vld [vmem:[%s5497_s18 + $0x28] sm:$0xf] }
 0x16a   : > { %v3254_v51 = vrot.slane %v3253_v6, 4  ;;  %v3891_v48 = vrot.slane %v6156_v21, 5 }
 0x16b   : > { %v2404_v10 = vpop.f32.mrf.mxu0  ;;  %v4028_v59 = vpack.c.b16 %v3997_v58, %v3996_v16  ;;  %v4905_v58 = vld [vmem:[%s5497_s18 + $0x24] sm:$0xe] }
 0x16c   : > { %v1750_v13 = vpop.f32.mrf.mxu3  ;;  %5049 = vmatmul.msk.bf16.vlgmr.msra.gmra.mxu2 %vm791_vm3, %v5309_v38  ;;  %v1115_v27 = vpop.f32.mrf.mxu1  ;;  %v2660_v38 = vunpack.c.l.b16 %v2556_v12  ;;  %v2559_v12 = vrot.slane %v5385_v9, 5  ;;  %v3259_v16 = vsel %vm5516_vm4, %v3254_v51, %v3258_v24  ;;  %v5310_v51 = vld [vmem:[%s5497_s18 + $0x24] sm:$0xff]  ;;  %v4921_v24 = vrot.slane %v4905_v58, 9 }
 0x16d   : > { %v1808_v4 = vadd.f32 %v1750_v13, %v1521_v34  ;;  %v3244_v34 = vrot.slane %v3243_v50, 4  ;;  %v5386_v50 = vld [vmem:[%s5497_s18 + $0x2c] sm:$0x1]  ;;  %v1116_v21 = vadd.f32 %v1115_v27, %v5920_v28 }
 0x16e   : > { %v2562_v6 = vrot.slane %v5386_v50, 5  ;;  %v2561_v50 = vrot.slane %v2559_v12, 4 }
 0x16f   : > { %v1466_v53 = vpop.f32.mrf.mxu2  ;;  %v6194_v52 = vadd.f32 %v2404_v10, %v1808_v4  ;;  %v2690_v10 = vpack.c.b16 %v2660_v38, %v2659_v30  ;;  %v5131_v4 = vld [vmem:[%s5497_s18 + $0x24] sm:$0xe]  ;;  %v3266_v30 = vrot.slane %v3264_v18, 5  ;;  %v3272_v38 = vrot.slane %v3270_v63, 5 }
 0x170   : > { %v1522_v31 = vadd.f32 %v1466_v53, %v1114_v17  ;;  %v3249_v17 = vsel %vm5516_vm4, %v3244_v34, %v6177_v54  ;;  %v3263_v53 = vrot.slane %v3261_v44, 4  ;;  %v3894_v54 = vrot.slane %v6180_v61, 5  ;;  %v6221_v44 = vld [vmem:[%s5497_s18 + $0x38] sm:$0x1] }
 0x171   : > { %5114 = vmatmul.msk.bf16.vlgmr.msra.gmra.mxu3 %vm791_vm3, %v3630_v19  ;;  %v3274_v19 = vshrl.u32 %v6198_v29, 16  ;;  %v3600_v27 = vunpack.c.l.b16 %v3249_v17 }
 0x172   : > { %v3267_v63 = vor.u32 %v3266_v30, %v3263_v53 }
 0x173   : > { %v2407_v32 = vpop.f32.mrf.mxu0  ;;  %v3276_v28 = vrot.slane %v3274_v19, 4  ;;  %v2563_v19 = vsel %vm5692_vm7, %v2561_v50, %v2562_v6 }
 0x174   : > { %v1753_v14 = vpop.f32.mrf.mxu3  ;;  %v1118_v13 = vpop.f32.mrf.mxu1 }
 0x175   : > { %v1809_v26 = vadd.f32 %v1753_v14, %v1522_v31  ;;  %v5147_v31 = vrot.slane %v5131_v4, 9  ;;  %v3893_v14 = vrot.slane %v3891_v48, 4  ;;  %v3277_v17 = vor.u32 %v3276_v28, %v3272_v38  ;;  %v6239_v28 = vld [vmem:[%s5497_s18 + $0x40] sm:$0xf] }
 0x176   : > { %5163 = vmatmul.msk.bf16.vlgmr.msra.gmra.mxu0 %vm791_vm3, %v4028_v59  ;;  %v3601_v59 = vunpack.c.l.b16 %v3259_v16  ;;  %v3280_v16 = vshll.u32 %v6221_v44, 16 }
 0x177   : > { %v1468_v3 = vpop.f32.mrf.mxu2  ;;  %v6215_v9 = vadd.f32 %v2407_v32, %v1809_v26  ;;  %4937 = vmatmul.msk.bf16.gmra.mxu1 %vm791_vm3, %v2690_v10  ;;  %v3892_v32 = vsel %vm5692_vm7, %v5147_v31, %v3891_v48  ;;  %v3895_v10 = vsel %vm5692_vm7, %v3893_v14, %v3894_v54  ;;  %v2560_v26 = vsel %vm5692_vm7, %v4921_v24, %v2559_v12 }
 0x178   : > { %v1523_v34 = vadd.f32 %v1468_v3, %v1116_v21  ;;  %v3631_v48 = vpack.c.b16 %v3601_v59, %v3600_v27  ;;  %v1119_v21 = vadd.f32 %v1118_v13, %v5811_v40  ;;  %v3998_v53 = vunpack.c.l.b16 %v3892_v32 }
 0x179   : > { %v3999_v30 = vunpack.c.l.b16 %v3895_v10  ;;  %v2661_v14 = vunpack.c.l.b16 %v2560_v26  ;;  %v2662_v54 = vunpack.c.l.b16 %v2563_v19  ;;  %v3268_v12 = vrot.slane %v3267_v63, 4  ;;  %v5387_v10 = vld [vmem:[%s5497_s18 + $0x34] sm:$0xf]  ;;  %v5132_v19 = vld [vmem:[%s5497_s18 + $0x30] sm:$0xe] }
 0x17a   : > { %v3278_v6 = vrot.slane %v3277_v17, 4  ;;  %v3282_v24 = vrot.slane %v3280_v16, 5  ;;  %v3898_v59 = vrot.slane %v6198_v29, 5  ;;  %v4906_v16 = vld [vmem:[%s5497_s18 + $0x30] sm:$0xe] }
 0x17b   : > { %v2409_v18 = vpop.f32.mrf.mxu0  ;;  %v4029_v50 = vpack.c.b16 %v3999_v30, %v3998_v53  ;;  %v2691_v13 = vpack.c.b16 %v2662_v54, %v2661_v14  ;;  %v3273_v27 = vsel %vm5516_vm4, %v3268_v12, %v3272_v38  ;;  %v5388_v38 = vld [vmem:[%s5497_s18 + $0x38] sm:$0x1]  ;;  %v5148_v54 = vrot.slane %v5132_v19, 9 }
 0x17c   : > { %v1755_v4 = vpop.f32.mrf.mxu3  ;;  %5050 = vmatmul.msk.bf16.gmra.mxu2 %vm791_vm3, %v5310_v51  ;;  %v1120_v61 = vpop.f32.mrf.mxu1  ;;  %v3283_v32 = vsel %vm5516_vm4, %v3278_v6, %v3282_v24  ;;  %v2569_v53 = vrot.slane %v5388_v38, 5  ;;  %v3602_v30 = vunpack.c.l.b16 %v3273_v27  ;;  %v3900_v12 = vrot.slane %v3898_v59, 4  ;;  %v5311_v24 = vld [vmem:[%s5497_s18 + $0x30] sm:$0xff]  ;;  %v6262_v27 = vld [vmem:[%s5497_s18 + $0x44] sm:$0x1] }
 0x17d   : > { %v1810_v58 = vadd.f32 %v1755_v4, %v1523_v34  ;;  %v5074_v34 = vld [vmem:[%s5497_s18 + $0x3c] sm:$0xf]  ;;  %v2566_v4 = vrot.slane %v5387_v10, 5  ;;  %v1121_v29 = vadd.f32 %v1120_v61, %v5827_v2 }
 0x17e   : > { %v3285_v26 = vshrl.u32 %v5074_v34, 16 }
 0x17f   : > { %v1471_v3 = vpop.f32.mrf.mxu2  ;;  %v6234_v31 = vadd.f32 %v2409_v18, %v1810_v58  ;;  %v3288_v58 = vshll.u32 %v5074_v34, 16  ;;  %v3603_v34 = vunpack.c.l.b16 %v3283_v32  ;;  %v2568_v10 = vrot.slane %v2566_v4, 4 }
 0x180   : > { %v1524_v51 = vadd.f32 %v1471_v3, %v1119_v21  ;;  %v3298_v21 = vshrl.u32 %v6239_v28, 16  ;;  %v3287_v38 = vrot.slane %v3285_v26, 4 }
 0x181   : > { %5115 = vmatmul.msk.bf16.gmra.mxu3 %vm791_vm3, %v3631_v48  ;;  %v3294_v48 = vshll.u32 %v6239_v28, 16  ;;  %v3290_v2 = vrot.slane %v3288_v58, 5  ;;  %v3632_v32 = vpack.c.b16 %v3603_v34, %v3602_v30  ;;  %v5077_v34 = vld [vmem:[%s5497_s18 + $0x48] sm:$0xf] }
 0x183   : > { %v2412_v40 = vpop.f32.mrf.mxu0  ;;  %v6259_v61 = vrot.slane %v3294_v48, 5  ;;  %v3291_v48 = vor.u32 %v3290_v2, %v3287_v38  ;;  %v3312_v38 = vshll.u32 %v5077_v34, 16 }
 0x184   : > { %v1758_v18 = vpop.f32.mrf.mxu3  ;;  %v1123_v63 = vpop.f32.mrf.mxu1 }
 0x185   : > { %v1811_v17 = vadd.f32 %v1758_v18, %v1524_v51  ;;  %v3901_v51 = vrot.slane %v6221_v44, 5  ;;  %v4922_v18 = vrot.slane %v4906_v16, 9  ;;  %v2570_v16 = vsel %vm5692_vm7, %v2568_v10, %v2569_v53 }
 0x186   : > { %5164 = vmatmul.msk.bf16.gmra.mxu0 %vm791_vm3, %v4029_v50  ;;  %v3300_v50 = vrot.slane %v3298_v21, 4  ;;  %v3304_v21 = vshll.u32 %v6262_v27, 16 }
 0x187   : > { %v1473_v3 = vpop.f32.mrf.mxu2  ;;  %v6254_v14 = vadd.f32 %v2412_v40, %v1811_v17  ;;  %4938 = vmatmul.msk.bf16.gmra.mxu1 %vm791_vm3, %v2691_v13  ;;  %v3899_v13 = vsel %vm5692_vm7, %v5148_v54, %v3898_v59  ;;  %v3902_v19 = vsel %vm5692_vm7, %v3900_v12, %v3901_v51  ;;  %v2567_v17 = vsel %vm5692_vm7, %v4922_v18, %v2566_v4  ;;  %v6280_v4 = vld [vmem:[%s5497_s18 + $0x4c] sm:$0xf] }
 0x188   : > { %v1525_v6 = vadd.f32 %v1473_v3, %v1121_v29  ;;  %v3301_v59 = vor.u32 %v3300_v50, %v6259_v61  ;;  %v1124_v29 = vadd.f32 %v1123_v63, %v5843_v22  ;;  %v4000_v3 = vunpack.c.l.b16 %v3899_v13 }
 0x189   : > { %v4001_v54 = vunpack.c.l.b16 %v3902_v19  ;;  %v2663_v51 = vunpack.c.l.b16 %v2567_v17  ;;  %v3306_v10 = vrot.slane %v3304_v21, 5  ;;  %v3309_v63 = vshrl.u32 %v5077_v34, 16  ;;  %v5389_v17 = vld [vmem:[%s5497_s18 + $0x40] sm:$0xf] }
 0x18a   : > { %v3302_v18 = vrot.slane %v3301_v59, 4  ;;  %v3318_v2 = vshll.u32 %v6280_v4, 16  ;;  %v3905_v13 = vrot.slane %v6239_v28, 5 }
 0x18b   : > { %v2414_v40 = vpop.f32.mrf.mxu0  ;;  %v4030_v22 = vpack.c.b16 %v4001_v54, %v4000_v3  ;;  %v4907_v54 = vld [vmem:[%s5497_s18 + $0x3c] sm:$0xe] }
 0x18c   : > { %v1760_v44 = vpop.f32.mrf.mxu3  ;;  %5051 = vmatmul.msk.bf16.gmra.mxu2 %vm791_vm3, %v5311_v24  ;;  %v1125_v26 = vpop.f32.mrf.mxu1  ;;  %v2664_v24 = vunpack.c.l.b16 %v2570_v16  ;;  %v2573_v16 = vrot.slane %v5389_v17, 5  ;;  %v3307_v3 = vsel %vm5516_vm4, %v3302_v18, %v3306_v10  ;;  %v5312_v18 = vld [vmem:[%s5497_s18 + $0x3c] sm:$0xff]  ;;  %v4923_v10 = vrot.slane %v4907_v54, 9 }
 0x18d   : > { %v1812_v58 = vadd.f32 %v1760_v44, %v1525_v6  ;;  %v3292_v6 = vrot.slane %v3291_v48, 4  ;;  %v5390_v48 = vld [vmem:[%s5497_s18 + $0x44] sm:$0x1]  ;;  %v1126_v28 = vadd.f32 %v1125_v26, %v5860_v55 }
 0x18e   : > { %v2576_v59 = vrot.slane %v5390_v48, 5  ;;  %v2575_v48 = vrot.slane %v2573_v16, 4 }
 0x18f   : > { %v1476_v12 = vpop.f32.mrf.mxu2  ;;  %v6276_v30 = vadd.f32 %v2414_v40, %v1812_v58  ;;  %v2692_v40 = vpack.c.b16 %v2664_v24, %v2663_v51  ;;  %v5133_v58 = vld [vmem:[%s5497_s18 + $0x3c] sm:$0xe]  ;;  %v3314_v51 = vrot.slane %v3312_v38, 5  ;;  %v3320_v24 = vrot.slane %v3318_v2, 5 }
 0x190   : > { %v1526_v53 = vadd.f32 %v1476_v12, %v1124_v29  ;;  %v3297_v29 = vsel %vm5516_vm4, %v3292_v6, %v6259_v61  ;;  %v3311_v12 = vrot.slane %v3309_v63, 4  ;;  %v3908_v61 = vrot.slane %v6262_v27, 5  ;;  %v6303_v63 = vld [vmem:[%s5497_s18 + $0x50] sm:$0x1] }
 0x191   : > { %5116 = vmatmul.msk.bf16.gmra.mxu3 %vm791_vm3, %v3632_v32  ;;  %v3322_v32 = vshrl.u32 %v6280_v4, 16  ;;  %v3604_v26 = vunpack.c.l.b16 %v3297_v29 }
 0x192   : > { %v3315_v2 = vor.u32 %v3314_v51, %v3311_v12 }
 0x193   : > { %v2417_v50 = vpop.f32.mrf.mxu0  ;;  %v3324_v55 = vrot.slane %v3322_v32, 4  ;;  %v2577_v32 = vsel %vm5692_vm7, %v2575_v48, %v2576_v59 }
 0x194   : > { %v1763_v19 = vpop.f32.mrf.mxu3  ;;  %v1128_v44 = vpop.f32.mrf.mxu1 }
 0x195   : > { %v1813_v21 = vadd.f32 %v1763_v19, %v1526_v53  ;;  %v5149_v53 = vrot.slane %v5133_v58, 9  ;;  %v3907_v19 = vrot.slane %v3905_v13, 4  ;;  %v3325_v29 = vor.u32 %v3324_v55, %v3320_v24  ;;  %v6321_v55 = vld [vmem:[%s5497_s18 + $0x58] sm:$0xf] }
 0x196   : > { %5165 = vmatmul.msk.bf16.gmra.mxu0 %vm791_vm3, %v4030_v22  ;;  %v3605_v22 = vunpack.c.l.b16 %v3307_v3  ;;  %v3328_v3 = vshll.u32 %v6303_v63, 16 }
 0x197   : > { %v1478_v34 = vpop.f32.mrf.mxu2  ;;  %v6297_v17 = vadd.f32 %v2417_v50, %v1813_v21  ;;  %4939 = vmatmul.msk.bf16.gmra.mxu1 %vm791_vm3, %v2692_v40  ;;  %v3906_v50 = vsel %vm5692_vm7, %v5149_v53, %v3905_v13  ;;  %v3909_v40 = vsel %vm5692_vm7, %v3907_v19, %v3908_v61  ;;  %v2574_v21 = vsel %vm5692_vm7, %v4923_v10, %v2573_v16 }
 0x198   : > { %v1527_v6 = vadd.f32 %v1478_v34, %v1126_v28  ;;  %v3633_v13 = vpack.c.b16 %v3605_v22, %v3604_v26  ;;  %v1129_v28 = vadd.f32 %v1128_v44, %v5885_v35  ;;  %v4002_v12 = vunpack.c.l.b16 %v3906_v50 }
 0x199   : > { %v4003_v51 = vunpack.c.l.b16 %v3909_v40  ;;  %v2665_v19 = vunpack.c.l.b16 %v2574_v21  ;;  %v2666_v61 = vunpack.c.l.b16 %v2577_v32  ;;  %v3316_v16 = vrot.slane %v3315_v2, 4  ;;  %v5391_v40 = vld [vmem:[%s5497_s18 + $0x4c] sm:$0xf]  ;;  %v5134_v32 = vld [vmem:[%s5497_s18 + $0x48] sm:$0xe] }
 0x19a   : > { %v3326_v59 = vrot.slane %v3325_v29, 4  ;;  %v3330_v10 = vrot.slane %v3328_v3, 5  ;;  %v3912_v22 = vrot.slane %v6280_v4, 5  ;;  %v4908_v3 = vld [vmem:[%s5497_s18 + $0x48] sm:$0xe] }
 0x19b   : > { %v2419_v38 = vpop.f32.mrf.mxu0  ;;  %v4031_v48 = vpack.c.b16 %v4003_v51, %v4002_v12  ;;  %v2693_v44 = vpack.c.b16 %v2666_v61, %v2665_v19  ;;  %v3321_v26 = vsel %vm5516_vm4, %v3316_v16, %v3320_v24  ;;  %v5392_v24 = vld [vmem:[%s5497_s18 + $0x50] sm:$0x1]  ;;  %v5150_v61 = vrot.slane %v5134_v32, 9 }
 0x19c   : > { %v1765_v58 = vpop.f32.mrf.mxu3  ;;  %5052 = vmatmul.msk.bf16.gmra.mxu2 %vm791_vm3, %v5312_v18  ;;  %v1130_v27 = vpop.f32.mrf.mxu1  ;;  %v3331_v50 = vsel %vm5516_vm4, %v3326_v59, %v3330_v10  ;;  %v2583_v12 = vrot.slane %v5392_v24, 5  ;;  %v3606_v51 = vunpack.c.l.b16 %v3321_v26  ;;  %v3914_v16 = vrot.slane %v3912_v22, 4  ;;  %v5313_v10 = vld [vmem:[%s5497_s18 + $0x48] sm:$0xff] }
 0x19d   : > { %v1814_v54 = vadd.f32 %v1765_v58, %v1527_v6  ;;  %v5080_v6 = vld [vmem:[%s5497_s18 + $0x54] sm:$0xf]  ;;  %v2580_v58 = vrot.slane %v5391_v40, 5  ;;  %v1131_v4 = vadd.f32 %v1130_v27, %v5903_v1 }
 0x19e   : > { %v3333_v21 = vshrl.u32 %v5080_v6, 16 }
 0x19f   : > { %v1481_v34 = vpop.f32.mrf.mxu2  ;;  %v6316_v53 = vadd.f32 %v2419_v38, %v1814_v54  ;;  %v3336_v54 = vshll.u32 %v5080_v6, 16  ;;  %v3607_v6 = vunpack.c.l.b16 %v3331_v50  ;;  %v2582_v40 = vrot.slane %v2580_v58, 4 }
 0x1a0   : > { %v1528_v18 = vadd.f32 %v1481_v34, %v1129_v28  ;;  %v3346_v28 = vshrl.u32 %v6321_v55, 16  ;;  %v3335_v24 = vrot.slane %v3333_v21, 4 }
 0x1a1   : > { %6994 = vst [vmem:[#allocation3_spill] sm:$0xff] %v6316_v53  ;;  %5117 = vmatmul.msk.bf16.gmra.mxu3 %vm791_vm3, %v3633_v13  ;;  %v3342_v13 = vshll.u32 %v6321_v55, 16  ;;  %v3338_v1 = vrot.slane %v3336_v54, 5  ;;  %v6344_v53 = vld [vmem:[%s5497_s18 + $0x5c] sm:$0x1]  ;;  %v2584_v32 = vsel %vm5692_vm7, %v2582_v40, %v2583_v12 }
 0x1a3   : > { %v2422_v35 = vpop.f32.mrf.mxu0  ;;  %v6341_v27 = vrot.slane %v3342_v13, 5  ;;  %v3339_v54 = vor.u32 %v3338_v1, %v3335_v24 }
 0x1a4   : > { %v1768_v38 = vpop.f32.mrf.mxu3  ;;  %v1133_v2 = vpop.f32.mrf.mxu1 }
 0x1a5   : > { %v1815_v29 = vadd.f32 %v1768_v38, %v1528_v18  ;;  %v3915_v18 = vrot.slane %v6303_v63, 5  ;;  %v4924_v38 = vrot.slane %v4908_v3, 9  ;;  %v3634_v3 = vpack.c.b16 %v3607_v6, %v3606_v51 }
 0x1a6   : > { %5166 = vmatmul.msk.bf16.gmra.mxu0 %vm791_vm3, %v4031_v48  ;;  %v3348_v48 = vrot.slane %v3346_v28, 4  ;;  %v3352_v28 = vshll.u32 %v6344_v53, 16  ;;  %v3340_v51 = vrot.slane %v3339_v54, 4 }
 0x1a7   : > { %v1483_v34 = vpop.f32.mrf.mxu2  ;;  %v6336_v19 = vadd.f32 %v2422_v35, %v1815_v29  ;;  %4940 = vmatmul.msk.bf16.gmra.mxu1 %vm791_vm3, %v2693_v44  ;;  %v3913_v35 = vsel %vm5692_vm7, %v5150_v61, %v3912_v22  ;;  %v3916_v63 = vsel %vm5692_vm7, %v3914_v16, %v3915_v18  ;;  %v2581_v21 = vsel %vm5692_vm7, %v4924_v38, %v2580_v58  ;;  %v5083_v61 = vld [vmem:[%s5497_s18 + $0x60] sm:$0xf]  ;;  %v6362_v38 = vld [vmem:[%s5497_s18 + $0x64] sm:$0xf] }
 0x1a8   : > { %v1529_v59 = vadd.f32 %v1483_v34, %v1131_v4  ;;  %v3349_v13 = vor.u32 %v3348_v48, %v6341_v27  ;;  %v1134_v22 = vadd.f32 %v1133_v2, %v5924_v45  ;;  %v4004_v4 = vunpack.c.l.b16 %v3913_v35 }
 0x1a9   : > { %v4005_v34 = vunpack.c.l.b16 %v3916_v63  ;;  %v2668_v58 = vunpack.c.l.b16 %v2584_v32  ;;  %v3357_v45 = vshrl.u32 %v5083_v61, 16  ;;  %v3360_v2 = vshll.u32 %v5083_v61, 16 }
 0x1aa   : > { %v3354_v6 = vrot.slane %v3352_v28, 5  ;;  %v3366_v24 = vshll.u32 %v6362_v38, 16  ;;  %v3370_v1 = vshrl.u32 %v6362_v38, 16  ;;  %v3919_v35 = vrot.slane %v6321_v55, 5 }
 0x1ab   : > { %v2424_v26 = vpop.f32.mrf.mxu0  ;;  %v4032_v40 = vpack.c.b16 %v4005_v34, %v4004_v4  ;;  %v3345_v54 = vsel %vm5516_vm4, %v3340_v51, %v6341_v27  ;;  %v3362_v28 = vrot.slane %v3360_v2, 5  ;;  %v5394_v51 = vld [vmem:[%s5497_s18 + $0x5c] sm:$0x1] }
 0x1ac   : > { %v1770_v44 = vpop.f32.mrf.mxu3  ;;  %5053 = vmatmul.msk.bf16.gmra.mxu2 %vm791_vm3, %v5313_v10  ;;  %v1135_v50 = vpop.f32.mrf.mxu1  ;;  %v2667_v10 = vunpack.c.l.b16 %v2581_v21  ;;  %v5393_v21 = vld [vmem:[%s5497_s18 + $0x58] sm:$0xf]  ;;  %v3368_v34 = vrot.slane %v3366_v24, 5  ;;  %v3372_v61 = vrot.slane %v3370_v1, 4 }
 0x1ad   : > { %v1816_v29 = vadd.f32 %v1770_v44, %v1529_v59  ;;  %v3350_v59 = vrot.slane %v3349_v13, 4  ;;  %v2587_v32 = vrot.slane %v5393_v21, 5  ;;  %v4909_v13 = vld [vmem:[%s5497_s18 + $0x54] sm:$0xe]  ;;  %v1136_v4 = vadd.f32 %v1135_v50, %v5938_v8 }
 0x1ae   : > { %v5314_v50 = vld [vmem:[%s5497_s18 + $0x54] sm:$0xff]  ;;  %v4925_v2 = vrot.slane %v4909_v13, 9 }
 0x1af   : > { %v1486_v16 = vpop.f32.mrf.mxu2  ;;  %v6359_v18 = vadd.f32 %v2424_v26, %v1816_v29  ;;  %v2694_v26 = vpack.c.b16 %v2668_v58, %v2667_v10  ;;  %v5135_v29 = vld [vmem:[%s5497_s18 + $0x54] sm:$0xe]  ;;  %v3355_v55 = vsel %vm5516_vm4, %v3350_v59, %v3354_v6  ;;  %v3921_v58 = vrot.slane %v3919_v35, 4  ;;  %v6385_v6 = vld [vmem:[%s5497_s18 + $0x68] sm:$0x1] }
 0x1b0   : > { %v1530_v12 = vadd.f32 %v1486_v16, %v1134_v22  ;;  %v3359_v22 = vrot.slane %v3357_v45, 4  ;;  %v5151_v27 = vrot.slane %v5135_v29, 9  ;;  %v2590_v45 = vrot.slane %v5394_v51, 5 }
 0x1b1   : > { %5118 = vmatmul.msk.bf16.gmra.mxu3 %vm791_vm3, %v3634_v3  ;;  %v2589_v59 = vrot.slane %v2587_v32, 4  ;;  %v3609_v24 = vunpack.c.l.b16 %v3355_v55  ;;  %v3376_v21 = vshll.u32 %v6385_v6, 16  ;;  %v2588_v13 = vsel %vm5692_vm7, %v4925_v2, %v2587_v32  ;;  %v6403_v2 = vld [vmem:[%s5497_s18 + $0x70] sm:$0xf] }
 0x1b2   : > { %v3363_v1 = vor.u32 %v3362_v28, %v3359_v22 }
 0x1b3   : > { %v2427_v48 = vpop.f32.mrf.mxu0  ;;  %v3378_v32 = vrot.slane %v3376_v21, 5 }
 0x1b4   : > { %v1773_v63 = vpop.f32.mrf.mxu3  ;;  %v1138_v44 = vpop.f32.mrf.mxu1 }
 0x1b5   : > { %v1817_v3 = vadd.f32 %v1773_v63, %v1530_v12  ;;  %v3922_v12 = vrot.slane %v6344_v53, 5  ;;  %v3373_v63 = vor.u32 %v3372_v61, %v3368_v34 }
 0x1b6   : > { %5167 = vmatmul.msk.bf16.gmra.mxu0 %vm791_vm3, %v4032_v40  ;;  %v3608_v40 = vunpack.c.l.b16 %v3345_v54  ;;  %v2591_v54 = vsel %vm5692_vm7, %v2589_v59, %v2590_v45  ;;  %v5086_v45 = vld [vmem:[%s5497_s18 + $0x6c] sm:$0xf] }
 0x1b7   : > { %v1488_v16 = vpop.f32.mrf.mxu2  ;;  %v6378_v10 = vadd.f32 %v2427_v48, %v1817_v3  ;;  %4941 = vmatmul.msk.bf16.gmra.mxu1 %vm791_vm3, %v2694_v26  ;;  %v3920_v26 = vsel %vm5692_vm7, %v5151_v27, %v3919_v35  ;;  %v3923_v53 = vsel %vm5692_vm7, %v3921_v58, %v3922_v12  ;;  %v1139_v35 = vadd.f32 %v1138_v44, %v5856_v0 }
 0x1b8   : > { %v1531_v8 = vadd.f32 %v1488_v16, %v1136_v4  ;;  %v3635_v28 = vpack.c.b16 %v3609_v24, %v3608_v40  ;;  %v3364_v4 = vrot.slane %v3363_v1, 4  ;;  %v3374_v55 = vrot.slane %v3373_v63, 4 }
 0x1b9   : > { %v4006_v61 = vunpack.c.l.b16 %v3920_v26  ;;  %v4007_v16 = vunpack.c.l.b16 %v3923_v53  ;;  %v2669_v12 = vunpack.c.l.b16 %v2588_v13  ;;  %v2670_v51 = vunpack.c.l.b16 %v2591_v54  ;;  %v5136_v53 = vld [vmem:[%s5497_s18 + $0x60] sm:$0xe] }
 0x1ba   : > { %v3369_v59 = vsel %vm5516_vm4, %v3364_v4, %v3368_v34  ;;  %v3379_v40 = vsel %vm5516_vm4, %v3374_v55, %v3378_v32  ;;  %v3926_v24 = vrot.slane %v6362_v38, 5  ;;  %v3381_v26 = vshrl.u32 %v5086_v45, 16  ;;  %v4910_v13 = vld [vmem:[%s5497_s18 + $0x60] sm:$0xe] }
 0x1bb   : > { %v2429_v48 = vpop.f32.mrf.mxu0  ;;  %v2695_v44 = vpack.c.b16 %v2670_v51, %v2669_v12  ;;  %v3384_v54 = vshll.u32 %v5086_v45, 16  ;;  %v3394_v34 = vshrl.u32 %v6403_v2, 16  ;;  %v3610_v4 = vunpack.c.l.b16 %v3369_v59  ;;  %v5315_v51 = vld [vmem:[%s5497_s18 + $0x60] sm:$0xff]  ;;  %v5396_v45 = vld [vmem:[%s5497_s18 + $0x68] sm:$0x1] }
 0x1bc   : > { %v1775_v29 = vpop.f32.mrf.mxu3  ;;  %5054 = vmatmul.msk.bf16.gmra.mxu2 %vm791_vm3, %v5314_v50  ;;  %v1140_v3 = vpop.f32.mrf.mxu1  ;;  %v4926_v32 = vrot.slane %v4910_v13, 9 }
 0x1bd   : > { %v1818_v22 = vadd.f32 %v1775_v29, %v1531_v8  ;;  %v4033_v8 = vpack.c.b16 %v4007_v16, %v4006_v61  ;;  %v5152_v61 = vrot.slane %v5136_v53, 9  ;;  %v3928_v16 = vrot.slane %v3926_v24, 4 }
 0x1be   : > { %v3386_v59 = vrot.slane %v3384_v54, 5 }
 0x1bf   : > { %v1491_v27 = vpop.f32.mrf.mxu2  ;;  %v6398_v58 = vadd.f32 %v2429_v48, %v1818_v22  ;;  %v5395_v48 = vld [vmem:[%s5497_s18 + $0x64] sm:$0xf]  ;;  %v3390_v22 = vshll.u32 %v6403_v2, 16 }
 0x1c0   : > { %v1532_v50 = vadd.f32 %v1491_v27, %v1139_v35  ;;  %v2594_v21 = vrot.slane %v5395_v48, 5  ;;  %v3611_v35 = vunpack.c.l.b16 %v3379_v40  ;;  %v3929_v27 = vrot.slane %v6385_v6, 5 }
 0x1c1   : > { %5119 = vmatmul.msk.bf16.gmra.mxu3 %vm791_vm3, %v3635_v28  ;;  %v1141_v28 = vadd.f32 %v1140_v3, %v5871_v7  ;;  %v2597_v7 = vrot.slane %v5396_v45, 5  ;;  %v3383_v3 = vrot.slane %v3381_v26, 4  ;;  %v6423_v40 = vrot.slane %v3390_v22, 5 }
 0x1c2   : > { %v3930_v6 = vsel %vm5692_vm7, %v3928_v16, %v3929_v27  ;;  %v2595_v26 = vsel %vm5692_vm7, %v4926_v32, %v2594_v21  ;;  %v3636_v54 = vpack.c.b16 %v3611_v35, %v3610_v4  ;;  %v5089_v32 = vld [vmem:[%s5497_s18 + $0x78] sm:$0xf] }
 0x1c3   : > { %v2432_v0 = vpop.f32.mrf.mxu0  ;;  %v3387_v22 = vor.u32 %v3386_v59, %v3383_v3  ;;  %v3405_v45 = vshrl.u32 %v5089_v32, 16 }
 0x1c4   : > { %v1778_v1 = vpop.f32.mrf.mxu3  ;;  %v1143_v63 = vpop.f32.mrf.mxu1 }
 0x1c5   : > { %v1819_v29 = vadd.f32 %v1778_v1, %v1532_v50  ;;  %v2596_v50 = vrot.slane %v2594_v21, 4  ;;  %v6426_v1 = vld [vmem:[%s5497_s18 + $0x74] sm:$0x1]  ;;  %v3388_v4 = vrot.slane %v3387_v22, 4 }
 0x1c6   : > { %5168 = vmatmul.msk.bf16.gmra.mxu0 %vm791_vm3, %v4033_v8  ;;  %v3396_v8 = vrot.slane %v3394_v34, 4 }
 0x1c7   : > { %v1493_v38 = vpop.f32.mrf.mxu2  ;;  %v6417_v55 = vadd.f32 %v2432_v0, %v1819_v29  ;;  %4942 = vmatmul.msk.bf16.gmra.mxu1 %vm791_vm3, %v2695_v44  ;;  %v3927_v44 = vsel %vm5692_vm7, %v5152_v61, %v3926_v24  ;;  %v2598_v29 = vsel %vm5692_vm7, %v2596_v50, %v2597_v7  ;;  %v1144_v24 = vadd.f32 %v1143_v63, %v5892_v43  ;;  %v6445_v63 = vld [vmem:[%s5497_s18 + $0x7c] sm:$0xf] }
 0x1c8   : > { %v1533_v12 = vadd.f32 %v1493_v38, %v1141_v28  ;;  %v3397_v34 = vor.u32 %v3396_v8, %v6423_v40  ;;  %v3400_v28 = vshll.u32 %v6426_v1, 16  ;;  %v4008_v38 = vunpack.c.l.b16 %v3927_v44 }
 0x1c9   : > { %v4009_v61 = vunpack.c.l.b16 %v3930_v6  ;;  %v2672_v21 = vunpack.c.l.b16 %v2598_v29  ;;  %v3408_v7 = vshll.u32 %v5089_v32, 16  ;;  %v3933_v8 = vrot.slane %v6403_v2, 5  ;;  %v5397_v6 = vld [vmem:[%s5497_s18 + $0x70] sm:$0xf] }
 0x1ca   : > { %v3398_v35 = vrot.slane %v3397_v34, 4  ;;  %v3414_v22 = vshll.u32 %v6445_v63, 16  ;;  %v3418_v34 = vshrl.u32 %v6445_v63, 16 }
 0x1cb   : > { %v2434_v0 = vpop.f32.mrf.mxu0  ;;  %v4034_v43 = vpack.c.b16 %v4009_v61, %v4008_v38  ;;  %v3410_v38 = vrot.slane %v3408_v7, 5 }
 0x1cc   : > { %v1780_v48 = vpop.f32.mrf.mxu3  ;;  %5055 = vmatmul.msk.bf16.gmra.mxu2 %vm791_vm3, %v5315_v51  ;;  %v1145_v53 = vpop.f32.mrf.mxu1  ;;  %v2671_v51 = vunpack.c.l.b16 %v2595_v26  ;;  %v5137_v26 = vld [vmem:[%s5497_s18 + $0x6c] sm:$0xe]  ;;  %v3420_v7 = vrot.slane %v3418_v34, 4 }
 0x1cd   : > { %v1820_v13 = vadd.f32 %v1780_v48, %v1533_v12  ;;  %v3402_v12 = vrot.slane %v3400_v28, 5  ;;  %v2601_v48 = vrot.slane %v5397_v6, 5  ;;  %v3407_v28 = vrot.slane %v3405_v45, 4 }
 0x1ce   : > { %v2696_v59 = vpack.c.b16 %v2672_v21, %v2671_v51  ;;  %v3935_v51 = vrot.slane %v3933_v8, 4  ;;  %v3936_v21 = vrot.slane %v6426_v1, 5  ;;  %v6466_v45 = vrot.slane %v3414_v22, 5 }
 0x1cf   : > { %v1496_v16 = vpop.f32.mrf.mxu2  ;;  %v6440_v27 = vadd.f32 %v2434_v0, %v1820_v13  ;;  %v3393_v13 = vsel %vm5516_vm4, %v3388_v4, %v6423_v40  ;;  %v3403_v2 = vsel %vm5516_vm4, %v3398_v35, %v3402_v12  ;;  %v5153_v40 = vrot.slane %v5137_v26, 9  ;;  %v5398_v4 = vld [vmem:[%s5497_s18 + $0x74] sm:$0x1] }
 0x1d0   : > { %v1534_v50 = vadd.f32 %v1496_v16, %v1144_v24  ;;  %v1146_v24 = vadd.f32 %v1145_v53, %v5912_v15  ;;  %v2603_v53 = vrot.slane %v2601_v48, 4  ;;  %v2604_v35 = vrot.slane %v5398_v4, 5 }
 0x1d1   : > { %5120 = vmatmul.msk.bf16.gmra.mxu3 %vm791_vm3, %v3636_v54  ;;  %v4911_v54 = vld [vmem:[%s5497_s18 + $0x6c] sm:$0xe]  ;;  %v3612_v12 = vunpack.c.l.b16 %v3393_v13  ;;  %v3937_v1 = vsel %vm5692_vm7, %v3935_v51, %v3936_v21  ;;  %v5092_v51 = vld [vmem:[%s5497_s18 + $0x84] sm:$0xf] }
 0x1d2   : > { %v4927_v15 = vrot.slane %v4911_v54, 9  ;;  %v2605_v13 = vsel %vm5692_vm7, %v2603_v53, %v2604_v35  ;;  %v3411_v54 = vor.u32 %v3410_v38, %v3407_v28  ;;  %v3429_v35 = vshrl.u32 %v5092_v51, 16 }
 0x1d3   : > { %v2437_v3 = vpop.f32.mrf.mxu0 }
 0x1d4   : > { %v1783_v0 = vpop.f32.mrf.mxu3  ;;  %v1148_v44 = vpop.f32.mrf.mxu1  ;;  %v3412_v28 = vrot.slane %v3411_v54, 4 }
 0x1d5   : > { %v1821_v29 = vadd.f32 %v1783_v0, %v1534_v50  ;;  %v5316_v50 = vld [vmem:[%s5497_s18 + $0x6c] sm:$0xff]  ;;  %v6469_v0 = vld [vmem:[%s5497_s18 + $0x80] sm:$0x1] }
 0x1d6   : > { %5169 = vmatmul.msk.bf16.gmra.mxu0 %vm791_vm3, %v4034_v43  ;;  %v3613_v43 = vunpack.c.l.b16 %v3403_v2  ;;  %v1149_v2 = vadd.f32 %v1148_v44, %v5935_v60  ;;  %v3432_v44 = vshll.u32 %v5092_v51, 16 }
 0x1d7   : > { %v1498_v61 = vpop.f32.mrf.mxu2  ;;  %v6460_v16 = vadd.f32 %v2437_v3, %v1821_v29  ;;  %4943 = vmatmul.msk.bf16.gmra.mxu1 %vm791_vm3, %v2696_v59  ;;  %v3934_v59 = vsel %vm5692_vm7, %v5153_v40, %v3933_v8  ;;  %v2602_v29 = vsel %vm5692_vm7, %v4927_v15, %v2601_v48  ;;  %v3424_v8 = vshll.u32 %v6469_v0, 16  ;;  %v6487_v15 = vld [vmem:[%s5497_s18 + $0x88] sm:$0xf] }
 0x1d8   : > { %v1535_v32 = vadd.f32 %v1498_v61, %v1146_v24  ;;  %v3637_v34 = vpack.c.b16 %v3613_v43, %v3612_v12  ;;  %v3421_v24 = vor.u32 %v3420_v7, %v6466_v45  ;;  %v4010_v61 = vunpack.c.l.b16 %v3934_v59 }
 0x1d9   : > { %v4011_v40 = vunpack.c.l.b16 %v3937_v1  ;;  %v2673_v4 = vunpack.c.l.b16 %v2602_v29  ;;  %v2674_v48 = vunpack.c.l.b16 %v2605_v13  ;;  %v3438_v12 = vshll.u32 %v6487_v15, 16  ;;  %v5399_v13 = vld [vmem:[%s5497_s18 + $0x7c] sm:$0xf] }
 0x1da   : > { %v3422_v38 = vrot.slane %v3421_v24, 4  ;;  %v3442_v43 = vshrl.u32 %v6487_v15, 16  ;;  %v3940_v59 = vrot.slane %v6445_v63, 5  ;;  %v3417_v29 = vsel %vm5516_vm4, %v3412_v28, %v6466_v45 }
 0x1db   : > { %v2439_v3 = vpop.f32.mrf.mxu0  ;;  %v4035_v60 = vpack.c.b16 %v4011_v40, %v4010_v61  ;;  %v2608_v54 = vrot.slane %v5399_v13, 5  ;;  %v3431_v61 = vrot.slane %v3429_v35, 4  ;;  %v3434_v40 = vrot.slane %v3432_v44, 5 }
 0x1dc   : > { %v1785_v6 = vpop.f32.mrf.mxu3  ;;  %5056 = vmatmul.msk.bf16.gmra.mxu2 %vm791_vm3, %v5316_v50  ;;  %v1150_v26 = vpop.f32.mrf.mxu1  ;;  %v6504_v51 = vrot.slane %v3438_v12, 5  ;;  %v3444_v45 = vrot.slane %v3442_v43, 4  ;;  %v6513_v12 = vld [vmem:[%s5497_s18 + $0x8c] sm:$0x1] }
 0x1dd   : > { %v1822_v22 = vadd.f32 %v1785_v6, %v1535_v32  ;;  %v3426_v32 = vrot.slane %v3424_v8, 5  ;;  %v1151_v63 = vadd.f32 %v1150_v26, %v5951_v37  ;;  %v2610_v37 = vrot.slane %v2608_v54, 4  ;;  %v5400_v26 = vld [vmem:[%s5497_s18 + $0x80] sm:$0x1] }
 0x1de   : > { %v2611_v35 = vrot.slane %v5400_v26, 5  ;;  %v3435_v43 = vor.u32 %v3434_v40, %v3431_v61  ;;  %v5237_v61 = vld [vmem:[%s6983_s3 + $0x70] sm:$0xf] }
 0x1df   : > { %v1501_v21 = vpop.f32.mrf.mxu2  ;;  %v6484_v50 = vadd.f32 %v2439_v3, %v1822_v22  ;;  %v2697_v3 = vpack.c.b16 %v2674_v48, %v2673_v4  ;;  %v5138_v22 = vld [vmem:[%s5497_s18 + $0x78] sm:$0xe]  ;;  %v3427_v8 = vsel %vm5516_vm4, %v3422_v38, %v3426_v32  ;;  %v3942_v48 = vrot.slane %v3940_v59, 4  ;;  %v5095_v40 = vld [vmem:[%s5497_s18 + $0x90] sm:$0xf] }
 0x1e0   : > { %v1536_v53 = vadd.f32 %v1501_v21, %v1149_v2  ;;  %v4912_v2 = vld [vmem:[%s5497_s18 + $0x78] sm:$0xe]  ;;  %v3615_v44 = vunpack.c.l.b16 %v3427_v8 }
 0x1e1   : > { %5121 = vmatmul.msk.bf16.gmra.mxu3 %vm791_vm3, %v3637_v34  ;;  %v5317_v38 = vld [vmem:[%s5497_s18 + $0x78] sm:$0xff]  ;;  %v4928_v32 = vrot.slane %v4912_v2, 9 }
 0x1e3   : > { %v2442_v7 = vpop.f32.mrf.mxu0 }
 0x1e4   : > { %v1788_v1 = vpop.f32.mrf.mxu3  ;;  %v2765_v6 = vpop.f32.mrf.mxu1 }
 0x1e5   : > { %v1823_v34 = vadd.f32 %v1788_v1, %v1536_v53  ;;  %v2845_v24 = vadd.f32 %v2765_v6, %v5966_v47  ;;  %v5154_v47 = vrot.slane %v5138_v22, 9  ;;  %v3943_v53 = vrot.slane %v6469_v0, 5 }
 0x1e6   : > { %5170 = vmatmul.msk.bf16.gmra.mxu0 %vm791_vm3, %v4035_v60  ;;  %v3614_v60 = vunpack.c.l.b16 %v3417_v29  ;;  %v3445_v1 = vor.u32 %v3444_v45, %v6504_v51  ;;  %v2609_v29 = vsel %vm5692_vm7, %v4928_v32, %v2608_v54  ;;  %v2612_v22 = vsel %vm5692_vm7, %v2610_v37, %v2611_v35 }
 0x1e7   : > { %v1503_v21 = vpop.f32.mrf.mxu2  ;;  %v6506_v4 = vadd.f32 %v2442_v7, %v1823_v34  ;;  %4944 = vmatmul.msk.bf16.gmra.mxu1 %vm791_vm3, %v2697_v3  ;;  %v3941_v3 = vsel %vm5692_vm7, %v5154_v47, %v3940_v59  ;;  %v3944_v0 = vsel %vm5692_vm7, %v3942_v48, %v3943_v53  ;;  %v3448_v34 = vshll.u32 %v6513_v12, 16  ;;  %v6535_v48 = vld [vmem:[%s5497_s18 + $0x94] sm:$0xf] }
 0x1e8   : > { %v1537_v28 = vadd.f32 %v1503_v21, %v1151_v63  ;;  %v3638_v2 = vpack.c.b16 %v3615_v44, %v3614_v60  ;;  %v5340_v63 = vld [vmem:[%s6983_s3 + $0x74] sm:$0xf0]  ;;  %v3436_v45 = vrot.slane %v3435_v43, 4  ;;  %v4012_v54 = vunpack.c.l.b16 %v3941_v3 }
 0x1e9   : > { %v4013_v21 = vunpack.c.l.b16 %v3944_v0  ;;  %v5238_v47 = vor.u32 %v5340_v63, %v5237_v61  ;;  %v3446_v32 = vrot.slane %v3445_v1, 4  ;;  %v3450_v26 = vrot.slane %v3448_v34, 5  ;;  %v5401_v34 = vld [vmem:[%s5497_s18 + $0x88] sm:$0xf]  ;;  %v5139_v63 = vld [vmem:[%s5497_s18 + $0x84] sm:$0xe] }
 0x1ea   : > { %v3453_v35 = vshrl.u32 %v5095_v40, 16  ;;  %v3456_v60 = vshll.u32 %v5095_v40, 16  ;;  %v3462_v44 = vshll.u32 %v6535_v48, 16  ;;  %v3466_v43 = vshrl.u32 %v6535_v48, 16 }
 0x1eb   : > { %v2444_v7 = vpop.f32.mrf.mxu0  ;;  %4419 = vmatpush.bf16.msrb.mxu1 %v5238_v47  ;;  %v4036_v3 = vpack.c.b16 %v4013_v21, %v4012_v54  ;;  %v3441_v1 = vsel %vm5516_vm4, %v3436_v45, %v6504_v51 }
 0x1ec   : > { %v1790_v6 = vpop.f32.mrf.mxu3  ;;  %5057 = vmatmul.msk.bf16.gmra.mxu2 %vm791_vm3, %v5317_v38  ;;  %v2767_v13 = vpop.f32.mrf.mxu1  ;;  %v2676_v38 = vunpack.c.l.b16 %v2612_v22  ;;  %v3451_v22 = vsel %vm5516_vm4, %v3446_v32, %v3450_v26  ;;  %v3458_v61 = vrot.slane %v3456_v60, 5  ;;  %v6552_v21 = vrot.slane %v3462_v44, 5  ;;  %v5402_v44 = vld [vmem:[%s5497_s18 + $0x8c] sm:$0x1] }
 0x1ed   : > { %v1824_v8 = vadd.f32 %v1790_v6, %v1537_v28  ;;  %v2846_v59 = vadd.f32 %v2767_v13, %v5981_v49  ;;  %v2675_v49 = vunpack.c.l.b16 %v2609_v29  ;;  %v3947_v6 = vrot.slane %v6487_v15, 5 }
 0x1ee   : > { %v3468_v51 = vrot.slane %v3466_v43, 4  ;;  %v3616_v15 = vunpack.c.l.b16 %v3441_v1  ;;  %v2618_v43 = vrot.slane %v5402_v44, 5 }
 0x1ef   : > { %v3052_v53 = vpop.f32.mrf.mxu2  ;;  %v6537_v28 = vadd.f32 %v2444_v7, %v1824_v8  ;;  %v2698_v0 = vpack.c.b16 %v2676_v38, %v2675_v49  ;;  %v2615_v8 = vrot.slane %v5401_v34, 5  ;;  %v6557_v49 = vld [vmem:[%s5497_s18 + $0x98] sm:$0x1]  ;;  %v5155_v38 = vrot.slane %v5139_v63, 9 }
 0x1f0   : > { %v3132_v37 = vadd.f32 %v3052_v53, %v2845_v24  ;;  %v4913_v24 = vld [vmem:[%s5497_s18 + $0x84] sm:$0xe]  ;;  %v3949_v32 = vrot.slane %v3947_v6, 4 }
 0x1f1   : > { %5122 = vmatmul.msk.bf16.gmra.mxu3 %vm791_vm3, %v3638_v2  ;;  %v3455_v2 = vrot.slane %v3453_v35, 4  ;;  %v4929_v45 = vrot.slane %v4913_v24, 9  ;;  %v3617_v35 = vunpack.c.l.b16 %v3451_v22  ;;  %v2617_v60 = vrot.slane %v2615_v8, 4 }
 0x1f3   : > { %v4104_v7 = vpop.f32.mrf.mxu0  ;;  %v3459_v1 = vor.u32 %v3458_v61, %v3455_v2  ;;  %v3639_v22 = vpack.c.b16 %v3617_v35, %v3616_v15  ;;  %v2619_v2 = vsel %vm5692_vm7, %v2617_v60, %v2618_v43  ;;  %v5098_v61 = vld [vmem:[%s5497_s18 + $0x9c] sm:$0xf] }
 0x1f4   : > { %v3706_v13 = vpop.f32.mrf.mxu3  ;;  %v2770_v29 = vpop.f32.mrf.mxu1  ;;  %v2678_v35 = vunpack.c.l.b16 %v2619_v2  ;;  %v3477_v44 = vshrl.u32 %v5098_v61, 16 }
 0x1f5   : > { %v3786_v40 = vadd.f32 %v3706_v13, %v3132_v37  ;;  %v2847_v54 = vadd.f32 %v2770_v29, %v5992_v62  ;;  %v3950_v37 = vrot.slane %v6513_v12, 5  ;;  %v5318_v62 = vld [vmem:[%s5497_s18 + $0x84] sm:$0xff]  ;;  %v2616_v12 = vsel %vm5692_vm7, %v4929_v45, %v2615_v8  ;;  %v6581_v45 = vld [vmem:[%s5497_s18 + $0xa0] sm:$0xf] }
 0x1f6   : > { %5171 = vmatmul.msk.bf16.gmra.mxu0 %vm791_vm3, %v4036_v3  ;;  %v3469_v3 = vor.u32 %v3468_v51, %v6552_v21  ;;  %v3460_v51 = vrot.slane %v3459_v1, 4  ;;  %v3490_v43 = vshrl.u32 %v6581_v45, 16 }
 0x1f7   : > { %v3054_v47 = vpop.f32.mrf.mxu2  ;;  %v4184_v53 = vadd.f32 %v4104_v7, %v3786_v40  ;;  %4945 = vmatmul.msk.bf16.gmra.mxu1 %vm791_vm3, %v2698_v0  ;;  %v3472_v7 = vshll.u32 %v6557_v49, 16  ;;  %v6567_v0 = vld [vmem:[%s6982_s2] ss:$0 sm:$0xff]  ;;  %v3951_v13 = vsel %vm5692_vm7, %v3949_v32, %v3950_v37 }
 0x1f8   : > { %v3133_v26 = vadd.f32 %v3054_v47, %v2846_v59  ;;  %v3948_v59 = vsel %vm5692_vm7, %v5155_v38, %v3947_v6  ;;  %v3470_v8 = vrot.slane %v3469_v3, 4  ;;  %v2677_v6 = vunpack.c.l.b16 %v2616_v12 }
 0x1f9   : > { %v3474_v47 = vrot.slane %v3472_v7, 5  ;;  %v4014_v38 = vunpack.c.l.b16 %v3948_v59  ;;  %v4015_v32 = vunpack.c.l.b16 %v3951_v13  ;;  %v4220_v37 = vadd.f32 %v6567_v0, %v4184_v53 }
 0x1fa   : > { %v3465_v3 = vsel %vm5516_vm4, %v3460_v51, %v6552_v21 }
 0x1fb   : > { %v4106_v24 = vpop.f32.mrf.mxu0  ;;  %v3475_v53 = vsel %vm5516_vm4, %v3470_v8, %v3474_v47  ;;  %v4037_v7 = vpack.c.b16 %v4015_v32, %v4014_v38  ;;  %v4252_v12 = vmax.f32 %v4220_v37, 0.0  ;;  %v3492_v8 = vrot.slane %v3490_v43, 4  ;;  %v5140_v47 = vld [vmem:[%s5497_s18 + $0x90] sm:$0xe] }
 0x1fc   : > { %v3708_v29 = vpop.f32.mrf.mxu3  ;;  %5058 = vmatmul.msk.bf16.gmra.mxu2 %vm791_vm3, %v5318_v62  ;;  %v2772_v34 = vpop.f32.mrf.mxu1  ;;  %v5156_v43 = vrot.slane %v5140_v47, 9 }
 0x1fd   : > { %v3787_v63 = vadd.f32 %v3708_v29, %v3133_v26  ;;  %v2848_v40 = vadd.f32 %v2772_v34, %v6008_v20  ;;  %v3480_v26 = vshll.u32 %v5098_v61, 16  ;;  %v3486_v20 = vshll.u32 %v6581_v45, 16  ;;  %v4914_v34 = vld [vmem:[%s5497_s18 + $0x90] sm:$0xe] }
 0x1fe   : > { %v2699_v29 = vpack.c.b16 %v2678_v35, %v2677_v6  ;;  %v3619_v6 = vunpack.c.l.b16 %v3475_v53 }
 0x1ff   : > { %v3057_v15 = vpop.f32.mrf.mxu2  ;;  %v4185_v62 = vadd.f32 %v4106_v24, %v3787_v63  ;;  %v5403_v24 = vld [vmem:[%s5497_s18 + $0x94] sm:$0xf]  ;;  %v3479_v63 = vrot.slane %v3477_v44, 4  ;;  %v3482_v21 = vrot.slane %v3480_v26, 5  ;;  %v6596_v51 = vrot.slane %v3486_v20, 5 }
 0x200   : > { %v3134_v60 = vadd.f32 %v3057_v15, %v2847_v54  ;;  %v2622_v54 = vrot.slane %v5403_v24, 5  ;;  %v3618_v15 = vunpack.c.l.b16 %v3465_v3  ;;  %v3957_v24 = vrot.slane %v6557_v49, 5 }
 0x201   : > { %5123 = vmatmul.msk.bf16.gmra.mxu3 %vm791_vm3, %v3639_v22  ;;  %v4221_v1 = vadd.f32 %v6567_v0, %v4185_v62  ;;  %v3954_v22 = vrot.slane %v6535_v48, 5  ;;  %v6601_v62 = vld [vmem:[%s5497_s18 + $0xa4] sm:$0x1]  ;;  %v4930_v48 = vrot.slane %v4914_v34, 9  ;;  %v3483_v3 = vor.u32 %v3482_v21, %v3479_v63 }
 0x202   : > { %v2624_v35 = vrot.slane %v2622_v54, 4  ;;  %v3496_v53 = vshll.u32 %v6601_v62, 16  ;;  %v3640_v63 = vpack.c.b16 %v3619_v6, %v3618_v15 }
 0x203   : > { %v4253_v59 = vmax.f32 %v4221_v1, 0.0  ;;  %v4109_v13 = vpop.f32.mrf.mxu0  ;;  %v5404_v1 = vld [vmem:[%s5497_s18 + $0x98] sm:$0x1]  ;;  %v2623_v34 = vsel %vm5692_vm7, %v4930_v48, %v2622_v54  ;;  %v3955_v49 = vsel %vm5692_vm7, %v5156_v43, %v3954_v22 }
 0x204   : > { %v3711_v2 = vpop.f32.mrf.mxu3  ;;  %v2775_v61 = vpop.f32.mrf.mxu1  ;;  %v2625_v44 = vrot.slane %v5404_v1, 5  ;;  %v3498_v54 = vrot.slane %v3496_v53, 5  ;;  %v2679_v1 = vunpack.c.l.b16 %v2623_v34  ;;  %v4016_v6 = vunpack.c.l.b16 %v3955_v49 }
 0x205   : > { %v3788_v38 = vadd.f32 %v3711_v2, %v3134_v60  ;;  %v4284_v32 = vadd.f32 %v4253_v59, %v4252_v12  ;;  %v2849_v37 = vadd.f32 %v2775_v61, %v6021_v5  ;;  %v3956_v60 = vrot.slane %v3954_v22, 4  ;;  %v5319_v12 = vld [vmem:[%s5497_s18 + $0x90] sm:$0xff]  ;;  %v5229_v22 = vld [vmem:[%s6983_s3 + $0x60] sm:$0xf] }
 0x206   : > { %5172 = vmatmul.msk.bf16.gmra.mxu0 %vm791_vm3, %v4037_v7  ;;  %v3493_v59 = vor.u32 %v3492_v8, %v6596_v51  ;;  %v3484_v8 = vrot.slane %v3483_v3, 4  ;;  %v3961_v34 = vrot.slane %v6581_v45, 5 }
 0x207   : > { %v3059_v26 = vpop.f32.mrf.mxu2  ;;  %v4186_v20 = vadd.f32 %v4109_v13, %v3788_v38  ;;  %4946 = vmatmul.msk.bf16.gmra.mxu1 %vm791_vm3, %v2699_v29  ;;  %v2626_v29 = vsel %vm5692_vm7, %v2624_v35, %v2625_v44  ;;  %v5338_v44 = vld [vmem:[%s6983_s3 + $0x64] sm:$0xf0] }
 0x208   : > { %v3135_v5 = vadd.f32 %v3059_v26, %v2848_v40  ;;  %v3958_v40 = vsel %vm5692_vm7, %v3956_v60, %v3957_v24  ;;  %v3494_v47 = vrot.slane %v3493_v59, 4  ;;  %v2680_v15 = vunpack.c.l.b16 %v2626_v29  ;;  %v5101_v24 = vld [vmem:[%s5497_s18 + $0xa8] sm:$0xf] }
 0x209   : > { %v4222_v7 = vadd.f32 %v6567_v0, %v4186_v20  ;;  %v4017_v26 = vunpack.c.l.b16 %v3958_v40  ;;  %v5230_v20 = vor.u32 %v5338_v44, %v5229_v22  ;;  %v3504_v29 = vshll.u32 %v5101_v24, 16 }
 0x20a   : > { %v3499_v3 = vsel %vm5516_vm4, %v3494_v47, %v3498_v54  ;;  %v2700_v59 = vpack.c.b16 %v2680_v15, %v2679_v1  ;;  %v4915_v1 = vld [vmem:[%s5497_s18 + $0x9c] sm:$0xe]  ;;  %v3963_v15 = vrot.slane %v3961_v34, 4 }
 0x20b   : > { %v4254_v2 = vmax.f32 %v4222_v7, 0.0  ;;  %v4111_v13 = vpop.f32.mrf.mxu0  ;;  %4420 = vmatpush.bf16.msrb.mxu1 %v5230_v20  ;;  %v4038_v53 = vpack.c.b16 %v4017_v26, %v4016_v6  ;;  %v3501_v7 = vshrl.u32 %v5101_v24, 16  ;;  %v3621_v45 = vunpack.c.l.b16 %v3499_v3  ;;  %v5320_v24 = vld [vmem:[%s5497_s18 + $0x9c] sm:$0xff] }
 0x20c   : > { %v3713_v61 = vpop.f32.mrf.mxu3  ;;  %5059 = vmatmul.msk.bf16.gmra.mxu2 %vm791_vm3, %v5319_v12  ;;  %v2777_v21 = vpop.f32.mrf.mxu1  ;;  %v3489_v12 = vsel %vm5516_vm4, %v3484_v8, %v6596_v51  ;;  %v3964_v6 = vrot.slane %v6601_v62, 5 }
 0x20d   : > { %v3789_v38 = vadd.f32 %v3713_v61, %v3135_v5  ;;  %v4285_v48 = vadd.f32 %v4284_v32, %v4254_v2  ;;  %v2850_v35 = vadd.f32 %v2777_v21, %v6038_v39  ;;  %v6629_v39 = vld [vmem:[%s5497_s18 + $0xac] sm:$0xf]  ;;  %v3620_v51 = vunpack.c.l.b16 %v3489_v12  ;;  %v5405_v21 = vld [vmem:[%s5497_s18 + $0xa0] sm:$0xf]  ;;  %v5406_v12 = vld [vmem:[%s5497_s18 + $0xa4] sm:$0x1] }
 0x20e   : > { %v3510_v49 = vshll.u32 %v6629_v39, 16  ;;  %v3514_v40 = vshrl.u32 %v6629_v39, 16  ;;  %v2629_v8 = vrot.slane %v5405_v21, 5  ;;  %v3503_v44 = vrot.slane %v3501_v7, 4  ;;  %v6654_v7 = vld [vmem:[%s5497_s18 + $0xb0] sm:$0x1] }
 0x20f   : > { %v3062_v43 = vpop.f32.mrf.mxu2  ;;  %v4187_v60 = vadd.f32 %v4111_v13, %v3789_v38  ;;  %v2632_v3 = vrot.slane %v5406_v12, 5 }
 0x210   : > { %v3136_v32 = vadd.f32 %v3062_v43, %v2849_v37  ;;  %v5141_v37 = vld [vmem:[%s5497_s18 + $0x9c] sm:$0xe]  ;;  %v3506_v43 = vrot.slane %v3504_v29, 5 }
 0x211   : > { %5124 = vmatmul.msk.bf16.gmra.mxu3 %vm791_vm3, %v3640_v63  ;;  %v4223_v5 = vadd.f32 %v6567_v0, %v4187_v60  ;;  %v5157_v22 = vrot.slane %v5141_v37, 9  ;;  %v3516_v60 = vrot.slane %v3514_v40, 4 }
 0x212   : > { %v3507_v29 = vor.u32 %v3506_v43, %v3503_v44 }
 0x213   : > { %v4255_v2 = vmax.f32 %v4223_v5, 0.0  ;;  %v4114_v13 = vpop.f32.mrf.mxu0  ;;  %v2631_v5 = vrot.slane %v2629_v8, 4  ;;  %v3962_v62 = vsel %vm5692_vm7, %v5157_v22, %v3961_v34 }
 0x214   : > { %v3716_v61 = vpop.f32.mrf.mxu3  ;;  %v2780_v63 = vpop.f32.mrf.mxu1  ;;  %v4018_v21 = vunpack.c.l.b16 %v3962_v62  ;;  %v3968_v62 = vrot.slane %v6629_v39, 5 }
 0x215   : > { %v3790_v47 = vadd.f32 %v3716_v61, %v3136_v32  ;;  %v4286_v54 = vadd.f32 %v4285_v48, %v4255_v2  ;;  %v2851_v38 = vadd.f32 %v2780_v63, %v6047_v11  ;;  %v6648_v48 = vrot.slane %v3510_v49, 5 }
 0x216   : > { %5173 = vmatmul.msk.bf16.gmra.mxu0 %vm791_vm3, %v4038_v53  ;;  %v4931_v32 = vrot.slane %v4915_v1, 9  ;;  %v3641_v2 = vpack.c.b16 %v3621_v45, %v3620_v51  ;;  %v2633_v34 = vsel %vm5692_vm7, %v2631_v5, %v2632_v3  ;;  %v3520_v63 = vshll.u32 %v6654_v7, 16 }
 0x217   : > { %v3064_v26 = vpop.f32.mrf.mxu2  ;;  %v4188_v20 = vadd.f32 %v4114_v13, %v3790_v47  ;;  %4947 = vmatmul.msk.bf16.gmra.mxu1 %vm791_vm3, %v2700_v59  ;;  %v3965_v59 = vsel %vm5692_vm7, %v3963_v15, %v3964_v6  ;;  %v2682_v6 = vunpack.c.l.b16 %v2633_v34 }
 0x218   : > { %v3137_v11 = vadd.f32 %v3064_v26, %v2850_v35  ;;  %v3517_v35 = vor.u32 %v3516_v60, %v6648_v48  ;;  %v2630_v61 = vsel %vm5692_vm7, %v4931_v32, %v2629_v8  ;;  %v4019_v22 = vunpack.c.l.b16 %v3965_v59  ;;  %v5104_v26 = vld [vmem:[%s5497_s18 + $0xb4] sm:$0xf] }
 0x219   : > { %v4224_v53 = vadd.f32 %v6567_v0, %v4188_v20  ;;  %v2681_v15 = vunpack.c.l.b16 %v2630_v61  ;;  %v6670_v20 = vld [vmem:[%s5497_s18 + $0xb8] sm:$0xf]  ;;  %v3508_v8 = vrot.slane %v3507_v29, 4  ;;  %v3528_v32 = vshll.u32 %v5104_v26, 16 }
 0x21a   : > { %v3534_v5 = vshll.u32 %v6670_v20, 16  ;;  %v3538_v12 = vshrl.u32 %v6670_v20, 16 }
 0x21b   : > { %v4256_v37 = vmax.f32 %v4224_v53, 0.0  ;;  %v4116_v13 = vpop.f32.mrf.mxu0 }
 0x21c   : > { %v3718_v49 = vpop.f32.mrf.mxu3  ;;  %5060 = vmatmul.msk.bf16.gmra.mxu2 %vm791_vm3, %v5320_v24  ;;  %v2782_v40 = vpop.f32.mrf.mxu1  ;;  %v3518_v24 = vrot.slane %v3517_v35, 4  ;;  %v5142_v35 = vld [vmem:[%s5497_s18 + $0xa8] sm:$0xe] }
 0x21d   : > { %v3791_v51 = vadd.f32 %v3718_v49, %v3137_v11  ;;  %v4287_v47 = vadd.f32 %v4286_v54, %v4256_v37  ;;  %v2852_v1 = vadd.f32 %v2782_v40, %v6061_v46  ;;  %v3522_v54 = vrot.slane %v3520_v63, 5  ;;  %v4916_v63 = vld [vmem:[%s5497_s18 + $0xa8] sm:$0xe] }
 0x21e   : > { %v4039_v11 = vpack.c.b16 %v4019_v22, %v4018_v21  ;;  %v3525_v46 = vshrl.u32 %v5104_v26, 16  ;;  %v3530_v21 = vrot.slane %v3528_v32, 5  ;;  %v4932_v26 = vrot.slane %v4916_v63, 9 }
 0x21f   : > { %v3067_v45 = vpop.f32.mrf.mxu2  ;;  %v4189_v44 = vadd.f32 %v4116_v13, %v3791_v51  ;;  %v5407_v13 = vld [vmem:[%s5497_s18 + $0xac] sm:$0xf]  ;;  %v3523_v34 = vsel %vm5516_vm4, %v3518_v24, %v3522_v54  ;;  %v6687_v51 = vrot.slane %v3534_v5, 5 }
 0x220   : > { %v3138_v43 = vadd.f32 %v3067_v45, %v2851_v38  ;;  %v2701_v38 = vpack.c.b16 %v2682_v6, %v2681_v15  ;;  %v2636_v29 = vrot.slane %v5407_v13, 5  ;;  %v3527_v39 = vrot.slane %v3525_v46, 4  ;;  %v5321_v6 = vld [vmem:[%s5497_s18 + $0xa8] sm:$0xff]  ;;  %v6695_v46 = vld [vmem:[%s5497_s18 + $0xbc] sm:$0x1] }
 0x221   : > { %5125 = vmatmul.msk.bf16.gmra.mxu3 %vm791_vm3, %v3641_v2  ;;  %v4225_v60 = vadd.f32 %v6567_v0, %v4189_v44  ;;  %v3513_v2 = vsel %vm5516_vm4, %v3508_v8, %v6648_v48  ;;  %v3540_v48 = vrot.slane %v3538_v12, 4  ;;  %v3970_v44 = vrot.slane %v3968_v62, 4  ;;  %v5408_v8 = vld [vmem:[%s5497_s18 + $0xb0] sm:$0x1] }
 0x222   : > { %v3622_v54 = vunpack.c.l.b16 %v3513_v2  ;;  %v3531_v12 = vor.u32 %v3530_v21, %v3527_v39  ;;  %v3544_v2 = vshll.u32 %v6695_v46, 16 }
 0x223   : > { %v4257_v3 = vmax.f32 %v4225_v60, 0.0  ;;  %v4119_v53 = vpop.f32.mrf.mxu0  ;;  %v2639_v60 = vrot.slane %v5408_v8, 5 }
 0x224   : > { %v3721_v59 = vpop.f32.mrf.mxu3  ;;  %v2785_v37 = vpop.f32.mrf.mxu1 }
 0x225   : > { %v3792_v49 = vadd.f32 %v3721_v59, %v3138_v43  ;;  %v4288_v40 = vadd.f32 %v4287_v47, %v4257_v3  ;;  %v2853_v61 = vadd.f32 %v2785_v37, %v6070_v57  ;;  %v5158_v47 = vrot.slane %v5142_v35, 9 }
 0x226   : > { %5174 = vmatmul.msk.bf16.gmra.mxu0 %vm791_vm3, %v4039_v11  ;;  %v3971_v57 = vrot.slane %v6654_v7, 5  ;;  %v2638_v43 = vrot.slane %v2636_v29, 4  ;;  %v3623_v11 = vunpack.c.l.b16 %v3523_v34  ;;  %v3541_v37 = vor.u32 %v3540_v48, %v6687_v51  ;;  %v5336_v34 = vld [vmem:[%s6983_s3 + $0x54] sm:$0xf0] }
 0x227   : > { %v3069_v22 = vpop.f32.mrf.mxu2  ;;  %v4190_v45 = vadd.f32 %v4119_v53, %v3792_v49  ;;  %4948 = vmatmul.msk.bf16.gmra.mxu1 %vm791_vm3, %v2701_v38  ;;  %v3969_v3 = vsel %vm5692_vm7, %v5158_v47, %v3968_v62  ;;  %v2637_v38 = vsel %vm5692_vm7, %v4932_v26, %v2636_v29  ;;  %v5221_v49 = vld [vmem:[%s6983_s3 + $0x50] sm:$0xf]  ;;  %v5107_v29 = vld [vmem:[%s5497_s18 + $0xc0] sm:$0xf] }
 0x228   : > { %v3139_v15 = vadd.f32 %v3069_v22, %v2852_v1  ;;  %v3972_v7 = vsel %vm5692_vm7, %v3970_v44, %v3971_v57  ;;  %v2640_v59 = vsel %vm5692_vm7, %v2638_v43, %v2639_v60  ;;  %v3642_v35 = vpack.c.b16 %v3623_v11, %v3622_v54  ;;  %v6716_v57 = vld [vmem:[%s5497_s18 + $0xc4] sm:$0xf] }
 0x229   : > { %v4226_v24 = vadd.f32 %v6567_v0, %v4190_v45  ;;  %v4020_v63 = vunpack.c.l.b16 %v3969_v3  ;;  %v4021_v39 = vunpack.c.l.b16 %v3972_v7  ;;  %v5222_v21 = vor.u32 %v5336_v34, %v5221_v49  ;;  %v4917_v34 = vld [vmem:[%s5497_s18 + $0xb4] sm:$0xe] }
 0x22a   : > { %v2683_v45 = vunpack.c.l.b16 %v2637_v38  ;;  %v2684_v47 = vunpack.c.l.b16 %v2640_v59  ;;  %v3532_v44 = vrot.slane %v3531_v12, 4  ;;  %v3549_v26 = vshrl.u32 %v5107_v29, 16  ;;  %v5143_v12 = vld [vmem:[%s5497_s18 + $0xb4] sm:$0xe]  ;;  %v5409_v59 = vld [vmem:[%s5497_s18 + $0xb8] sm:$0xf] }
 0x22b   : > { %v4258_v32 = vmax.f32 %v4226_v24, 0.0  ;;  %v4121_v5 = vpop.f32.mrf.mxu0  ;;  %4421 = vmatpush.bf16.msrb.mxu1 %v5222_v21  ;;  %v3552_v8 = vshll.u32 %v5107_v29, 16  ;;  %v4040_v60 = vpack.c.b16 %v4021_v39, %v4020_v63  ;;  %v3558_v24 = vshll.u32 %v6716_v57, 16  ;;  %v6995_v21 = vld [vmem:[#allocation2_spill] sm:$0xff] }
 0x22c   : > { %v3723_v1 = vpop.f32.mrf.mxu3  ;;  %5061 = vmatmul.msk.bf16.gmra.mxu2 %vm791_vm3, %v5321_v6  ;;  %v2787_v53 = vpop.f32.mrf.mxu1  ;;  %v3546_v6 = vrot.slane %v3544_v2, 5  ;;  %v3562_v54 = vshrl.u32 %v6716_v57, 16  ;;  %v3975_v3 = vrot.slane %v6670_v20, 5  ;;  %v3551_v2 = vrot.slane %v3549_v26, 4  ;;  %v5410_v26 = vld [vmem:[%s5497_s18 + $0xbc] sm:$0x1] }
 0x22d   : > { %v3793_v13 = vadd.f32 %v3723_v1, %v3139_v15  ;;  %v4289_v62 = vadd.f32 %v4288_v40, %v4258_v32  ;;  %v3542_v15 = vrot.slane %v3541_v37, 4  ;;  %v2643_v37 = vrot.slane %v5409_v59, 5 }
 0x22e   : > { %v3554_v29 = vrot.slane %v3552_v8, 5  ;;  %v3560_v20 = vrot.slane %v3558_v24, 5  ;;  %v3564_v63 = vrot.slane %v3562_v54, 4  ;;  %v5159_v39 = vrot.slane %v5143_v12, 9 }
 0x22f   : > { %v3072_v22 = vpop.f32.mrf.mxu2  ;;  %v4191_v48 = vadd.f32 %v4121_v5, %v3793_v13  ;;  %v2702_v5 = vpack.c.b16 %v2684_v47, %v2683_v45  ;;  %v3547_v38 = vsel %vm5516_vm4, %v3542_v15, %v3546_v6  ;;  %v6736_v47 = vld [vmem:[%s5497_s18 + $0xc8] sm:$0x1]  ;;  %v4933_v15 = vrot.slane %v4917_v34, 9 }
 0x230   : > { %v3140_v40 = vadd.f32 %v3072_v22, %v2853_v61  ;;  %v3537_v61 = vsel %vm5516_vm4, %v3532_v44, %v6687_v51  ;;  %v2854_v22 = vadd.f32 %v2787_v53, %v6995_v21  ;;  %v5322_v44 = vld [vmem:[%s5497_s18 + $0xb4] sm:$0xff]  ;;  %v2645_v6 = vrot.slane %v2643_v37, 4 }
 0x231   : > { %5126 = vmatmul.msk.bf16.gmra.mxu3 %vm791_vm3, %v3642_v35  ;;  %v4227_v43 = vadd.f32 %v6567_v0, %v4191_v48  ;;  %v3624_v51 = vunpack.c.l.b16 %v3537_v61  ;;  %v3555_v24 = vor.u32 %v3554_v29, %v3551_v2  ;;  %v3565_v53 = vor.u32 %v3564_v63, %v3560_v20 }
 0x232   : > { %v3568_v54 = vshll.u32 %v6736_v47, 16 }
 0x233   : > { %v4259_v11 = vmax.f32 %v4227_v43, 0.0  ;;  %v4124_v32 = vpop.f32.mrf.mxu0  ;;  %v2646_v43 = vrot.slane %v5410_v26, 5  ;;  %v3566_v34 = vrot.slane %v3565_v53, 4  ;;  %v5411_v53 = vld [vmem:[%s5497_s18 + $0xc4] sm:$0xf] }
 0x234   : > { %v3726_v7 = vpop.f32.mrf.mxu3  ;;  %v2790_v1 = vpop.f32.mrf.mxu1  ;;  %v3570_v29 = vrot.slane %v3568_v54, 5  ;;  %v2650_v54 = vrot.slane %v5411_v53, 5  ;;  %v5213_v53 = vld [vmem:[%s6983_s3 + $0x40] sm:$0xf] }
 0x235   : > { %v3794_v13 = vadd.f32 %v3726_v7, %v3140_v40  ;;  %v4290_v35 = vadd.f32 %v4289_v62, %v4259_v11  ;;  %v2855_v49 = vadd.f32 %v2790_v1, %v6097_v56  ;;  %v3977_v62 = vrot.slane %v3975_v3, 4 }
 0x236   : > { %5175 = vmatmul.msk.bf16.gmra.mxu0 %vm791_vm3, %v4040_v60  ;;  %v3978_v56 = vrot.slane %v6695_v46, 5  ;;  %v3625_v40 = vunpack.c.l.b16 %v3547_v38  ;;  %v2644_v1 = vsel %vm5692_vm7, %v4933_v15, %v2643_v37  ;;  %v2647_v38 = vsel %vm5692_vm7, %v2645_v6, %v2646_v43 }
 0x237   : > { %v3074_v48 = vpop.f32.mrf.mxu2  ;;  %v4192_v45 = vadd.f32 %v4124_v32, %v3794_v13  ;;  %4949 = vmatmul.msk.bf16.gmra.mxu1 %vm791_vm3, %v2702_v5  ;;  %v3976_v5 = vsel %vm5692_vm7, %v5159_v39, %v3975_v3  ;;  %v3556_v3 = vrot.slane %v3555_v24, 4  ;;  %v3982_v43 = vrot.slane %v6716_v57, 5 }
 0x238   : > { %v3141_v8 = vadd.f32 %v3074_v48, %v2854_v22  ;;  %v3979_v46 = vsel %vm5692_vm7, %v3977_v62, %v3978_v56  ;;  %v3643_v12 = vpack.c.b16 %v3625_v40, %v3624_v51  ;;  %v4022_v63 = vunpack.c.l.b16 %v3976_v5 }
 0x239   : > { %v4228_v60 = vadd.f32 %v6567_v0, %v4192_v45  ;;  %v4023_v39 = vunpack.c.l.b16 %v3979_v46  ;;  %v2685_v22 = vunpack.c.l.b16 %v2644_v1  ;;  %v2686_v48 = vunpack.c.l.b16 %v2647_v38  ;;  %v5110_v45 = vld [vmem:[%s5497_s18 + $0xcc] sm:$0xf] }
 0x23a   : > { %v3576_v40 = vshll.u32 %v5110_v45, 16 }
 0x23b   : > { %v4260_v11 = vmax.f32 %v4228_v60, 0.0  ;;  %v4126_v32 = vpop.f32.mrf.mxu0  ;;  %v4041_v56 = vpack.c.b16 %v4023_v39, %v4022_v63  ;;  %v2703_v26 = vpack.c.b16 %v2686_v48, %v2685_v22  ;;  %v2652_v39 = vrot.slane %v2650_v54, 4  ;;  %v6777_v48 = vld [vmem:[%s5497_s18 + $0xd4] sm:$0x1] }
 0x23c   : > { %v3728_v61 = vpop.f32.mrf.mxu3  ;;  %5062 = vmatmul.msk.bf16.gmra.mxu2 %vm791_vm3, %v5322_v44  ;;  %v2792_v7 = vpop.f32.mrf.mxu1  ;;  %v3573_v44 = vshrl.u32 %v5110_v45, 16 }
 0x23d   : > { %v3795_v59 = vadd.f32 %v3728_v61, %v3141_v8  ;;  %v4291_v2 = vadd.f32 %v4290_v35, %v4260_v11  ;;  %v2856_v13 = vadd.f32 %v2792_v7, %v6118_v36  ;;  %v3561_v36 = vsel %vm5516_vm4, %v3556_v3, %v3560_v20  ;;  %v5144_v20 = vld [vmem:[%s5497_s18 + $0xc0] sm:$0xe] }
 0x23e   : > { %v3571_v35 = vsel %vm5516_vm4, %v3566_v34, %v3570_v29  ;;  %v3626_v24 = vunpack.c.l.b16 %v3561_v36  ;;  %v4918_v61 = vld [vmem:[%s5497_s18 + $0xc0] sm:$0xe]  ;;  %v3578_v7 = vrot.slane %v3576_v40, 5  ;;  %v3984_v3 = vrot.slane %v3982_v43, 4 }
 0x23f   : > { %v3077_v21 = vpop.f32.mrf.mxu2  ;;  %v4193_v51 = vadd.f32 %v4126_v32, %v3795_v59  ;;  %v3627_v46 = vunpack.c.l.b16 %v3571_v35  ;;  %v5323_v29 = vld [vmem:[%s5497_s18 + $0xc0] sm:$0xff]  ;;  %v4934_v63 = vrot.slane %v4918_v61, 9 }
 0x240   : > { %v3142_v62 = vadd.f32 %v3077_v21, %v2855_v49  ;;  %v6761_v49 = vld [vmem:[%s5497_s18 + $0xd0] sm:$0xf]  ;;  %v5412_v21 = vld [vmem:[%s5497_s18 + $0xc8] sm:$0x1] }
 0x241   : > { %5127 = vmatmul.msk.bf16.gmra.mxu3 %vm791_vm3, %v3643_v12  ;;  %v4229_v37 = vadd.f32 %v6567_v0, %v4193_v51  ;;  %v3575_v12 = vrot.slane %v3573_v44, 4  ;;  %v3582_v57 = vshll.u32 %v6761_v49, 16  ;;  %v3586_v1 = vshrl.u32 %v6761_v49, 16 }
 0x242   : > { %v2653_v51 = vrot.slane %v5412_v21, 5  ;;  %v2651_v40 = vsel %vm5692_vm7, %v4934_v63, %v2650_v54  ;;  %v5145_v21 = vld [vmem:[%s5497_s18 + $0xcc] sm:$0xe] }
 0x243   : > { %v4261_v15 = vmax.f32 %v4229_v37, 0.0  ;;  %v4129_v6 = vpop.f32.mrf.mxu0  ;;  %v3584_v45 = vrot.slane %v3582_v57, 5 }
 0x244   : > { %v3731_v8 = vpop.f32.mrf.mxu3  ;;  %v2795_v60 = vpop.f32.mrf.mxu1 }
 0x245   : > { %v3796_v11 = vadd.f32 %v3731_v8, %v3142_v62  ;;  %v4292_v32 = vadd.f32 %v4291_v2, %v4261_v15  ;;  %v2857_v5 = vadd.f32 %v2795_v60, %v6137_v41  ;;  %v5160_v2 = vrot.slane %v5144_v20, 9 }
 0x246   : > { %5176 = vmatmul.msk.bf16.gmra.mxu0 %vm791_vm3, %v4041_v56  ;;  %v3985_v41 = vrot.slane %v6736_v47, 5  ;;  %v3588_v62 = vrot.slane %v3586_v1, 4  ;;  %v3644_v56 = vpack.c.b16 %v3627_v46, %v3626_v24  ;;  %v2654_v15 = vsel %vm5692_vm7, %v2652_v39, %v2653_v51  ;;  %v5334_v24 = vld [vmem:[%s6983_s3 + $0x44] sm:$0xf0] }
 0x247   : > { %v3079_v38 = vpop.f32.mrf.mxu2  ;;  %v4194_v59 = vadd.f32 %v4129_v6, %v3796_v11  ;;  %4950 = vmatmul.msk.bf16.gmra.mxu1 %vm791_vm3, %v2703_v26  ;;  %v3983_v35 = vsel %vm5692_vm7, %v5160_v2, %v3982_v43  ;;  %v3579_v6 = vor.u32 %v3578_v7, %v3575_v12  ;;  %v3592_v43 = vshll.u32 %v6777_v48, 16 }
 0x248   : > { %v3143_v34 = vadd.f32 %v3079_v38, %v2856_v13  ;;  %v3986_v47 = vsel %vm5692_vm7, %v3984_v3, %v3985_v41  ;;  %v3589_v20 = vor.u32 %v3588_v62, %v3584_v45  ;;  %v4024_v54 = vunpack.c.l.b16 %v3983_v35 }
 0x249   : > { %v4230_v22 = vadd.f32 %v6567_v0, %v4194_v59  ;;  %v4025_v11 = vunpack.c.l.b16 %v3986_v47  ;;  %v5214_v46 = vor.u32 %v5334_v24, %v5213_v53  ;;  %v2687_v7 = vunpack.c.l.b16 %v2651_v40 }
 0x24a   : > { %v3580_v1 = vrot.slane %v3579_v6, 4  ;;  %v3590_v38 = vrot.slane %v3589_v20, 4  ;;  %v3594_v59 = vrot.slane %v3592_v43, 5 }
 0x24b   : > { %v4262_v37 = vmax.f32 %v4230_v22, 0.0  ;;  %v4131_v36 = vpop.f32.mrf.mxu0  ;;  %4422 = vmatpush.bf16.msrb.mxu1 %v5214_v46  ;;  %v4042_v2 = vpack.c.b16 %v4025_v11, %v4024_v54 }
 0x24c   : > { %v3733_v13 = vpop.f32.mrf.mxu3  ;;  %5063 = vmatmul.msk.bf16.gmra.mxu2 %vm791_vm3, %v5323_v29  ;;  %v2797_v44 = vpop.f32.mrf.mxu1  ;;  %v3989_v29 = vrot.slane %v6761_v49, 5  ;;  %v3585_v62 = vsel %vm5516_vm4, %v3580_v1, %v3584_v45  ;;  %v5161_v49 = vrot.slane %v5145_v21, 9 }
 0x24d   : > { %v3797_v26 = vadd.f32 %v3733_v13, %v3143_v34  ;;  %v4293_v8 = vadd.f32 %v4292_v32, %v4262_v37  ;;  %v2858_v60 = vadd.f32 %v2797_v44, %v6151_v25  ;;  %v2688_v32 = vunpack.c.l.b16 %v2654_v15  ;;  %v5324_v44 = vld [vmem:[%s5497_s18 + $0xcc] sm:$0xff] }
 0x24e   : > { %v3595_v37 = vsel %vm5516_vm4, %v3590_v38, %v3594_v59  ;;  %v3991_v47 = vrot.slane %v3989_v29, 4  ;;  %v3992_v13 = vrot.slane %v6777_v48, 5  ;;  %v3628_v40 = vunpack.c.l.b16 %v3585_v62  ;;  %v5339_v62 = vld [vmem:[%s6983_s3 + $0x74] sm:$0xf] }
 0x24f   : > { %v3082_v61 = vpop.f32.mrf.mxu2  ;;  %v4195_v12 = vadd.f32 %v4131_v36, %v3797_v26  ;;  %v2704_v34 = vpack.c.b16 %v2688_v32, %v2687_v7  ;;  %v3629_v15 = vunpack.c.l.b16 %v3595_v37  ;;  %v3990_v33 = vsel %vm5692_vm7, %v5161_v49, %v3989_v29 }
 0x250   : > { %v3144_v25 = vadd.f32 %v3082_v61, %v2857_v5  ;;  %v3993_v26 = vsel %vm5692_vm7, %v3991_v47, %v3992_v13  ;;  %v4026_v20 = vunpack.c.l.b16 %v3990_v33 }
 0x251   : > { %5128 = vmatmul.msk.bf16.gmra.mxu3 %vm791_vm3, %v3644_v56  ;;  %v4231_v57 = vadd.f32 %v6567_v0, %v4195_v12  ;;  %v4027_v54 = vunpack.c.l.b16 %v3993_v26 }
 0x253   : > { %v4263_v3 = vmax.f32 %v4231_v57, 0.0  ;;  %v4134_v41 = vpop.f32.mrf.mxu0  ;;  %v4043_v23 = vpack.c.b16 %v4027_v54, %v4026_v20 }
 0x254   : > { %v3736_v63 = vpop.f32.mrf.mxu3  ;;  %v2800_v39 = vpop.f32.mrf.mxu1 }
 0x255   : > { %v3798_v51 = vadd.f32 %v3736_v63, %v3144_v25  ;;  %v4294_v5 = vadd.f32 %v4293_v8, %v4263_v3  ;;  %v2859_v22 = vadd.f32 %v2800_v39, %v6171_v42 }
 0x256   : > { %5177 = vmatmul.msk.bf16.gmra.mxu0 %vm791_vm3, %v4042_v2 }
 0x257   : > { %v3084_v36 = vpop.f32.mrf.mxu2  ;;  %v4196_v35 = vadd.f32 %v4134_v41, %v3798_v51  ;;  %4951 = vmatmul.msk.bf16.gmra.mxu1 %vm791_vm3, %v2704_v34 }
 0x258   : > { %v3145_v56 = vadd.f32 %v3084_v36, %v2858_v60  ;;  %v3645_v60 = vpack.c.b16 %v3629_v15, %v3628_v40  ;;  %v5239_v36 = vld [vmem:[%s6983_s3 + $0x78] sm:$0xf0] }
 0x259   : > { %v4232_v42 = vadd.f32 %v6567_v0, %v4196_v35  ;;  %v5242_v47 = vor.u32 %v5339_v62, %v5239_v36  ;;  %v5347_v62 = vld [vmem:[%s6986_s6 + $0x30] sm:$0xff] }
 0x25b   : > { %v4264_v45 = vmax.f32 %v4232_v42, 0.0  ;;  %v4136_v6 = vpop.f32.mrf.mxu0  ;;  %4432 = vmatpush.bf16.msrb.mxu2 %v5242_v47 }
 0x25c   : > { %v3738_v8 = vpop.f32.mrf.mxu3  ;;  %5064 = vmatmul.msk.bf16.gmra.mxu2 %vm791_vm3, %v5324_v44  ;;  %v2802_v43 = vpop.f32.mrf.mxu1 }
 0x25d   : > { %v3799_v53 = vadd.f32 %v3738_v8, %v3145_v56  ;;  %v4295_v48 = vadd.f32 %v4294_v5, %v4264_v45  ;;  %v2860_v24 = vadd.f32 %v2802_v43, %v6194_v52 }
 0x25f   : > { %v3087_v11 = vpop.f32.mrf.mxu2  ;;  %v4197_v46 = vadd.f32 %v4136_v6, %v3799_v53 }
 0x260   : > { %v3146_v61 = vadd.f32 %v3087_v11, %v2859_v22  ;;  %v5205_v22 = vld [vmem:[%s6983_s3 + $0x30] sm:$0xf] }
 0x261   : > { %5129 = vmatmul.msk.bf16.gmra.mxu3 %vm791_vm3, %v3645_v60  ;;  %v4233_v12 = vadd.f32 %v6567_v0, %v4197_v46 }
 0x263   : > { %v4265_v7 = vmax.f32 %v4233_v12, 0.0  ;;  %v4139_v32 = vpop.f32.mrf.mxu0 }
 0x264   : > { %v3741_v25 = vpop.f32.mrf.mxu3  ;;  %v2805_v57 = vpop.f32.mrf.mxu1 }
 0x265   : > { %v3800_v1 = vadd.f32 %v3741_v25, %v3146_v61  ;;  %v4296_v38 = vadd.f32 %v4295_v48, %v4265_v7  ;;  %v2861_v59 = vadd.f32 %v2805_v57, %v6215_v9  ;;  %v5332_v9 = vld [vmem:[%s6983_s3 + $0x34] sm:$0xf0] }
 0x266   : > { %5178 = vmatmul.msk.bf16.gmra.mxu0 %vm791_vm3, %v4043_v23  ;;  %v5206_v37 = vor.u32 %v5332_v9, %v5205_v22  ;;  %v5231_v9 = vld [vmem:[%s6983_s3 + $0x68] sm:$0xf0] }
 0x267   : > { %v3089_v52 = vpop.f32.mrf.mxu2  ;;  %v4198_v2 = vadd.f32 %v4139_v32, %v3800_v1 }
 0x268   : > { %v3147_v3 = vadd.f32 %v3089_v52, %v2860_v24  ;;  %4423 = vmatpush.bf16.msrb.mxu1 %v5206_v37 }
 0x269   : > { %v4234_v41 = vadd.f32 %v6567_v0, %v4198_v2 }
 0x26b   : > { %v4266_v34 = vmax.f32 %v4234_v41, 0.0  ;;  %v4141_v29 = vpop.f32.mrf.mxu0 }
 0x26c   : > { %v3743_v63 = vpop.f32.mrf.mxu3  ;;  %v2807_v39 = vpop.f32.mrf.mxu1 }
 0x26d   : > { %v3801_v21 = vadd.f32 %v3743_v63, %v3147_v3  ;;  %v4297_v51 = vadd.f32 %v4296_v38, %v4266_v34  ;;  %v2862_v5 = vadd.f32 %v2807_v39, %v6234_v31  ;;  %v5348_v31 = vld [vmem:[%s6986_s6 + $0x38] sm:$0xff] }
 0x26e   : > { %4516 = vmatpush.bf16.msrb.mxu3 %v5348_v31 }
 0x26f   : > { %v3092_v35 = vpop.f32.mrf.mxu2  ;;  %v4199_v49 = vadd.f32 %v4141_v29, %v3801_v21 }
 0x270   : > { %v3148_v13 = vadd.f32 %v3092_v35, %v2861_v59 }
 0x271   : > { %v4235_v56 = vadd.f32 %v6567_v0, %v4199_v49 }
 0x272   : > { %4517 = vmatpush.bf16.msrb.mxu3 %v5347_v62 }
 0x273   : > { %v4267_v44 = vmax.f32 %v4235_v56, 0.0  ;;  %v4144_v42 = vpop.f32.mrf.mxu0 }
 0x274   : > { %v3746_v40 = vpop.f32.mrf.mxu3  ;;  %v2810_v15 = vpop.f32.mrf.mxu1 }
 0x275   : > { %v3802_v45 = vadd.f32 %v3746_v40, %v3148_v13  ;;  %v4298_v6 = vadd.f32 %v4297_v51, %v4267_v44  ;;  %v2863_v33 = vadd.f32 %v2810_v15, %v6254_v14  ;;  %v5197_v51 = vld [vmem:[%s6983_s3 + $0x20] sm:$0xf]  ;;  %v6996_v15 = vld [vmem:[#allocation3_spill] sm:$0xff] }
 0x277   : > { %v3094_v26 = vpop.f32.mrf.mxu2  ;;  %v4200_v8 = vadd.f32 %v4144_v42, %v3802_v45 }
 0x278   : > { %v3149_v43 = vadd.f32 %v3094_v26, %v2862_v5  ;;  %v5330_v5 = vld [vmem:[%s6983_s3 + $0x24] sm:$0xf0] }
 0x279   : > { %v4236_v53 = vadd.f32 %v6567_v0, %v4200_v8  ;;  %v5198_v22 = vor.u32 %v5330_v5, %v5197_v51  ;;  %v6864_v8 = vld [vmem:[%s6982_s2] ss:$0 sm:$0xff]  ;;  %v5223_v51 = vld [vmem:[%s6983_s3 + $0x58] sm:$0xf0]  ;;  %v5346_v5 = vld [vmem:[%s6986_s6 + $0x28] sm:$0xff] }
 0x27a   : > { %4518 = vmatpush.bf16.msrb.mxu3 %v5346_v5 }
 0x27b   : > { %v4268_v48 = vmax.f32 %v4236_v53, 0.0  ;;  %v4146_v60 = vpop.f32.mrf.mxu0  ;;  %4424 = vmatpush.bf16.msrb.mxu1 %v5198_v22 }
 0x27c   : > { %v3748_v24 = vpop.f32.mrf.mxu3  ;;  %v2812_v20 = vpop.f32.mrf.mxu1 }
 0x27d   : > { %v3803_v54 = vadd.f32 %v3748_v24, %v3149_v43  ;;  %v4299_v11 = vadd.f32 %v4298_v6, %v4268_v48  ;;  %v2864_v46 = vadd.f32 %v2812_v20, %v6276_v30 }
 0x27f   : > { %v3097_v61 = vpop.f32.mrf.mxu2  ;;  %v4201_v12 = vadd.f32 %v4146_v60, %v3803_v54 }
 0x280   : > { %v3150_v23 = vadd.f32 %v3097_v61, %v2863_v33 }
 0x281   : > { %v4237_v7 = vadd.f32 %v6567_v0, %v4201_v12 }
 0x283   : > { %v4269_v32 = vmax.f32 %v4237_v7, 0.0  ;;  %v4149_v14 = vpop.f32.mrf.mxu0 }
 0x284   : > { %v3751_v25 = vpop.f32.mrf.mxu3  ;;  %v2815_v57 = vpop.f32.mrf.mxu1 }
 0x285   : > { %v3804_v1 = vadd.f32 %v3751_v25, %v3150_v23  ;;  %v4300_v38 = vadd.f32 %v4299_v11, %v4269_v32  ;;  %v2865_v59 = vadd.f32 %v2815_v57, %v6297_v17  ;;  %v5337_v17 = vld [vmem:[%s6983_s3 + $0x64] sm:$0xf] }
 0x286   : > { %v5234_v31 = vor.u32 %v5337_v17, %v5231_v9 }
 0x287   : > { %v3099_v52 = vpop.f32.mrf.mxu2  ;;  %v4202_v2 = vadd.f32 %v4149_v14, %v3804_v1 }
 0x288   : > { %v3151_v3 = vadd.f32 %v3099_v52, %v2864_v46  ;;  %4433 = vmatpush.bf16.msrb.mxu2 %v5234_v31 }
 0x289   : > { %v4238_v41 = vadd.f32 %v6567_v0, %v4202_v2 }
 0x28b   : > { %v4270_v34 = vmax.f32 %v4238_v41, 0.0  ;;  %v4151_v30 = vpop.f32.mrf.mxu0 }
 0x28c   : > { %v3753_v29 = vpop.f32.mrf.mxu3  ;;  %v2817_v63 = vpop.f32.mrf.mxu1 }
 0x28d   : > { %v3805_v39 = vadd.f32 %v3753_v29, %v3151_v3  ;;  %v4301_v21 = vadd.f32 %v4300_v38, %v4270_v34  ;;  %v2866_v45 = vadd.f32 %v2817_v63, %v6996_v15  ;;  %v5189_v63 = vld [vmem:[%s6983_s3 + $0x10] sm:$0xf] }
 0x28f   : > { %v3102_v37 = vpop.f32.mrf.mxu2  ;;  %v4203_v36 = vadd.f32 %v4151_v30, %v3805_v39  ;;  %v5328_v39 = vld [vmem:[%s6983_s3 + $0x14] sm:$0xf0] }
 0x290   : > { %v3152_v35 = vadd.f32 %v3102_v37, %v2865_v59 }
 0x291   : > { %v4239_v49 = vadd.f32 %v6567_v0, %v4203_v36 }
 0x293   : > { %v4271_v47 = vmax.f32 %v4239_v49, 0.0  ;;  %v4154_v13 = vpop.f32.mrf.mxu0 }
 0x294   : > { %v3756_v56 = vpop.f32.mrf.mxu3  ;;  %v2820_v44 = vpop.f32.mrf.mxu1 }
 0x295   : > { %v3806_v42 = vadd.f32 %v3756_v56, %v3152_v35  ;;  %v4302_v40 = vadd.f32 %v4301_v21, %v4271_v47  ;;  %v2867_v54 = vadd.f32 %v2820_v44, %v6336_v19  ;;  %v5190_v21 = vor.u32 %v5328_v39, %v5189_v63 }
 0x297   : > { %v3104_v6 = vpop.f32.mrf.mxu2  ;;  %v4204_v33 = vadd.f32 %v4154_v13, %v3806_v42  ;;  %4425 = vmatpush.bf16.msrb.mxu1 %v5190_v21 }
 0x298   : > { %v3153_v26 = vadd.f32 %v3104_v6, %v2866_v45 }
 0x299   : > { %v4240_v43 = vadd.f32 %v6864_v8, %v4204_v33 }
 0x29b   : > { %v4272_v0 = vmax.f32 %v4240_v43, 0.0  ;;  %v4156_v53 = vpop.f32.mrf.mxu0 }
 0x29c   : > { %v3758_v48 = vpop.f32.mrf.mxu3  ;;  %v2822_v60 = vpop.f32.mrf.mxu1 }
 0x29d   : > { %v3807_v24 = vadd.f32 %v3758_v48, %v3153_v26  ;;  %v4303_v20 = vadd.f32 %v4302_v40, %v4272_v0  ;;  %v2868_v1 = vadd.f32 %v2822_v60, %v6359_v18  ;;  %v5335_v18 = vld [vmem:[%s6983_s3 + $0x54] sm:$0xf] }
 0x29e   : > { %v5226_v62 = vor.u32 %v5335_v18, %v5223_v51 }
 0x29f   : > { %v3107_v11 = vpop.f32.mrf.mxu2  ;;  %v4205_v46 = vadd.f32 %v4156_v53, %v3807_v24 }
 0x2a0   : > { %v3154_v61 = vadd.f32 %v3107_v11, %v2867_v54  ;;  %4434 = vmatpush.bf16.msrb.mxu2 %v5226_v62 }
 0x2a1   : > { %v4241_v12 = vadd.f32 %v6864_v8, %v4205_v46 }
 0x2a3   : > { %v4273_v23 = vmax.f32 %v4241_v12, 0.0  ;;  %v4159_v7 = vpop.f32.mrf.mxu0 }
 0x2a4   : > { %v3761_v32 = vpop.f32.mrf.mxu3  ;;  %v2825_v14 = vpop.f32.mrf.mxu1 }
 0x2a5   : > { %v3808_v25 = vadd.f32 %v3761_v32, %v3154_v61  ;;  %v4304_v57 = vadd.f32 %v4303_v20, %v4273_v23  ;;  %v2869_v17 = vadd.f32 %v2825_v14, %v6378_v10 }
 0x2a7   : > { %v3109_v38 = vpop.f32.mrf.mxu2  ;;  %v4206_v59 = vadd.f32 %v4159_v7, %v3808_v25 }
 0x2a8   : > { %v3155_v52 = vadd.f32 %v3109_v38, %v2868_v1 }
 0x2a9   : > { %v4242_v2 = vadd.f32 %v6864_v8, %v4206_v59 }
 0x2ab   : > { %v4274_v3 = vmax.f32 %v4242_v2, 0.0  ;;  %v4161_v19 = vpop.f32.mrf.mxu0  ;;  %v5326_v2 = vld [vmem:[%s6983_s3 + $0x4] sm:$0xf0] }
 0x2ac   : > { %v3763_v41 = vpop.f32.mrf.mxu3  ;;  %v2827_v34 = vpop.f32.mrf.mxu1 }
 0x2ad   : > { %v3809_v30 = vadd.f32 %v3763_v41, %v3155_v52  ;;  %v4305_v29 = vadd.f32 %v4304_v57, %v4274_v3  ;;  %v2870_v44 = vadd.f32 %v2827_v34, %v6398_v58  ;;  %v5181_v52 = vld [vmem:[%s6983_s3] sm:$0xf] }
 0x2ae   : > { %v5182_v3 = vor.u32 %v5326_v2, %v5181_v52  ;;  %v5345_v41 = vld [vmem:[%s6986_s6 + $0x20] sm:$0xff]  ;;  %v5342_v2 = vld [vmem:[%s6986_s6 + $0x8] sm:$0xff] }
 0x2af   : > { %v3112_v22 = vpop.f32.mrf.mxu2  ;;  %v4207_v9 = vadd.f32 %v4161_v19, %v3809_v30  ;;  %v5215_v19 = vld [vmem:[%s6983_s3 + $0x48] sm:$0xf0]  ;;  %4519 = vmatpush.bf16.msrb.mxu3 %v5345_v41 }
 0x2b0   : > { %v3156_v37 = vadd.f32 %v3112_v22, %v2869_v17  ;;  %4426 = vmatpush.bf16.msrb.mxu1 %v5182_v3 }
 0x2b1   : > { %v4243_v36 = vadd.f32 %v6864_v8, %v4207_v9 }
 0x2b3   : > { %v4275_v31 = vmax.f32 %v4243_v36, 0.0  ;;  %v4164_v35 = vpop.f32.mrf.mxu0 }
 0x2b4   : > { %v3766_v49 = vpop.f32.mrf.mxu3  ;;  %v2830_v47 = vpop.f32.mrf.mxu1 }
 0x2b5   : > { %v3810_v13 = vadd.f32 %v3766_v49, %v3156_v37  ;;  %v4306_v56 = vadd.f32 %v4305_v29, %v4275_v31  ;;  %v2871_v53 = vadd.f32 %v2830_v47, %v6417_v55 }
 0x2b7   : > { %v3114_v42 = vpop.f32.mrf.mxu2  ;;  %v4208_v40 = vadd.f32 %v4164_v35, %v3810_v13 }
 0x2b8   : > { %v3157_v10 = vadd.f32 %v3114_v42, %v2870_v44  ;;  %v5331_v42 = vld [vmem:[%s6983_s3 + $0x34] sm:$0xf] }
 0x2b9   : > { %v4244_v15 = vadd.f32 %v6864_v8, %v4208_v40  ;;  %v5207_v40 = vld [vmem:[%s6983_s3 + $0x38] sm:$0xf0] }
 0x2bb   : > { %v4276_v45 = vmax.f32 %v4244_v15, 0.0  ;;  %v4166_v6 = vpop.f32.mrf.mxu0 }
 0x2bc   : > { %v3768_v33 = vpop.f32.mrf.mxu3  ;;  %v2832_v26 = vpop.f32.mrf.mxu1 }
 0x2bd   : > { %v3811_v43 = vadd.f32 %v3768_v33, %v3157_v10  ;;  %v4307_v0 = vadd.f32 %v4306_v56, %v4276_v45  ;;  %v2872_v23 = vadd.f32 %v2832_v26, %v6440_v27  ;;  %v5333_v27 = vld [vmem:[%s6983_s3 + $0x44] sm:$0xf] }
 0x2be   : > { %v5218_v63 = vor.u32 %v5333_v27, %v5215_v19  ;;  %v5329_v26 = vld [vmem:[%s6983_s3 + $0x24] sm:$0xf] }
 0x2bf   : > { %v3117_v48 = vpop.f32.mrf.mxu2  ;;  %v4209_v60 = vadd.f32 %v4166_v6, %v3811_v43  ;;  %v5199_v43 = vld [vmem:[%s6983_s3 + $0x28] sm:$0xf0]  ;;  %v5341_v19 = vld [vmem:[%s6986_s6] sm:$0xff] }
 0x2c0   : > { %v3158_v24 = vadd.f32 %v3117_v48, %v2871_v53  ;;  %4435 = vmatpush.bf16.msrb.mxu2 %v5218_v63 }
 0x2c1   : > { %v4245_v20 = vadd.f32 %v6864_v8, %v4209_v60  ;;  %v5191_v60 = vld [vmem:[%s6983_s3 + $0x18] sm:$0xf0] }
 0x2c3   : > { %v4277_v54 = vmax.f32 %v4245_v20, 0.0  ;;  %v4169_v58 = vpop.f32.mrf.mxu0 }
 0x2c4   : > { %v3771_v11 = vpop.f32.mrf.mxu3  ;;  %v2835_v12 = vpop.f32.mrf.mxu1 }
 0x2c5   : > { %v3812_v46 = vadd.f32 %v3771_v11, %v3158_v24  ;;  %v4308_v61 = vadd.f32 %v4307_v0, %v4277_v54  ;;  %v2873_v34 = vadd.f32 %v2835_v12, %v6460_v16  ;;  %v5202_v0 = vor.u32 %v5329_v26, %v5199_v43 }
 0x2c7   : > { %v3119_v7 = vpop.f32.mrf.mxu2  ;;  %v4210_v32 = vadd.f32 %v4169_v58, %v3812_v46  ;;  %v5325_v46 = vld [vmem:[%s6983_s3 + $0x4] sm:$0xf] }
 0x2c8   : > { %v3159_v14 = vadd.f32 %v3119_v7, %v2872_v23 }
 0x2c9   : > { %v4246_v25 = vadd.f32 %v6864_v8, %v4210_v32  ;;  %v5344_v32 = vld [vmem:[%s6986_s6 + $0x18] sm:$0xff] }
 0x2ca   : > { %4520 = vmatpush.bf16.msrb.mxu3 %v5344_v32 }
 0x2cb   : > { %v4278_v57 = vmax.f32 %v4246_v25, 0.0  ;;  %v4171_v55 = vpop.f32.mrf.mxu0 }
 0x2cc   : > { %v3773_v1 = vpop.f32.mrf.mxu3  ;;  %v2837_v39 = vpop.f32.mrf.mxu1 }
 0x2cd   : > { %v3813_v38 = vadd.f32 %v3773_v1, %v3159_v14  ;;  %v4309_v59 = vadd.f32 %v4308_v61, %v4278_v57  ;;  %v2874_v62 = vadd.f32 %v2837_v39, %v6484_v50  ;;  %v5210_v50 = vor.u32 %v5331_v42, %v5207_v40  ;;  %v5183_v61 = vld [vmem:[%s6983_s3 + $0x8] sm:$0xf0] }
 0x2ce   : > { %v5186_v14 = vor.u32 %v5325_v46, %v5183_v61 }
 0x2cf   : > { %v3122_v30 = vpop.f32.mrf.mxu2  ;;  %v4211_v29 = vadd.f32 %v4171_v55, %v3813_v38  ;;  %4436 = vmatpush.bf16.msrb.mxu2 %v5210_v50  ;;  %v5343_v55 = vld [vmem:[%s6986_s6 + $0x10] sm:$0xff] }
 0x2d0   : > { %v3160_v18 = vadd.f32 %v3122_v30, %v2873_v34  ;;  %4521 = vmatpush.bf16.msrb.mxu3 %v5343_v55 }
 0x2d1   : > { %v4247_v21 = vadd.f32 %v6864_v8, %v4211_v29 }
 0x2d3   : > { %v4279_v51 = vmax.f32 %v4247_v21, 0.0  ;;  %v4174_v5 = vpop.f32.mrf.mxu0  ;;  %4437 = vmatpush.bf16.msrb.mxu2 %v5202_v0 }
 0x2d4   : > { %v3776_v17 = vpop.f32.mrf.mxu3  ;;  %v2840_v35 = vpop.f32.mrf.mxu1  ;;  %4522 = vmatpush.bf16.msrb.mxu3 %v5342_v2 }
 0x2d5   : > { %v3814_v22 = vadd.f32 %v3776_v17, %v3160_v18  ;;  %v4310_v9 = vadd.f32 %v4309_v59, %v4279_v51  ;;  %v2875_v10 = vadd.f32 %v2840_v35, %v6506_v4  ;;  %v5327_v4 = vld [vmem:[%s6983_s3 + $0x14] sm:$0xf]  ;;  %v4529_v18 = vlaneseq }
 0x2d6   : > { %v5194_v54 = vor.u32 %v5327_v4, %v5191_v60 }
 0x2d7   : > { %v3124_v37 = vpop.f32.mrf.mxu2  ;;  %v4212_v36 = vadd.f32 %v4174_v5, %v3814_v22  ;;  %vm6958_vm8 = vcmp.lt.s32.totalorder %v4529_v18, 128  ;;  %v4445_v22 = vld [vmem:[%s6984_s4] sm:$0x1] }
 0x2d8   : > { %v3161_v16 = vadd.f32 %v3124_v37, %v2874_v62  ;;  %4438 = vmatpush.bf16.msrb.mxu2 %v5194_v54  ;;  %4523 = vmatpush.bf16.msrb.mxu3 %v5341_v19 }
 0x2d9   : > { %v4248_v31 = vadd.f32 %v6864_v8, %v4212_v36  ;;  %v4448_v36 = vld [vmem:[%s6985_s5] sm:$0x1] }
 0x2db   : > { %v4280_v49 = vmax.f32 %v4248_v31, 0.0  ;;  %v4176_v47 = vpop.f32.mrf.mxu0 }
 0x2dc   : > { %v3778_v13 = vpop.f32.mrf.mxu3  ;;  %v2842_v20 = vpop.f32.mrf.mxu1  ;;  %4439 = vmatpush.bf16.msrb.mxu2 %v5186_v14 }
 0x2dd   : > { %v3815_v56 = vadd.f32 %v3778_v13, %v3161_v16  ;;  %v4311_v44 = vadd.f32 %v4310_v9, %v4280_v49  ;;  %v2876_v12 = vadd.f32 %v2842_v20, %v6537_v28  ;;  %v4467_v13 = vld [vmem:[%s6987_s7] sm:$0x1] }
 0x2df   : > { %v3127_v15 = vpop.f32.mrf.mxu2  ;;  %v4213_v45 = vadd.f32 %v4176_v47, %v3815_v56 }
 0x2e0   : > { %v3162_v6 = vadd.f32 %v3127_v15, %v2875_v10 }
 0x2e1   : > { %v4249_v33 = vadd.f32 %v6864_v8, %v4213_v45 }
 0x2e3   : > { %v4281_v53 = vmax.f32 %v4249_v33, 0.0  ;;  %v4179_v48 = vpop.f32.mrf.mxu0 }
 0x2e4   : > { %v3781_v24 = vpop.f32.mrf.mxu3 }
 0x2e5   : > { %v3816_v58 = vadd.f32 %v3781_v24, %v3162_v6  ;;  %v4312_v11 = vadd.f32 %v4311_v44, %v4281_v53 }
 0x2e7   : > { %v3129_v23 = vpop.f32.mrf.mxu2  ;;  %v4214_v7 = vadd.f32 %v4179_v48, %v3816_v58 }
 0x2e8   : > { %v3163_v25 = vadd.f32 %v3129_v23, %v2876_v12 }
 0x2e9   : > { %v4250_v57 = vadd.f32 %v6864_v8, %v4214_v7 }
 0x2eb   : > { %v4282_v1 = vmax.f32 %v4250_v57, 0.0  ;;  %v4181_v59 = vpop.f32.mrf.mxu0 }
 0x2ec   : > { %v3783_v38 = vpop.f32.mrf.mxu3 }
 0x2ed   : > { %v3817_v28 = vadd.f32 %v3783_v38, %v3163_v25  ;;  %v4313_v52 = vadd.f32 %v4312_v11, %v4282_v1 }
 0x2ef   : > { %v4215_v27 = vadd.f32 %v4181_v59, %v3817_v28 }
 0x2f1   : > { %v4251_v3 = vadd.f32 %v6864_v8, %v4215_v27 }
 0x2f3   : > { %v4283_v41 = vmax.f32 %v4251_v3, 0.0 }
 0x2f5   : > { %v4314_v34 = vadd.f32 %v4313_v52, %v4283_v41 }
 0x2f7   : > { %v4315_v30 = vrot.slane %v4314_v34, 4 }
 0x2f9   : > { %v4316_v29 = vadd.f32 %v4315_v30, %v4314_v34 }
 0x2fb   : > { %v4317_v63 = vrot.slane %v4316_v29, 2 }
 0x2fd   : > { %v4318_v39 = vadd.f32 %v4317_v63, %v4316_v29 }
 0x2ff   : > { %v4319_v21 = vrot.slane %v4318_v39, 1 }
 0x301   : > { %v4320_v51 = vadd.f32 %v4319_v21, %v4318_v39 }
 0x303   : > { %v4321_v5 = vmul.f32 0.00390625, %v4320_v51 }
 0x305   : > { %v4322_v17 = vpack.c.bf16 %v4321_v5, %v4321_v5  ;;  %4533 = vst.msk [vmem:[%s303_s16] sm:$0x1] %vm6958_vm8, %v4321_v5 }
 0x307   : > { %4427 = vmatmul.bf16.vlgmr.msrb.gmra.mxu1 %v4322_v17  ;;  %4440 = vmatmul.bf16.vlgmr.msrb.gmra.mxu2 %v4322_v17 }
 0x384   : > { %v4428_v9 = vpop.f32.mrf.mxu1 }
 0x385   : > { %v4446_v62 = vadd.f32 %v4445_v22, %v4428_v9 }
 0x387   : > { %v4447_v37 = vmax.f32 %v4446_v62, 0.0 }
 0x389   : > { %v4450_v16 = vpack.c.bf16 %v4447_v37, %v4447_v37 }
 0x38a   : > { %v4441_v31 = vpop.f32.mrf.mxu2 }
 0x38b   : > { %v4449_v35 = vadd.f32 %v4448_v36, %v4441_v31  ;;  %4524 = vmatmul.bf16.vlgmr.msrb.gmra.mxu3 %v4450_v16 }
 0x38c   : > { %v4430_v49 = vpop.f32.mrf.mxu1 }
 0x38d   : > { %4535 = vst.msk [vmem:[%s303_s16 + $0x2] sm:$0x1] %vm6958_vm8, %v4449_v35 }
 0x392   : > { %v4443_v47 = vpop.f32.mrf.mxu2 }
 0x40e   : > { %v4525_v56 = vpop.f32.mrf.mxu3 }
 0x40f   : > { %v4526_v44 = vadd.f32 %v4525_v56, %v4467_v13 }
 0x411   : > { %4534 = vst.msk [vmem:[%s303_s16 + $0x1] sm:$0x1] %vm6958_vm8, %v4526_v44 }
 0x416   : > { %v4527_v42 = vpop.f32.mrf.mxu3 }
 0x417 PF: > { %s18_s27 = sadd.s32 1, %s5420_s27  }
 0x418   : > { %p15_p4 = scmp.ge.s32.totalorder %s18_s27, 4  }
 0x41a   :  { %17 = sbr.rel (!%p15_p4) target bundleno = 1 (0x1), region = 92 }

</bundles_post_ra>
